<compile_context>
chip_gen: v6e
topology: v6e:2x2x1
jax: 0.10.0
libtpu: 0.0.40
codegen_flags: <defaults>
</compile_context>

<pallas_src>
import functools

import numpy as np
import jax
import jax.numpy as jnp
from jax.experimental import pallas as pl
from jax.experimental.pallas import tpu as pltpu

# ----------------------- model configuration (small, synthetic) ----------------
R_MAX = 3.0
NUM_BESSEL = 8
NUM_POLY_CUTOFF = 5
MAX_ELL = 2
N_LM = (MAX_ELL + 1) ** 2          # 9 spherical-harmonic components
NUM_INTERACTIONS = 2
NUM_ELEMENTS = 4
HIDDEN_CH = 16                     # hidden_irreps ~ "16x0e + 16x1o + 16x2e"
MLP_HIDDEN = 16                    # MLP_irreps = "16x0e"
AVG_NUM_NEIGHBORS = 8.0
DIM = N_LM * HIDDEN_CH             # 144
EDGE_TILE = 256                    # edge-axis tile (sized for v7x's 64 MiB VMEM)

F32 = jnp.float32
BF16 = jnp.bfloat16


def _round_up(x, m):
    return ((x + m - 1) // m) * m


# ----------------------------- Pallas kernel bodies ----------------------------
def _embed_kernel(attrs_ref, bgraphT_ref, wemb_ref, ae_ref, h_ref, e0_ref):
    # node embedding (scalar channels, already padded to DIM columns) + e0 graph sum
    attrs = attrs_ref[...]                                                        # [N, Z] f32
    h_ref[...] = jnp.dot(attrs.astype(BF16), wemb_ref[...],
                         preferred_element_type=F32)                             # bf16 MXU
    node_e0 = jnp.dot(attrs, ae_ref[...], preferred_element_type=F32)            # [N, 1] f32 (exact)
    e0_ref[...] = jnp.dot(bgraphT_ref[...], node_e0, preferred_element_type=F32)  # [G, 1]


def _edge_kernel(vec_ref, freq_ref, wr1_ref, wr2_ref, expand_ref, she_ref, tpw_ref):
    v = vec_ref[...]                                              # [TE, 3] f32
    r2 = jnp.sum(v * v, axis=-1, keepdims=True)                   # [TE, 1]
    inv_r = jax.lax.rsqrt(jnp.maximum(r2, 1e-12))                 # EUP slot, zero-length guarded
    r = r2 * inv_r
    vx = v[:, 0:1] * inv_r
    vy = v[:, 1:2] * inv_r
    vz = v[:, 2:3] * inv_r
    one = jnp.ones_like(vx)
    s3 = 3.0 ** 0.5
    s5 = 5.0 ** 0.5
    s15 = 15.0 ** 0.5
    # real spherical harmonics, 'component' normalization, on normalized vectors
    sh = jnp.concatenate(
        [one,
         s3 * vy, s3 * vz, s3 * vx,
         s15 * vx * vy, s15 * vy * vz,
         (s5 / 2.0) * (3.0 * vz * vz - 1.0),
         s15 * vx * vz, (s15 / 2.0) * (vx * vx - vy * vy)], axis=1)   # [TE, N_LM]
    # lm-expand once (bf16 MXU, exact 0/1 structure) -> lane-dense bf16 [TE, DIM]
    she_ref[...] = jnp.dot(sh.astype(BF16), expand_ref[...],
                           preferred_element_type=F32).astype(BF16)

    # Bessel radial basis * polynomial cutoff (RadialEmbeddingBlock), all f32 VPU
    freqs = freq_ref[...]                                          # [1, NUM_BESSEL]
    pref = (2.0 / R_MAX) ** 0.5
    bess = pref * jnp.sin(r * freqs) * inv_r
    u = r / R_MAX
    p = NUM_POLY_CUTOFF
    f = (1.0
         - 0.5 * (p + 1.0) * (p + 2.0) * u ** p
         + p * (p + 2.0) * u ** (p + 1)
         - 0.5 * p * (p + 1.0) * u ** (p + 2))
    f = f * (u < 1.0).astype(F32)
    edge_feats = bess * f                                          # [TE, NUM_BESSEL]

    # radial MLPs of ALL interaction layers fused; 1/avg_num_neighbors is folded
    # into wr2 at pack time. bf16 operands, f32 accumulate, bf16 output.
    hidden = jax.nn.silu(jnp.dot(edge_feats.astype(BF16), wr1_ref[...],
                                 preferred_element_type=F32))
    tpw_ref[...] = jnp.dot(hidden.astype(BF16), wr2_ref[...],
                           preferred_element_type=F32).astype(BF16)   # [TE, L*C]


def _layer_kernel(h_ref, attrs_ref, bgraphT_ref,
                  s_ref, rT_ref, she_ref, tpw_ref,
                  wup_ref, sel0_ref, sumhi_ref, tilec_ref,
                  wout_ref, wskip_ref, welem_ref, wroa_ref, wrob_ref,
                  hout_ref, en_ref,
                  hup_scr, agg_scr, *, nonlinear_readout):
    first = pl.program_id(0) == 0
    last = pl.program_id(0) == pl.num_programs(0) - 1

    @pl.when(first)
    def _():
        # linear_up (block-diag per-l mixing, weight pre-packed), computed and
        # cast to bf16 exactly once; held resident across all edge blocks.
        hup_scr[...] = jnp.dot(h_ref[...].astype(BF16), wup_ref[...],
                               preferred_element_type=F32).astype(BF16)
        agg_scr[...] = jnp.zeros_like(agg_scr)

    # ---- per-edge-block message tensor product + scatter-sum (reduction axis) ----
    # sender gather as one-hot matmul (bf16 operands, f32 accumulate)
    h_s = jnp.dot(s_ref[...], hup_scr[...], preferred_element_type=F32)           # [TE, DIM] f32
    sh_f = she_ref[...].astype(F32)                                               # VPU math in f32
    # tile this layer's radial weights across lm (exact 0/1 structure matmul, bf16)
    tpw_e = jnp.dot(tpw_ref[...], tilec_ref[...], preferred_element_type=F32)     # [TE, DIM]
    # uvu tensor product, fully lane-dense:
    #   col lm*C+c (lm>=1): h0[c] * Y_lm * tpw[c]
    #   col c      (lm=0) : (sum_lm h[lm,c] * Y_lm) * tpw[c]
    # TODO(synk): full e3nn Clebsch-Gordan paths (1o x 1o -> 1e, ...) omitted.
    h0_e = jnp.dot(h_s.astype(BF16), sel0_ref[...], preferred_element_type=F32)   # tile l=0 block
    a = h_s * sh_f
    hi = jnp.dot(a.astype(BF16), sumhi_ref[...], preferred_element_type=F32)
    msg = (h0_e * sh_f + hi) * tpw_e                 # 1/avg_num_neighbors folded into tpw
    # receiver scatter-sum: pre-transposed one-hot, plain A @ B (bf16 MXU, f32 acc)
    agg_scr[...] += jnp.dot(rT_ref[...], msg.astype(BF16), preferred_element_type=F32)

    @pl.when(last)
    def _():
        # node update: three accumulating bf16 matmuls (no materialized concat)
        h_new = (jnp.dot(agg_scr[...].astype(BF16), wout_ref[...],
                         preferred_element_type=F32)
                 + jnp.dot(h_ref[...].astype(BF16), wskip_ref[...],
                           preferred_element_type=F32)
                 + jnp.dot(attrs_ref[...], welem_ref[...],
                           preferred_element_type=F32))                           # [N, DIM]
        hout_ref[...] = h_new
        # readout (linear or gated MLP) fused in, then per-graph energy sum
        pre = jnp.dot(h_new.astype(BF16), wroa_ref[...], preferred_element_type=F32)
        if nonlinear_readout:
            node_en = jnp.dot(jax.nn.silu(pre).astype(BF16), wrob_ref[...],
                              preferred_element_type=F32)                         # [N, 1]
        else:
            node_en = pre                                                         # [N, 1]
        en_ref[...] = jnp.dot(bgraphT_ref[...], node_en,
                              preferred_element_type=F32)                         # [G, 1]


# ------------------------------ Pallas wrappers --------------------------------
def embed(attrs_p, bgraph_t, w_embed_full, atomic_energies):
    n_pad, z = attrs_p.shape
    g = bgraph_t.shape[0]
    return pl.pallas_call(
        _embed_kernel,
        grid=(1,),
        in_specs=[pl.BlockSpec((n_pad, z), lambda i: (0, 0)),
                  pl.BlockSpec((g, n_pad), lambda i: (0, 0)),
                  pl.BlockSpec((z, DIM), lambda i: (0, 0)),
                  pl.BlockSpec((z, 1), lambda i: (0, 0))],
        out_specs=(pl.BlockSpec((n_pad, DIM), lambda i: (0, 0)),
                   pl.BlockSpec((g, 1), lambda i: (0, 0))),
        out_shape=(jax.ShapeDtypeStruct((n_pad, DIM), F32),
                   jax.ShapeDtypeStruct((g, 1), F32)),
    )(attrs_p, bgraph_t, w_embed_full, atomic_energies)


def edge_features(vec_p, freqs, w_r1_cat, w_r2_bd, expand_sh, *, te):
    e_pad = vec_p.shape[0]
    lmh = w_r1_cat.shape[1]
    lc = w_r2_bd.shape[1]
    nblk = e_pad // te
    return pl.pallas_call(
        _edge_kernel,
        grid=(nblk,),
        in_specs=[pl.BlockSpec((te, 3), lambda i: (i, 0)),
                  pl.BlockSpec((1, NUM_BESSEL), lambda i: (0, 0)),
                  pl.BlockSpec((NUM_BESSEL, lmh), lambda i: (0, 0)),
                  pl.BlockSpec((lmh, lc), lambda i: (0, 0)),
                  pl.BlockSpec((N_LM, DIM), lambda i: (0, 0))],
        out_specs=(pl.BlockSpec((te, DIM), lambda i: (i, 0)),
                   pl.BlockSpec((te, lc), lambda i: (i, 0))),
        out_shape=(jax.ShapeDtypeStruct((e_pad, DIM), BF16),
                   jax.ShapeDtypeStruct((e_pad, lc), BF16)),
        compiler_params=pltpu.CompilerParams(
            dimension_semantics=("parallel",)),
    )(vec_p, freqs, w_r1_cat, w_r2_bd, expand_sh)


def interaction_layer(h, attrs_pb, bgraph_t, s_onehot, r_onehot_t, sh_e, tpw_all,
                      w_up_bd, sel0, sum_hi, tile_c, w_out, w_skip, w_elem,
                      w_ro_a, w_ro_b, *, nonlinear, te):
    n_pad, d = h.shape
    z = attrs_pb.shape[1]
    g = bgraph_t.shape[0]
    e_pad = s_onehot.shape[0]
    lc = tpw_all.shape[1]
    kro = w_ro_a.shape[1]
    nblk = e_pad // te

    kernel = functools.partial(_layer_kernel, nonlinear_readout=nonlinear)
    return pl.pallas_call(
        kernel,
        grid=(nblk,),
        in_specs=[
            pl.BlockSpec((n_pad, d), lambda i: (0, 0)),        # h (resident, f32)
            pl.BlockSpec((n_pad, z), lambda i: (0, 0)),        # node attrs (bf16 one-hot)
            pl.BlockSpec((g, n_pad), lambda i: (0, 0)),        # batch one-hot, pre-transposed
            pl.BlockSpec((te, n_pad), lambda i: (i, 0)),       # sender one-hot (bf16)
            pl.BlockSpec((n_pad, te), lambda i: (0, i)),       # receiver one-hot^T (bf16)
            pl.BlockSpec((te, d), lambda i: (i, 0)),           # lm-expanded sh (bf16)
            pl.BlockSpec((te, lc), lambda i: (i, 0)),          # radial weights, all layers (bf16)
            pl.BlockSpec((d, d), lambda i: (0, 0)),            # w_up (block-diag, bf16)
            pl.BlockSpec((d, d), lambda i: (0, 0)),            # sel0 structure (bf16)
            pl.BlockSpec((d, d), lambda i: (0, 0)),            # sum_hi structure (bf16)
            pl.BlockSpec((lc, d), lambda i: (0, 0)),           # tile_c structure (bf16)
            pl.BlockSpec((d, d), lambda i: (0, 0)),            # w_out (bf16)
            pl.BlockSpec((d, d), lambda i: (0, 0)),            # w_skip (bf16)
            pl.BlockSpec((z, d), lambda i: (0, 0)),            # w_elem (bf16)
            pl.BlockSpec((d, kro), lambda i: (0, 0)),          # readout A (bf16)
            pl.BlockSpec((kro, 1), lambda i: (0, 0)),          # readout B (bf16)
        ],
        out_specs=(pl.BlockSpec((n_pad, d), lambda i: (0, 0)),
                   pl.BlockSpec((g, 1), lambda i: (0, 0))),
        out_shape=(jax.ShapeDtypeStruct((n_pad, d), F32),
                   jax.ShapeDtypeStruct((g, 1), F32)),
        scratch_shapes=[pltpu.VMEM((n_pad, d), BF16),          # h_up (bf16, cast once)
                        pltpu.VMEM((n_pad, d), F32)],          # agg accumulator (f32)
        compiler_params=pltpu.CompilerParams(
            dimension_semantics=("arbitrary",)),               # edge axis is a reduction
    )(h, attrs_pb, bgraph_t, s_onehot, r_onehot_t, sh_e, tpw_all,
      w_up_bd, sel0, sum_hi, tile_c, w_out, w_skip, w_elem, w_ro_a, w_ro_b)


# ------------------------------- parameters ------------------------------------
def init_params(key):
    keys = iter(jax.random.split(key, 64))

    def w(shape, fan_in):
        return jax.random.normal(next(keys), shape, F32) / jnp.sqrt(float(fan_in))

    C = HIDDEN_CH
    params = {
        "atomic_energies": (-jnp.arange(1, NUM_ELEMENTS + 1, dtype=F32)).reshape(NUM_ELEMENTS, 1),
        "w_embed": w((NUM_ELEMENTS, C), NUM_ELEMENTS),
        "layers": [],
        "w_ro0": w((C, 1), C),                 # LinearReadoutBlock
        "w_ro1_a": w((C, MLP_HIDDEN), C),      # NonLinearReadoutBlock (gate = silu)
        "w_ro1_b": w((MLP_HIDDEN, 1), MLP_HIDDEN),
    }
    for _ in range(NUM_INTERACTIONS):
        params["layers"].append({
            "w_up": [w((C, C), C) for _ in range(MAX_ELL + 1)],     # per-l o3.Linear
            "w_r1": w((NUM_BESSEL, MLP_HIDDEN), NUM_BESSEL),        # radial MLP
            "w_r2": w((MLP_HIDDEN, C), MLP_HIDDEN),
            "w_out": [w((C, C), C) for _ in range(MAX_ELL + 1)],    # per-l o3.Linear
            "w_skip": [w((C, C), C) for _ in range(MAX_ELL + 1)],   # residual mixing
            "w_elem": w((NUM_ELEMENTS, C), NUM_ELEMENTS),           # attr skip (scalars)
        })
    return params


def _structure_matrices():
    """0/1 matrices that lm-expand / lm-reduce channel blocks (exact in bf16)."""
    C = HIDDEN_CH
    expand_sh = np.zeros((N_LM, DIM), np.float32)       # Y_lm -> tiled across C channels
    sel0 = np.zeros((DIM, DIM), np.float32)             # tile the l=0 block across all lm
    sum_hi = np.zeros((DIM, DIM), np.float32)           # per-channel sum over lm>=1 into lm=0 block
    for lm in range(N_LM):
        expand_sh[lm, lm * C:(lm + 1) * C] = 1.0
        for c in range(C):
            sel0[c, lm * C + c] = 1.0
            if lm >= 1:
                sum_hi[lm * C + c, c] = 1.0
    return (jnp.asarray(expand_sh, BF16), jnp.asarray(sel0, BF16), jnp.asarray(sum_hi, BF16))


def pack_params(raw):
    """One-time packing of per-l weights into block-diag / stacked MXU-friendly bf16 forms."""
    C = HIDDEN_CH

    def blockdiag_per_l(w_per_l):
        mats = []
        for l, wl in enumerate(w_per_l):
            mats.extend([wl] * (2 * l + 1))
        return jax.scipy.linalg.block_diag(*mats)            # [DIM, DIM]

    expand_sh, sel0, sum_hi = _structure_matrices()
    packed = {
        "atomic_energies": raw["atomic_energies"],            # f32 (exact e0 path)
        "w_embed_full": jnp.zeros((NUM_ELEMENTS, DIM), F32).at[:, :C]
                        .set(raw["w_embed"]).astype(BF16),
        "w_r1_cat": jnp.concatenate([lw["w_r1"] for lw in raw["layers"]], axis=1).astype(BF16),
        # 1 / avg_num_neighbors folded into the radial-MLP output weight (free).
        "w_r2_bd": (jax.scipy.linalg.block_diag(*[lw["w_r2"] for lw in raw["layers"]])
                    * (1.0 / AVG_NUM_NEIGHBORS)).astype(BF16),
        "w_ro0_full": jnp.zeros((DIM, 1), F32).at[:C, :].set(raw["w_ro0"]).astype(BF16),
        "w_ro1_a_full": jnp.zeros((DIM, MLP_HIDDEN), F32).at[:C, :].set(raw["w_ro1_a"]).astype(BF16),
        "w_ro1_b": raw["w_ro1_b"].astype(BF16),
        "expand_sh": expand_sh,
        "sel0": sel0,
        "sum_hi": sum_hi,
        "layers": [],
    }
    for li, lw in enumerate(raw["layers"]):
        tile_c = np.zeros((NUM_INTERACTIONS * C, DIM), np.float32)
        for lm in range(N_LM):
            for c in range(C):
                tile_c[li * C + c, lm * C + c] = 1.0
        packed["layers"].append({
            "w_up_bd": blockdiag_per_l(lw["w_up"]).astype(BF16),
            "w_out_bd": blockdiag_per_l(lw["w_out"]).astype(BF16),
            "w_skip_bd": blockdiag_per_l(lw["w_skip"]).astype(BF16),
            "w_elem_full": jnp.zeros((NUM_ELEMENTS, DIM), F32).at[:, :C]
                           .set(lw["w_elem"]).astype(BF16),
            "tile_c": jnp.asarray(tile_c, BF16),
        })
    return packed


# --------------------------------- forward -------------------------------------
def forward(packed, node_attrs, positions, edge_index, shifts, batch, num_graphs):
    n_nodes, n_elem = node_attrs.shape
    n_edges = edge_index.shape[1]

    n_pad = _round_up(n_nodes, 8)
    # Edge tile te always divides e_pad: pad the edge set UP to a multiple of te
    # (never fall back to one monolithic tile).
    e_min = max(n_edges, 8)
    te = EDGE_TILE if e_min > EDGE_TILE else _round_up(e_min, 8)
    e_pad = _round_up(e_min, te)

    # ---- glue: padding + one-hot gather/scatter matrices ----
    attrs_p = jnp.zeros((n_pad, n_elem), F32).at[:n_nodes].set(node_attrs.astype(F32))
    attrs_pb = attrs_p.astype(BF16)                                        # exact one-hot
    sender, receiver = edge_index[0], edge_index[1]
    vectors = positions[receiver] - positions[sender] + shifts             # [E, 3]
    pad_vec = jnp.tile(jnp.array([[1.0, 0.0, 0.0]], F32), (e_pad - n_edges, 1))
    vec_p = jnp.concatenate([vectors.astype(F32), pad_vec], axis=0)        # finite for pad edges
    # one-hots in bf16 (exact 0/1); padded edge rows are all-zero so they contribute nothing.
    # receiver one-hot pre-transposed so the scatter-sum is a plain A @ B in-kernel.
    s_onehot = jnp.zeros((e_pad, n_pad), BF16).at[jnp.arange(n_edges), sender].set(1.0)
    r_onehot_t = jnp.zeros((n_pad, e_pad), BF16).at[receiver, jnp.arange(n_edges)].set(1.0)
    bgraph_t = jnp.zeros((num_graphs, n_pad), F32).at[batch, jnp.arange(n_nodes)].set(1.0)
    freqs = (jnp.arange(1, NUM_BESSEL + 1, dtype=F32) * jnp.pi / R_MAX).reshape(1, NUM_BESSEL)

    # ---- fused: e0 graph-sum + node embedding ----
    h, e0 = embed(attrs_p, bgraph_t, packed["w_embed_full"], packed["atomic_energies"])

    # ---- fused, edge-tiled: geometry + sh + radial embedding + radial MLPs (all layers) ----
    sh_e, tpw_all = edge_features(vec_p, freqs, packed["w_r1_cat"], packed["w_r2_bd"],
                                  packed["expand_sh"], te=te)

    energies = [e0[:, 0]]
    for li, lw in enumerate(packed["layers"]):
        nonlinear = (li == NUM_INTERACTIONS - 1)
        if nonlinear:
            w_ro_a, w_ro_b = packed["w_ro1_a_full"], packed["w_ro1_b"]
        else:
            w_ro_a, w_ro_b = packed["w_ro0_full"], jnp.ones((1, 1), BF16)  # B unused (linear)
        h, en = interaction_layer(
            h, attrs_pb, bgraph_t, s_onehot, r_onehot_t, sh_e, tpw_all,
            lw["w_up_bd"], packed["sel0"], packed["sum_hi"], lw["tile_c"],
            lw["w_out_bd"], lw["w_skip_bd"], lw["w_elem_full"], w_ro_a, w_ro_b,
            nonlinear=nonlinear, te=te)
        energies.append(en[:, 0])

    contributions = jnp.stack(energies, axis=-1)                          # [G, num_interactions+1]
    total_energy = jnp.sum(contributions, axis=-1)                        # [G]
    # TODO(synk): compute_forces = -dE/d(positions) needs custom VJPs for the Pallas kernels;
    # returning zeros instead of faking gradients.
    forces = jnp.zeros_like(positions)
    return {"energy": total_energy, "contributions": contributions, "forces": forces}


# ----------------------------------- main ---------------------------------------
if __name__ == "__main__":
    key = jax.random.PRNGKey(0)
    k_params, k_pos = jax.random.split(key)
    params = pack_params(init_params(k_params))

    n_per_graph = 6
    num_graphs = 2
    n_nodes = n_per_graph * num_graphs
    node_types = jnp.arange(n_nodes) % NUM_ELEMENTS
    node_attrs = jax.nn.one_hot(node_types, NUM_ELEMENTS, dtype=F32)       # [12, 4]
    positions = jax.random.normal(k_pos, (n_nodes, 3), F32) * 1.5          # [12, 3]
    batch = jnp.repeat(jnp.arange(num_graphs), n_per_graph)                # [12]

    # fully-connected (no self loops) edges within each graph
    senders, receivers = [], []
    for g in range(num_graphs):
        for a in range(n_per_graph):
            for b in range(n_per_graph):
                if a != b:
                    senders.append(g * n_per_graph + a)
                    receivers.append(g * n_per_graph + b)
    edge_index = jnp.array([senders, receivers], dtype=jnp.int32)          # [2, 60]
    shifts = jnp.zeros((edge_index.shape[1], 3), F32)

    fwd = jax.jit(functools.partial(forward, num_graphs=num_graphs))
    out = fwd(params, node_attrs, positions, edge_index, shifts, batch)
    jax.block_until_ready(out)

    assert out["energy"].shape == (num_graphs,)
    assert out["contributions"].shape == (num_graphs, NUM_INTERACTIONS + 1)
    assert out["forces"].shape == positions.shape
    assert bool(jnp.all(jnp.isfinite(out["energy"])))
    assert bool(jnp.all(jnp.isfinite(out["contributions"])))
    print("KERNEL_OK")
</pallas_src>

<mosaic_0001>
module attributes {stable_mosaic.version = 11 : i64} {
  func.func @_edge_kernel(%arg0: i32, %arg1: memref<64x3xf32, #tpu.memory_space<vmem>>, %arg2: memref<1x8xf32, #tpu.memory_space<vmem>>, %arg3: memref<8x32xbf16, #tpu.memory_space<vmem>>, %arg4: memref<32x32xbf16, #tpu.memory_space<vmem>>, %arg5: memref<9x144xbf16, #tpu.memory_space<vmem>>, %arg6: memref<64x144xbf16, #tpu.memory_space<vmem>>, %arg7: memref<64x32xbf16, #tpu.memory_space<vmem>>) attributes {dimension_semantics = [#tpu.dimension_semantics<parallel>], iteration_bounds = array<i64: 1>, scalar_prefetch = 0 : i64, scratch_operands = 0 : i64, tpu.core_type = #tpu.core_type<tc>, window_params = [{transform_indices = @transform_0, window_bounds = array<i64: 64, 3>}, {pipeline_mode = #tpu.pipeline_mode<synchronous>, transform_indices = @transform_1, window_bounds = array<i64: 1, 8>}, {pipeline_mode = #tpu.pipeline_mode<synchronous>, transform_indices = @transform_2, window_bounds = array<i64: 8, 32>}, {pipeline_mode = #tpu.pipeline_mode<synchronous>, transform_indices = @transform_3, window_bounds = array<i64: 32, 32>}, {pipeline_mode = #tpu.pipeline_mode<synchronous>, transform_indices = @transform_4, window_bounds = array<i64: 9, 144>}, {transform_indices = @transform_5, window_bounds = array<i64: 64, 144>}, {transform_indices = @transform_6, window_bounds = array<i64: 64, 32>}]} {
    %c0 = arith.constant 0 : index
    %c0_0 = arith.constant 0 : index
    %0 = vector.load %arg1[%c0, %c0_0] : memref<64x3xf32, #tpu.memory_space<vmem>>, vector<64x3xf32>
    %1 = arith.mulf %0, %0 : vector<64x3xf32>
    %cst = arith.constant dense<0.000000e+00> : vector<64xf32>
    %2 = vector.multi_reduction <add>, %1, %cst [1] : vector<64x3xf32> to vector<64xf32>
    %3 = vector.shape_cast %2 : vector<64xf32> to vector<64x1xf32>
    %cst_1 = arith.constant 9.99999996E-13 : f32
    %4 = vector.broadcast %cst_1 : f32 to vector<64x1xf32>
    %5 = arith.maximumf %3, %4 : vector<64x1xf32>
    %6 = math.rsqrt %5 : vector<64x1xf32>
    %7 = arith.mulf %3, %6 : vector<64x1xf32>
    %8 = vector.extract_strided_slice %0 {offsets = [0, 0], sizes = [64, 1], strides = [1, 1]} : vector<64x3xf32> to vector<64x1xf32>
    %9 = arith.mulf %8, %6 : vector<64x1xf32>
    %10 = vector.extract_strided_slice %0 {offsets = [0, 1], sizes = [64, 1], strides = [1, 1]} : vector<64x3xf32> to vector<64x1xf32>
    %11 = arith.mulf %10, %6 : vector<64x1xf32>
    %12 = vector.extract_strided_slice %0 {offsets = [0, 2], sizes = [64, 1], strides = [1, 1]} : vector<64x3xf32> to vector<64x1xf32>
    %13 = arith.mulf %12, %6 : vector<64x1xf32>
    %cst_2 = arith.constant 1.000000e+00 : f32
    %14 = vector.broadcast %cst_2 : f32 to vector<64x1xf32>
    %cst_3 = arith.constant 1.73205078 : f32
    %15 = vector.broadcast %cst_3 : f32 to vector<64x1xf32>
    %16 = arith.mulf %15, %11 : vector<64x1xf32>
    %cst_4 = arith.constant 1.73205078 : f32
    %17 = vector.broadcast %cst_4 : f32 to vector<64x1xf32>
    %18 = arith.mulf %17, %13 : vector<64x1xf32>
    %cst_5 = arith.constant 1.73205078 : f32
    %19 = vector.broadcast %cst_5 : f32 to vector<64x1xf32>
    %20 = arith.mulf %19, %9 : vector<64x1xf32>
    %cst_6 = arith.constant 3.87298346 : f32
    %21 = vector.broadcast %cst_6 : f32 to vector<64x1xf32>
    %22 = arith.mulf %21, %9 : vector<64x1xf32>
    %23 = arith.mulf %22, %11 : vector<64x1xf32>
    %cst_7 = arith.constant 3.87298346 : f32
    %24 = vector.broadcast %cst_7 : f32 to vector<64x1xf32>
    %25 = arith.mulf %24, %11 : vector<64x1xf32>
    %26 = arith.mulf %25, %13 : vector<64x1xf32>
    %cst_8 = arith.constant 3.000000e+00 : f32
    %27 = vector.broadcast %cst_8 : f32 to vector<64x1xf32>
    %28 = arith.mulf %27, %13 : vector<64x1xf32>
    %29 = arith.mulf %28, %13 : vector<64x1xf32>
    %cst_9 = arith.constant 1.000000e+00 : f32
    %30 = vector.broadcast %cst_9 : f32 to vector<64x1xf32>
    %31 = arith.subf %29, %30 : vector<64x1xf32>
    %cst_10 = arith.constant 1.11803401 : f32
    %32 = vector.broadcast %cst_10 : f32 to vector<64x1xf32>
    %33 = arith.mulf %32, %31 : vector<64x1xf32>
    %cst_11 = arith.constant 3.87298346 : f32
    %34 = vector.broadcast %cst_11 : f32 to vector<64x1xf32>
    %35 = arith.mulf %34, %9 : vector<64x1xf32>
    %36 = arith.mulf %35, %13 : vector<64x1xf32>
    %37 = arith.mulf %9, %9 : vector<64x1xf32>
    %38 = arith.mulf %11, %11 : vector<64x1xf32>
    %39 = arith.subf %37, %38 : vector<64x1xf32>
    %cst_12 = arith.constant 1.93649173 : f32
    %40 = vector.broadcast %cst_12 : f32 to vector<64x1xf32>
    %41 = arith.mulf %40, %39 : vector<64x1xf32>
    %42 = tpu.concatenate %14, %16, %18, %20, %23, %26, %33, %36, %41 in 1 : vector<64x1xf32>, vector<64x1xf32>, vector<64x1xf32>, vector<64x1xf32>, vector<64x1xf32>, vector<64x1xf32>, vector<64x1xf32>, vector<64x1xf32>, vector<64x1xf32> -> vector<64x9xf32>
    %43 = arith.truncf %42 : vector<64x9xf32> to vector<64x9xbf16>
    %c0_13 = arith.constant 0 : index
    %c0_14 = arith.constant 0 : index
    %44 = vector.load %arg5[%c0_13, %c0_14] : memref<9x144xbf16, #tpu.memory_space<vmem>>, vector<9x144xbf16>
    %cst_15 = arith.constant dense<0.000000e+00> : vector<64x144xf32>
    %45 = tpu.matmul %43, %44, %cst_15 {dimension_numbers = #tpu.dot_dimension_numbers<[1], [0], [0], [1], [0, 0, 1, 1], [], []>} : vector<64x9xbf16>, vector<9x144xbf16>, vector<64x144xf32> -> vector<64x144xf32>
    %46 = arith.truncf %45 : vector<64x144xf32> to vector<64x144xbf16>
    %c0_16 = arith.constant 0 : index
    %c0_17 = arith.constant 0 : index
    %47 = vector.load %arg6[%c0_16, %c0_17] : memref<64x144xbf16, #tpu.memory_space<vmem>>, vector<64x144xbf16>
    tpu.vector_store %arg6[%c0_16, %c0_17], %46 {strides = array<i32>} : memref<64x144xbf16, #tpu.memory_space<vmem>>, vector<64x144xbf16>,
    %c0_18 = arith.constant 0 : index
    %c0_19 = arith.constant 0 : index
    %48 = vector.load %arg2[%c0_18, %c0_19] : memref<1x8xf32, #tpu.memory_space<vmem>>, vector<1x8xf32>
    %49 = vector.broadcast %7 : vector<64x1xf32> to vector<64x8xf32>
    %50 = vector.broadcast %48 : vector<1x8xf32> to vector<64x8xf32>
    %51 = arith.mulf %49, %50 : vector<64x8xf32>
    %52 = math.sin %51 : vector<64x8xf32>
    %cst_20 = arith.constant 0.816496611 : f32
    %53 = vector.broadcast %cst_20 : f32 to vector<64x8xf32>
    %54 = arith.mulf %53, %52 : vector<64x8xf32>
    %55 = vector.broadcast %6 : vector<64x1xf32> to vector<64x8xf32>
    %56 = arith.mulf %54, %55 : vector<64x8xf32>
    %cst_21 = arith.constant 3.000000e+00 : f32
    %57 = vector.broadcast %cst_21 : f32 to vector<64x1xf32>
    %58 = arith.divf %7, %57 : vector<64x1xf32>
    %59 = arith.mulf %58, %58 : vector<64x1xf32>
    %60 = arith.mulf %59, %59 : vector<64x1xf32>
    %61 = arith.mulf %58, %60 : vector<64x1xf32>
    %cst_22 = arith.constant 2.100000e+01 : f32
    %62 = vector.broadcast %cst_22 : f32 to vector<64x1xf32>
    %63 = arith.mulf %62, %61 : vector<64x1xf32>
    %cst_23 = arith.constant 1.000000e+00 : f32
    %64 = vector.broadcast %cst_23 : f32 to vector<64x1xf32>
    %65 = arith.subf %64, %63 : vector<64x1xf32>
    %66 = arith.mulf %58, %58 : vector<64x1xf32>
    %67 = arith.mulf %66, %66 : vector<64x1xf32>
    %68 = arith.mulf %66, %67 : vector<64x1xf32>
    %cst_24 = arith.constant 3.500000e+01 : f32
    %69 = vector.broadcast %cst_24 : f32 to vector<64x1xf32>
    %70 = arith.mulf %69, %68 : vector<64x1xf32>
    %71 = arith.addf %65, %70 : vector<64x1xf32>
    %72 = arith.mulf %58, %58 : vector<64x1xf32>
    %73 = arith.mulf %58, %72 : vector<64x1xf32>
    %74 = arith.mulf %72, %72 : vector<64x1xf32>
    %75 = arith.mulf %73, %74 : vector<64x1xf32>
    %cst_25 = arith.constant 1.500000e+01 : f32
    %76 = vector.broadcast %cst_25 : f32 to vector<64x1xf32>
    %77 = arith.mulf %76, %75 : vector<64x1xf32>
    %78 = arith.subf %71, %77 : vector<64x1xf32>
    %cst_26 = arith.constant 1.000000e+00 : f32
    %79 = vector.broadcast %cst_26 : f32 to vector<64x1xf32>
    %80 = arith.cmpf olt, %58, %79 : vector<64x1xf32>
    %81 = arith.extui %80 : vector<64x1xi1> to vector<64x1xi32>
    %82 = arith.sitofp %81 : vector<64x1xi32> to vector<64x1xf32>
    %83 = arith.mulf %78, %82 : vector<64x1xf32>
    %84 = vector.broadcast %83 : vector<64x1xf32> to vector<64x8xf32>
    %85 = arith.mulf %56, %84 : vector<64x8xf32>
    %86 = arith.truncf %85 : vector<64x8xf32> to vector<64x8xbf16>
    %c0_27 = arith.constant 0 : index
    %c0_28 = arith.constant 0 : index
    %87 = vector.load %arg3[%c0_27, %c0_28] : memref<8x32xbf16, #tpu.memory_space<vmem>>, vector<8x32xbf16>
    %cst_29 = arith.constant dense<0.000000e+00> : vector<64x32xf32>
    %88 = tpu.matmul %86, %87, %cst_29 {dimension_numbers = #tpu.dot_dimension_numbers<[1], [0], [0], [1], [0, 0, 1, 1], [], []>} : vector<64x8xbf16>, vector<8x32xbf16>, vector<64x32xf32> -> vector<64x32xf32>
    %89 = arith.negf %88 : vector<64x32xf32>
    %90 = math.exp %89 : vector<64x32xf32>
    %cst_30 = arith.constant 1.000000e+00 : f32
    %91 = vector.broadcast %cst_30 : f32 to vector<64x32xf32>
    %92 = arith.addf %91, %90 : vector<64x32xf32>
    %93 = arith.divf %91, %92 : vector<64x32xf32>
    %94 = arith.mulf %88, %93 : vector<64x32xf32>
    %95 = arith.truncf %94 : vector<64x32xf32> to vector<64x32xbf16>
    %c0_31 = arith.constant 0 : index
    %c0_32 = arith.constant 0 : index
    %96 = vector.load %arg4[%c0_31, %c0_32] : memref<32x32xbf16, #tpu.memory_space<vmem>>, vector<32x32xbf16>
    %cst_33 = arith.constant dense<0.000000e+00> : vector<64x32xf32>
    %97 = tpu.matmul %95, %96, %cst_33 {dimension_numbers = #tpu.dot_dimension_numbers<[1], [0], [0], [1], [0, 0, 1, 1], [], []>} : vector<64x32xbf16>, vector<32x32xbf16>, vector<64x32xf32> -> vector<64x32xf32>
    %98 = arith.truncf %97 : vector<64x32xf32> to vector<64x32xbf16>
    %c0_34 = arith.constant 0 : index
    %c0_35 = arith.constant 0 : index
    %99 = vector.load %arg7[%c0_34, %c0_35] : memref<64x32xbf16, #tpu.memory_space<vmem>>, vector<64x32xbf16>
    tpu.vector_store %arg7[%c0_34, %c0_35], %98 {strides = array<i32>} : memref<64x32xbf16, #tpu.memory_space<vmem>>, vector<64x32xbf16>,
    return
  }
  func.func @transform_0(%arg0: i32) -> (i32, i32) {
    %c0_i32 = arith.constant 0 : i32
    %c0_i32_0 = arith.constant 0 : i32
    return %arg0, %c0_i32 : i32, i32
  }
  func.func @transform_1(%arg0: i32) -> (i32, i32) {
    %c0_i32 = arith.constant 0 : i32
    %c0_i32_0 = arith.constant 0 : i32
    %c0_i32_1 = arith.constant 0 : i32
    return %c0_i32, %c0_i32_0 : i32, i32
  }
  func.func @transform_2(%arg0: i32) -> (i32, i32) {
    %c0_i32 = arith.constant 0 : i32
    %c0_i32_0 = arith.constant 0 : i32
    %c0_i32_1 = arith.constant 0 : i32
    return %c0_i32, %c0_i32_0 : i32, i32
  }
  func.func @transform_3(%arg0: i32) -> (i32, i32) {
    %c0_i32 = arith.constant 0 : i32
    %c0_i32_0 = arith.constant 0 : i32
    %c0_i32_1 = arith.constant 0 : i32
    return %c0_i32, %c0_i32_0 : i32, i32
  }
  func.func @transform_4(%arg0: i32) -> (i32, i32) {
    %c0_i32 = arith.constant 0 : i32
    %c0_i32_0 = arith.constant 0 : i32
    %c0_i32_1 = arith.constant 0 : i32
    return %c0_i32, %c0_i32_0 : i32, i32
  }
  func.func @transform_5(%arg0: i32) -> (i32, i32) {
    %c0_i32 = arith.constant 0 : i32
    %c0_i32_0 = arith.constant 0 : i32
    return %arg0, %c0_i32 : i32, i32
  }
  func.func @transform_6(%arg0: i32) -> (i32, i32) {
    %c0_i32 = arith.constant 0 : i32
    %c0_i32_0 = arith.constant 0 : i32
    return %arg0, %c0_i32 : i32, i32
  }
}

module attributes {stable_mosaic.version = 11 : i64} {
  func.func @_embed_kernel(%arg0: i32, %arg1: memref<16x4xf32, #tpu.memory_space<vmem>>, %arg2: memref<2x16xf32, #tpu.memory_space<vmem>>, %arg3: memref<4x144xbf16, #tpu.memory_space<vmem>>, %arg4: memref<4x1xf32, #tpu.memory_space<vmem>>, %arg5: memref<16x144xf32, #tpu.memory_space<vmem>>, %arg6: memref<2x1xf32, #tpu.memory_space<vmem>>) attributes {dimension_semantics = [#tpu.dimension_semantics<arbitrary>], iteration_bounds = array<i64: 1>, scalar_prefetch = 0 : i64, scratch_operands = 0 : i64, tpu.core_type = #tpu.core_type<tc>, window_params = [{pipeline_mode = #tpu.pipeline_mode<synchronous>, transform_indices = @transform_0, window_bounds = array<i64: 16, 4>}, {pipeline_mode = #tpu.pipeline_mode<synchronous>, transform_indices = @transform_1, window_bounds = array<i64: 2, 16>}, {pipeline_mode = #tpu.pipeline_mode<synchronous>, transform_indices = @transform_2, window_bounds = array<i64: 4, 144>}, {pipeline_mode = #tpu.pipeline_mode<synchronous>, transform_indices = @transform_3, window_bounds = array<i64: 4, 1>}, {pipeline_mode = #tpu.pipeline_mode<synchronous>, transform_indices = @transform_4, window_bounds = array<i64: 16, 144>}, {pipeline_mode = #tpu.pipeline_mode<synchronous>, transform_indices = @transform_5, window_bounds = array<i64: 2, 1>}]} {
    %c0 = arith.constant 0 : index
    %c0_0 = arith.constant 0 : index
    %0 = vector.load %arg1[%c0, %c0_0] : memref<16x4xf32, #tpu.memory_space<vmem>>, vector<16x4xf32>
    %1 = arith.truncf %0 : vector<16x4xf32> to vector<16x4xbf16>
    %c0_1 = arith.constant 0 : index
    %c0_2 = arith.constant 0 : index
    %2 = vector.load %arg3[%c0_1, %c0_2] : memref<4x144xbf16, #tpu.memory_space<vmem>>, vector<4x144xbf16>
    %cst = arith.constant dense<0.000000e+00> : vector<16x144xf32>
    %3 = tpu.matmul %1, %2, %cst {dimension_numbers = #tpu.dot_dimension_numbers<[1], [0], [0], [1], [0, 0, 1, 1], [], []>} : vector<16x4xbf16>, vector<4x144xbf16>, vector<16x144xf32> -> vector<16x144xf32>
    %c0_3 = arith.constant 0 : index
    %c0_4 = arith.constant 0 : index
    %4 = vector.load %arg5[%c0_3, %c0_4] : memref<16x144xf32, #tpu.memory_space<vmem>>, vector<16x144xf32>
    tpu.vector_store %arg5[%c0_3, %c0_4], %3 {strides = array<i32>} : memref<16x144xf32, #tpu.memory_space<vmem>>, vector<16x144xf32>,
    %c0_5 = arith.constant 0 : index
    %c0_6 = arith.constant 0 : index
    %5 = vector.load %arg4[%c0_5, %c0_6] : memref<4x1xf32, #tpu.memory_space<vmem>>, vector<4x1xf32>
    %cst_7 = arith.constant dense<0.000000e+00> : vector<16x1xf32>
    %6 = tpu.matmul %0, %5, %cst_7 {dimension_numbers = #tpu.dot_dimension_numbers<[1], [0], [0], [1], [0, 0, 1, 1], [], []>} : vector<16x4xf32>, vector<4x1xf32>, vector<16x1xf32> -> vector<16x1xf32>
    %c0_8 = arith.constant 0 : index
    %c0_9 = arith.constant 0 : index
    %7 = vector.load %arg2[%c0_8, %c0_9] : memref<2x16xf32, #tpu.memory_space<vmem>>, vector<2x16xf32>
    %cst_10 = arith.constant dense<0.000000e+00> : vector<2x1xf32>
    %8 = tpu.matmul %7, %6, %cst_10 {dimension_numbers = #tpu.dot_dimension_numbers<[1], [0], [0], [1], [0, 0, 1, 1], [], []>} : vector<2x16xf32>, vector<16x1xf32>, vector<2x1xf32> -> vector<2x1xf32>
    %c0_11 = arith.constant 0 : index
    %c0_12 = arith.constant 0 : index
    %9 = vector.load %arg6[%c0_11, %c0_12] : memref<2x1xf32, #tpu.memory_space<vmem>>, vector<2x1xf32>
    tpu.vector_store %arg6[%c0_11, %c0_12], %8 {strides = array<i32>} : memref<2x1xf32, #tpu.memory_space<vmem>>, vector<2x1xf32>,
    return
  }
  func.func @transform_0(%arg0: i32) -> (i32, i32) {
    %c0_i32 = arith.constant 0 : i32
    %c0_i32_0 = arith.constant 0 : i32
    %c0_i32_1 = arith.constant 0 : i32
    return %c0_i32, %c0_i32_0 : i32, i32
  }
  func.func @transform_1(%arg0: i32) -> (i32, i32) {
    %c0_i32 = arith.constant 0 : i32
    %c0_i32_0 = arith.constant 0 : i32
    %c0_i32_1 = arith.constant 0 : i32
    return %c0_i32, %c0_i32_0 : i32, i32
  }
  func.func @transform_2(%arg0: i32) -> (i32, i32) {
    %c0_i32 = arith.constant 0 : i32
    %c0_i32_0 = arith.constant 0 : i32
    %c0_i32_1 = arith.constant 0 : i32
    return %c0_i32, %c0_i32_0 : i32, i32
  }
  func.func @transform_3(%arg0: i32) -> (i32, i32) {
    %c0_i32 = arith.constant 0 : i32
    %c0_i32_0 = arith.constant 0 : i32
    %c0_i32_1 = arith.constant 0 : i32
    return %c0_i32, %c0_i32_0 : i32, i32
  }
  func.func @transform_4(%arg0: i32) -> (i32, i32) {
    %c0_i32 = arith.constant 0 : i32
    %c0_i32_0 = arith.constant 0 : i32
    %c0_i32_1 = arith.constant 0 : i32
    return %c0_i32, %c0_i32_0 : i32, i32
  }
  func.func @transform_5(%arg0: i32) -> (i32, i32) {
    %c0_i32 = arith.constant 0 : i32
    %c0_i32_0 = arith.constant 0 : i32
    %c0_i32_1 = arith.constant 0 : i32
    return %c0_i32, %c0_i32_0 : i32, i32
  }
}

module attributes {stable_mosaic.version = 11 : i64} {
  func.func @_layer_kernel(%arg0: i32, %arg1: memref<16x144xf32, #tpu.memory_space<vmem>>, %arg2: memref<16x4xbf16, #tpu.memory_space<vmem>>, %arg3: memref<2x16xf32, #tpu.memory_space<vmem>>, %arg4: memref<64x16xbf16, #tpu.memory_space<vmem>>, %arg5: memref<16x64xbf16, #tpu.memory_space<vmem>>, %arg6: memref<64x144xbf16, #tpu.memory_space<vmem>>, %arg7: memref<64x32xbf16, #tpu.memory_space<vmem>>, %arg8: memref<144x144xbf16, #tpu.memory_space<vmem>>, %arg9: memref<144x144xbf16, #tpu.memory_space<vmem>>, %arg10: memref<144x144xbf16, #tpu.memory_space<vmem>>, %arg11: memref<32x144xbf16, #tpu.memory_space<vmem>>, %arg12: memref<144x144xbf16, #tpu.memory_space<vmem>>, %arg13: memref<144x144xbf16, #tpu.memory_space<vmem>>, %arg14: memref<4x144xbf16, #tpu.memory_space<vmem>>, %arg15: memref<144x1xbf16, #tpu.memory_space<vmem>>, %arg16: memref<1x1xbf16, #tpu.memory_space<vmem>>, %arg17: memref<16x144xf32, #tpu.memory_space<vmem>>, %arg18: memref<2x1xf32, #tpu.memory_space<vmem>>, %arg19: memref<16x144xbf16, #tpu.memory_space<vmem>>, %arg20: memref<16x144xf32, #tpu.memory_space<vmem>>) attributes {dimension_semantics = [#tpu.dimension_semantics<arbitrary>], iteration_bounds = array<i64: 1>, scalar_prefetch = 0 : i64, scratch_operands = 2 : i64, tpu.core_type = #tpu.core_type<tc>, window_params = [{pipeline_mode = #tpu.pipeline_mode<synchronous>, transform_indices = @transform_0, window_bounds = array<i64: 16, 144>}, {pipeline_mode = #tpu.pipeline_mode<synchronous>, transform_indices = @transform_1, window_bounds = array<i64: 16, 4>}, {pipeline_mode = #tpu.pipeline_mode<synchronous>, transform_indices = @transform_2, window_bounds = array<i64: 2, 16>}, {transform_indices = @transform_3, window_bounds = array<i64: 64, 16>}, {transform_indices = @transform_4, window_bounds = array<i64: 16, 64>}, {transform_indices = @transform_5, window_bounds = array<i64: 64, 144>}, {transform_indices = @transform_6, window_bounds = array<i64: 64, 32>}, {pipeline_mode = #tpu.pipeline_mode<synchronous>, transform_indices = @transform_7, window_bounds = array<i64: 144, 144>}, {pipeline_mode = #tpu.pipeline_mode<synchronous>, transform_indices = @transform_8, window_bounds = array<i64: 144, 144>}, {pipeline_mode = #tpu.pipeline_mode<synchronous>, transform_indices = @transform_9, window_bounds = array<i64: 144, 144>}, {pipeline_mode = #tpu.pipeline_mode<synchronous>, transform_indices = @transform_10, window_bounds = array<i64: 32, 144>}, {pipeline_mode = #tpu.pipeline_mode<synchronous>, transform_indices = @transform_11, window_bounds = array<i64: 144, 144>}, {pipeline_mode = #tpu.pipeline_mode<synchronous>, transform_indices = @transform_12, window_bounds = array<i64: 144, 144>}, {pipeline_mode = #tpu.pipeline_mode<synchronous>, transform_indices = @transform_13, window_bounds = array<i64: 4, 144>}, {pipeline_mode = #tpu.pipeline_mode<synchronous>, transform_indices = @transform_14, window_bounds = array<i64: 144, 1>}, {pipeline_mode = #tpu.pipeline_mode<synchronous>, transform_indices = @transform_15, window_bounds = array<i64: 1, 1>}, {pipeline_mode = #tpu.pipeline_mode<synchronous>, transform_indices = @transform_16, window_bounds = array<i64: 16, 144>}, {pipeline_mode = #tpu.pipeline_mode<synchronous>, transform_indices = @transform_17, window_bounds = array<i64: 2, 1>}]} {
    %c0_i32 = arith.constant 0 : i32
    %0 = arith.cmpi eq, %arg0, %c0_i32 : i32
    %c0_i32_0 = arith.constant 0 : i32
    %1 = arith.cmpi eq, %arg0, %c0_i32_0 : i32
    %2 = arith.extui %0 : i1 to i32
    %c0_i32_1 = arith.constant 0 : i32
    %3 = arith.cmpi ne, %2, %c0_i32_1 : i32
    scf.if %3 {
      %c0_26 = arith.constant 0 : index
      %c0_27 = arith.constant 0 : index
      %30 = vector.load %arg1[%c0_26, %c0_27] : memref<16x144xf32, #tpu.memory_space<vmem>>, vector<16x144xf32>
      %31 = arith.truncf %30 : vector<16x144xf32> to vector<16x144xbf16>
      %c0_28 = arith.constant 0 : index
      %c0_29 = arith.constant 0 : index
      %32 = vector.load %arg8[%c0_28, %c0_29] : memref<144x144xbf16, #tpu.memory_space<vmem>>, vector<144x144xbf16>
      %cst_30 = arith.constant dense<0.000000e+00> : vector<16x144xf32>
      %33 = tpu.matmul %31, %32, %cst_30 {dimension_numbers = #tpu.dot_dimension_numbers<[1], [0], [0], [1], [0, 0, 1, 1], [], []>} : vector<16x144xbf16>, vector<144x144xbf16>, vector<16x144xf32> -> vector<16x144xf32>
      %34 = arith.truncf %33 : vector<16x144xf32> to vector<16x144xbf16>
      %c0_31 = arith.constant 0 : index
      %c0_32 = arith.constant 0 : index
      %35 = vector.load %arg19[%c0_31, %c0_32] : memref<16x144xbf16, #tpu.memory_space<vmem>>, vector<16x144xbf16>
      tpu.vector_store %arg19[%c0_31, %c0_32], %34 {strides = array<i32>} : memref<16x144xbf16, #tpu.memory_space<vmem>>, vector<16x144xbf16>,
      %cst_33 = arith.constant 0.000000e+00 : f32
      %36 = vector.broadcast %cst_33 : f32 to vector<16x144xf32>
      %c0_34 = arith.constant 0 : index
      %c0_35 = arith.constant 0 : index
      %37 = vector.load %arg20[%c0_34, %c0_35] : memref<16x144xf32, #tpu.memory_space<vmem>>, vector<16x144xf32>
      tpu.vector_store %arg20[%c0_34, %c0_35], %36 {strides = array<i32>} : memref<16x144xf32, #tpu.memory_space<vmem>>, vector<16x144xf32>,
    } else {
    }
    %c0 = arith.constant 0 : index
    %c0_2 = arith.constant 0 : index
    %4 = vector.load %arg4[%c0, %c0_2] : memref<64x16xbf16, #tpu.memory_space<vmem>>, vector<64x16xbf16>
    %c0_3 = arith.constant 0 : index
    %c0_4 = arith.constant 0 : index
    %5 = vector.load %arg19[%c0_3, %c0_4] : memref<16x144xbf16, #tpu.memory_space<vmem>>, vector<16x144xbf16>
    %cst = arith.constant dense<0.000000e+00> : vector<64x144xf32>
    %6 = tpu.matmul %4, %5, %cst {dimension_numbers = #tpu.dot_dimension_numbers<[1], [0], [0], [1], [0, 0, 1, 1], [], []>} : vector<64x16xbf16>, vector<16x144xbf16>, vector<64x144xf32> -> vector<64x144xf32>
    %c0_5 = arith.constant 0 : index
    %c0_6 = arith.constant 0 : index
    %7 = vector.load %arg6[%c0_5, %c0_6] : memref<64x144xbf16, #tpu.memory_space<vmem>>, vector<64x144xbf16>
    %8 = arith.extf %7 : vector<64x144xbf16> to vector<64x144xf32>
    %c0_7 = arith.constant 0 : index
    %c0_8 = arith.constant 0 : index
    %9 = vector.load %arg7[%c0_7, %c0_8] : memref<64x32xbf16, #tpu.memory_space<vmem>>, vector<64x32xbf16>
    %c0_9 = arith.constant 0 : index
    %c0_10 = arith.constant 0 : index
    %10 = vector.load %arg11[%c0_9, %c0_10] : memref<32x144xbf16, #tpu.memory_space<vmem>>, vector<32x144xbf16>
    %cst_11 = arith.constant dense<0.000000e+00> : vector<64x144xf32>
    %11 = tpu.matmul %9, %10, %cst_11 {dimension_numbers = #tpu.dot_dimension_numbers<[1], [0], [0], [1], [0, 0, 1, 1], [], []>} : vector<64x32xbf16>, vector<32x144xbf16>, vector<64x144xf32> -> vector<64x144xf32>
    %12 = arith.truncf %6 : vector<64x144xf32> to vector<64x144xbf16>
    %c0_12 = arith.constant 0 : index
    %c0_13 = arith.constant 0 : index
    %13 = vector.load %arg9[%c0_12, %c0_13] : memref<144x144xbf16, #tpu.memory_space<vmem>>, vector<144x144xbf16>
    %cst_14 = arith.constant dense<0.000000e+00> : vector<64x144xf32>
    %14 = tpu.matmul %12, %13, %cst_14 {dimension_numbers = #tpu.dot_dimension_numbers<[1], [0], [0], [1], [0, 0, 1, 1], [], []>} : vector<64x144xbf16>, vector<144x144xbf16>, vector<64x144xf32> -> vector<64x144xf32>
    %15 = arith.mulf %6, %8 : vector<64x144xf32>
    %16 = arith.truncf %15 : vector<64x144xf32> to vector<64x144xbf16>
    %c0_15 = arith.constant 0 : index
    %c0_16 = arith.constant 0 : index
    %17 = vector.load %arg10[%c0_15, %c0_16] : memref<144x144xbf16, #tpu.memory_space<vmem>>, vector<144x144xbf16>
    %cst_17 = arith.constant dense<0.000000e+00> : vector<64x144xf32>
    %18 = tpu.matmul %16, %17, %cst_17 {dimension_numbers = #tpu.dot_dimension_numbers<[1], [0], [0], [1], [0, 0, 1, 1], [], []>} : vector<64x144xbf16>, vector<144x144xbf16>, vector<64x144xf32> -> vector<64x144xf32>
    %19 = arith.mulf %14, %8 : vector<64x144xf32>
    %20 = arith.addf %19, %18 : vector<64x144xf32>
    %21 = arith.mulf %20, %11 : vector<64x144xf32>
    %c0_18 = arith.constant 0 : index
    %c0_19 = arith.constant 0 : index
    %22 = vector.load %arg20[%c0_18, %c0_19] : memref<16x144xf32, #tpu.memory_space<vmem>>, vector<16x144xf32>
    %c0_20 = arith.constant 0 : index
    %c0_21 = arith.constant 0 : index
    %23 = vector.load %arg5[%c0_20, %c0_21] : memref<16x64xbf16, #tpu.memory_space<vmem>>, vector<16x64xbf16>
    %24 = arith.truncf %21 : vector<64x144xf32> to vector<64x144xbf16>
    %cst_22 = arith.constant dense<0.000000e+00> : vector<16x144xf32>
    %25 = tpu.matmul %23, %24, %cst_22 {dimension_numbers = #tpu.dot_dimension_numbers<[1], [0], [0], [1], [0, 0, 1, 1], [], []>} : vector<16x64xbf16>, vector<64x144xbf16>, vector<16x144xf32> -> vector<16x144xf32>
    %26 = arith.addf %22, %25 : vector<16x144xf32>
    %c0_23 = arith.constant 0 : index
    %c0_24 = arith.constant 0 : index
    %27 = vector.load %arg20[%c0_23, %c0_24] : memref<16x144xf32, #tpu.memory_space<vmem>>, vector<16x144xf32>
    tpu.vector_store %arg20[%c0_23, %c0_24], %26 {strides = array<i32>} : memref<16x144xf32, #tpu.memory_space<vmem>>, vector<16x144xf32>,
    %28 = arith.extui %1 : i1 to i32
    %c0_i32_25 = arith.constant 0 : i32
    %29 = arith.cmpi ne, %28, %c0_i32_25 : i32
    scf.if %29 {
      %c0_26 = arith.constant 0 : index
      %c0_27 = arith.constant 0 : index
      %30 = vector.load %arg20[%c0_26, %c0_27] : memref<16x144xf32, #tpu.memory_space<vmem>>, vector<16x144xf32>
      %31 = arith.truncf %30 : vector<16x144xf32> to vector<16x144xbf16>
      %c0_28 = arith.constant 0 : index
      %c0_29 = arith.constant 0 : index
      %32 = vector.load %arg12[%c0_28, %c0_29] : memref<144x144xbf16, #tpu.memory_space<vmem>>, vector<144x144xbf16>
      %cst_30 = arith.constant dense<0.000000e+00> : vector<16x144xf32>
      %33 = tpu.matmul %31, %32, %cst_30 {dimension_numbers = #tpu.dot_dimension_numbers<[1], [0], [0], [1], [0, 0, 1, 1], [], []>} : vector<16x144xbf16>, vector<144x144xbf16>, vector<16x144xf32> -> vector<16x144xf32>
      %c0_31 = arith.constant 0 : index
      %c0_32 = arith.constant 0 : index
      %34 = vector.load %arg1[%c0_31, %c0_32] : memref<16x144xf32, #tpu.memory_space<vmem>>, vector<16x144xf32>
      %35 = arith.truncf %34 : vector<16x144xf32> to vector<16x144xbf16>
      %c0_33 = arith.constant 0 : index
      %c0_34 = arith.constant 0 : index
      %36 = vector.load %arg13[%c0_33, %c0_34] : memref<144x144xbf16, #tpu.memory_space<vmem>>, vector<144x144xbf16>
      %cst_35 = arith.constant dense<0.000000e+00> : vector<16x144xf32>
      %37 = tpu.matmul %35, %36, %cst_35 {dimension_numbers = #tpu.dot_dimension_numbers<[1], [0], [0], [1], [0, 0, 1, 1], [], []>} : vector<16x144xbf16>, vector<144x144xbf16>, vector<16x144xf32> -> vector<16x144xf32>
      %38 = arith.addf %33, %37 : vector<16x144xf32>
      %c0_36 = arith.constant 0 : index
      %c0_37 = arith.constant 0 : index
      %39 = vector.load %arg2[%c0_36, %c0_37] : memref<16x4xbf16, #tpu.memory_space<vmem>>, vector<16x4xbf16>
      %c0_38 = arith.constant 0 : index
      %c0_39 = arith.constant 0 : index
      %40 = vector.load %arg14[%c0_38, %c0_39] : memref<4x144xbf16, #tpu.memory_space<vmem>>, vector<4x144xbf16>
      %cst_40 = arith.constant dense<0.000000e+00> : vector<16x144xf32>
      %41 = tpu.matmul %39, %40, %cst_40 {dimension_numbers = #tpu.dot_dimension_numbers<[1], [0], [0], [1], [0, 0, 1, 1], [], []>} : vector<16x4xbf16>, vector<4x144xbf16>, vector<16x144xf32> -> vector<16x144xf32>
      %42 = arith.addf %38, %41 : vector<16x144xf32>
      %c0_41 = arith.constant 0 : index
      %c0_42 = arith.constant 0 : index
      %43 = vector.load %arg17[%c0_41, %c0_42] : memref<16x144xf32, #tpu.memory_space<vmem>>, vector<16x144xf32>
      tpu.vector_store %arg17[%c0_41, %c0_42], %42 {strides = array<i32>} : memref<16x144xf32, #tpu.memory_space<vmem>>, vector<16x144xf32>,
      %44 = arith.truncf %42 : vector<16x144xf32> to vector<16x144xbf16>
      %c0_43 = arith.constant 0 : index
      %c0_44 = arith.constant 0 : index
      %45 = vector.load %arg15[%c0_43, %c0_44] : memref<144x1xbf16, #tpu.memory_space<vmem>>, vector<144x1xbf16>
      %cst_45 = arith.constant dense<0.000000e+00> : vector<16x1xf32>
      %46 = tpu.matmul %44, %45, %cst_45 {dimension_numbers = #tpu.dot_dimension_numbers<[1], [0], [0], [1], [0, 0, 1, 1], [], []>} : vector<16x144xbf16>, vector<144x1xbf16>, vector<16x1xf32> -> vector<16x1xf32>
      %c0_46 = arith.constant 0 : index
      %c0_47 = arith.constant 0 : index
      %47 = vector.load %arg3[%c0_46, %c0_47] : memref<2x16xf32, #tpu.memory_space<vmem>>, vector<2x16xf32>
      %cst_48 = arith.constant dense<0.000000e+00> : vector<2x1xf32>
      %48 = tpu.matmul %47, %46, %cst_48 {dimension_numbers = #tpu.dot_dimension_numbers<[1], [0], [0], [1], [0, 0, 1, 1], [], []>} : vector<2x16xf32>, vector<16x1xf32>, vector<2x1xf32> -> vector<2x1xf32>
      %c0_49 = arith.constant 0 : index
      %c0_50 = arith.constant 0 : index
      %49 = vector.load %arg18[%c0_49, %c0_50] : memref<2x1xf32, #tpu.memory_space<vmem>>, vector<2x1xf32>
      tpu.vector_store %arg18[%c0_49, %c0_50], %48 {strides = array<i32>} : memref<2x1xf32, #tpu.memory_space<vmem>>, vector<2x1xf32>,
    } else {
    }
    return
  }
  func.func @transform_0(%arg0: i32) -> (i32, i32) {
    %c0_i32 = arith.constant 0 : i32
    %c0_i32_0 = arith.constant 0 : i32
    %c0_i32_1 = arith.constant 0 : i32
    return %c0_i32, %c0_i32_0 : i32, i32
  }
  func.func @transform_1(%arg0: i32) -> (i32, i32) {
    %c0_i32 = arith.constant 0 : i32
    %c0_i32_0 = arith.constant 0 : i32
    %c0_i32_1 = arith.constant 0 : i32
    return %c0_i32, %c0_i32_0 : i32, i32
  }
  func.func @transform_2(%arg0: i32) -> (i32, i32) {
    %c0_i32 = arith.constant 0 : i32
    %c0_i32_0 = arith.constant 0 : i32
    %c0_i32_1 = arith.constant 0 : i32
    return %c0_i32, %c0_i32_0 : i32, i32
  }
  func.func @transform_3(%arg0: i32) -> (i32, i32) {
    %c0_i32 = arith.constant 0 : i32
    %c0_i32_0 = arith.constant 0 : i32
    return %arg0, %c0_i32 : i32, i32
  }
  func.func @transform_4(%arg0: i32) -> (i32, i32) {
    %c0_i32 = arith.constant 0 : i32
    %c0_i32_0 = arith.constant 0 : i32
    return %c0_i32, %arg0 : i32, i32
  }
  func.func @transform_5(%arg0: i32) -> (i32, i32) {
    %c0_i32 = arith.constant 0 : i32
    %c0_i32_0 = arith.constant 0 : i32
    return %arg0, %c0_i32 : i32, i32
  }
  func.func @transform_6(%arg0: i32) -> (i32, i32) {
    %c0_i32 = arith.constant 0 : i32
    %c0_i32_0 = arith.constant 0 : i32
    return %arg0, %c0_i32 : i32, i32
  }
  func.func @transform_7(%arg0: i32) -> (i32, i32) {
    %c0_i32 = arith.constant 0 : i32
    %c0_i32_0 = arith.constant 0 : i32
    %c0_i32_1 = arith.constant 0 : i32
    return %c0_i32, %c0_i32_0 : i32, i32
  }
  func.func @transform_8(%arg0: i32) -> (i32, i32) {
    %c0_i32 = arith.constant 0 : i32
    %c0_i32_0 = arith.constant 0 : i32
    %c0_i32_1 = arith.constant 0 : i32
    return %c0_i32, %c0_i32_0 : i32, i32
  }
  func.func @transform_9(%arg0: i32) -> (i32, i32) {
    %c0_i32 = arith.constant 0 : i32
    %c0_i32_0 = arith.constant 0 : i32
    %c0_i32_1 = arith.constant 0 : i32
    return %c0_i32, %c0_i32_0 : i32, i32
  }
  func.func @transform_10(%arg0: i32) -> (i32, i32) {
    %c0_i32 = arith.constant 0 : i32
    %c0_i32_0 = arith.constant 0 : i32
    %c0_i32_1 = arith.constant 0 : i32
    return %c0_i32, %c0_i32_0 : i32, i32
  }
  func.func @transform_11(%arg0: i32) -> (i32, i32) {
    %c0_i32 = arith.constant 0 : i32
    %c0_i32_0 = arith.constant 0 : i32
    %c0_i32_1 = arith.constant 0 : i32
    return %c0_i32, %c0_i32_0 : i32, i32
  }
  func.func @transform_12(%arg0: i32) -> (i32, i32) {
    %c0_i32 = arith.constant 0 : i32
    %c0_i32_0 = arith.constant 0 : i32
    %c0_i32_1 = arith.constant 0 : i32
    return %c0_i32, %c0_i32_0 : i32, i32
  }
  func.func @transform_13(%arg0: i32) -> (i32, i32) {
    %c0_i32 = arith.constant 0 : i32
    %c0_i32_0 = arith.constant 0 : i32
    %c0_i32_1 = arith.constant 0 : i32
    return %c0_i32, %c0_i32_0 : i32, i32
  }
  func.func @transform_14(%arg0: i32) -> (i32, i32) {
    %c0_i32 = arith.constant 0 : i32
    %c0_i32_0 = arith.constant 0 : i32
    %c0_i32_1 = arith.constant 0 : i32
    return %c0_i32, %c0_i32_0 : i32, i32
  }
  func.func @transform_15(%arg0: i32) -> (i32, i32) {
    %c0_i32 = arith.constant 0 : i32
    %c0_i32_0 = arith.constant 0 : i32
    %c0_i32_1 = arith.constant 0 : i32
    return %c0_i32, %c0_i32_0 : i32, i32
  }
  func.func @transform_16(%arg0: i32) -> (i32, i32) {
    %c0_i32 = arith.constant 0 : i32
    %c0_i32_0 = arith.constant 0 : i32
    %c0_i32_1 = arith.constant 0 : i32
    return %c0_i32, %c0_i32_0 : i32, i32
  }
  func.func @transform_17(%arg0: i32) -> (i32, i32) {
    %c0_i32 = arith.constant 0 : i32
    %c0_i32_0 = arith.constant 0 : i32
    %c0_i32_1 = arith.constant 0 : i32
    return %c0_i32, %c0_i32_0 : i32, i32
  }
}

module attributes {stable_mosaic.version = 11 : i64} {
  func.func @_layer_kernel(%arg0: i32, %arg1: memref<16x144xf32, #tpu.memory_space<vmem>>, %arg2: memref<16x4xbf16, #tpu.memory_space<vmem>>, %arg3: memref<2x16xf32, #tpu.memory_space<vmem>>, %arg4: memref<64x16xbf16, #tpu.memory_space<vmem>>, %arg5: memref<16x64xbf16, #tpu.memory_space<vmem>>, %arg6: memref<64x144xbf16, #tpu.memory_space<vmem>>, %arg7: memref<64x32xbf16, #tpu.memory_space<vmem>>, %arg8: memref<144x144xbf16, #tpu.memory_space<vmem>>, %arg9: memref<144x144xbf16, #tpu.memory_space<vmem>>, %arg10: memref<144x144xbf16, #tpu.memory_space<vmem>>, %arg11: memref<32x144xbf16, #tpu.memory_space<vmem>>, %arg12: memref<144x144xbf16, #tpu.memory_space<vmem>>, %arg13: memref<144x144xbf16, #tpu.memory_space<vmem>>, %arg14: memref<4x144xbf16, #tpu.memory_space<vmem>>, %arg15: memref<144x16xbf16, #tpu.memory_space<vmem>>, %arg16: memref<16x1xbf16, #tpu.memory_space<vmem>>, %arg17: memref<16x144xf32, #tpu.memory_space<vmem>>, %arg18: memref<2x1xf32, #tpu.memory_space<vmem>>, %arg19: memref<16x144xbf16, #tpu.memory_space<vmem>>, %arg20: memref<16x144xf32, #tpu.memory_space<vmem>>) attributes {dimension_semantics = [#tpu.dimension_semantics<arbitrary>], iteration_bounds = array<i64: 1>, scalar_prefetch = 0 : i64, scratch_operands = 2 : i64, tpu.core_type = #tpu.core_type<tc>, window_params = [{pipeline_mode = #tpu.pipeline_mode<synchronous>, transform_indices = @transform_0, window_bounds = array<i64: 16, 144>}, {pipeline_mode = #tpu.pipeline_mode<synchronous>, transform_indices = @transform_1, window_bounds = array<i64: 16, 4>}, {pipeline_mode = #tpu.pipeline_mode<synchronous>, transform_indices = @transform_2, window_bounds = array<i64: 2, 16>}, {transform_indices = @transform_3, window_bounds = array<i64: 64, 16>}, {transform_indices = @transform_4, window_bounds = array<i64: 16, 64>}, {transform_indices = @transform_5, window_bounds = array<i64: 64, 144>}, {transform_indices = @transform_6, window_bounds = array<i64: 64, 32>}, {pipeline_mode = #tpu.pipeline_mode<synchronous>, transform_indices = @transform_7, window_bounds = array<i64: 144, 144>}, {pipeline_mode = #tpu.pipeline_mode<synchronous>, transform_indices = @transform_8, window_bounds = array<i64: 144, 144>}, {pipeline_mode = #tpu.pipeline_mode<synchronous>, transform_indices = @transform_9, window_bounds = array<i64: 144, 144>}, {pipeline_mode = #tpu.pipeline_mode<synchronous>, transform_indices = @transform_10, window_bounds = array<i64: 32, 144>}, {pipeline_mode = #tpu.pipeline_mode<synchronous>, transform_indices = @transform_11, window_bounds = array<i64: 144, 144>}, {pipeline_mode = #tpu.pipeline_mode<synchronous>, transform_indices = @transform_12, window_bounds = array<i64: 144, 144>}, {pipeline_mode = #tpu.pipeline_mode<synchronous>, transform_indices = @transform_13, window_bounds = array<i64: 4, 144>}, {pipeline_mode = #tpu.pipeline_mode<synchronous>, transform_indices = @transform_14, window_bounds = array<i64: 144, 16>}, {pipeline_mode = #tpu.pipeline_mode<synchronous>, transform_indices = @transform_15, window_bounds = array<i64: 16, 1>}, {pipeline_mode = #tpu.pipeline_mode<synchronous>, transform_indices = @transform_16, window_bounds = array<i64: 16, 144>}, {pipeline_mode = #tpu.pipeline_mode<synchronous>, transform_indices = @transform_17, window_bounds = array<i64: 2, 1>}]} {
    %c0_i32 = arith.constant 0 : i32
    %0 = arith.cmpi eq, %arg0, %c0_i32 : i32
    %c0_i32_0 = arith.constant 0 : i32
    %1 = arith.cmpi eq, %arg0, %c0_i32_0 : i32
    %2 = arith.extui %0 : i1 to i32
    %c0_i32_1 = arith.constant 0 : i32
    %3 = arith.cmpi ne, %2, %c0_i32_1 : i32
    scf.if %3 {
      %c0_26 = arith.constant 0 : index
      %c0_27 = arith.constant 0 : index
      %30 = vector.load %arg1[%c0_26, %c0_27] : memref<16x144xf32, #tpu.memory_space<vmem>>, vector<16x144xf32>
      %31 = arith.truncf %30 : vector<16x144xf32> to vector<16x144xbf16>
      %c0_28 = arith.constant 0 : index
      %c0_29 = arith.constant 0 : index
      %32 = vector.load %arg8[%c0_28, %c0_29] : memref<144x144xbf16, #tpu.memory_space<vmem>>, vector<144x144xbf16>
      %cst_30 = arith.constant dense<0.000000e+00> : vector<16x144xf32>
      %33 = tpu.matmul %31, %32, %cst_30 {dimension_numbers = #tpu.dot_dimension_numbers<[1], [0], [0], [1], [0, 0, 1, 1], [], []>} : vector<16x144xbf16>, vector<144x144xbf16>, vector<16x144xf32> -> vector<16x144xf32>
      %34 = arith.truncf %33 : vector<16x144xf32> to vector<16x144xbf16>
      %c0_31 = arith.constant 0 : index
      %c0_32 = arith.constant 0 : index
      %35 = vector.load %arg19[%c0_31, %c0_32] : memref<16x144xbf16, #tpu.memory_space<vmem>>, vector<16x144xbf16>
      tpu.vector_store %arg19[%c0_31, %c0_32], %34 {strides = array<i32>} : memref<16x144xbf16, #tpu.memory_space<vmem>>, vector<16x144xbf16>,
      %cst_33 = arith.constant 0.000000e+00 : f32
      %36 = vector.broadcast %cst_33 : f32 to vector<16x144xf32>
      %c0_34 = arith.constant 0 : index
      %c0_35 = arith.constant 0 : index
      %37 = vector.load %arg20[%c0_34, %c0_35] : memref<16x144xf32, #tpu.memory_space<vmem>>, vector<16x144xf32>
      tpu.vector_store %arg20[%c0_34, %c0_35], %36 {strides = array<i32>} : memref<16x144xf32, #tpu.memory_space<vmem>>, vector<16x144xf32>,
    } else {
    }
    %c0 = arith.constant 0 : index
    %c0_2 = arith.constant 0 : index
    %4 = vector.load %arg4[%c0, %c0_2] : memref<64x16xbf16, #tpu.memory_space<vmem>>, vector<64x16xbf16>
    %c0_3 = arith.constant 0 : index
    %c0_4 = arith.constant 0 : index
    %5 = vector.load %arg19[%c0_3, %c0_4] : memref<16x144xbf16, #tpu.memory_space<vmem>>, vector<16x144xbf16>
    %cst = arith.constant dense<0.000000e+00> : vector<64x144xf32>
    %6 = tpu.matmul %4, %5, %cst {dimension_numbers = #tpu.dot_dimension_numbers<[1], [0], [0], [1], [0, 0, 1, 1], [], []>} : vector<64x16xbf16>, vector<16x144xbf16>, vector<64x144xf32> -> vector<64x144xf32>
    %c0_5 = arith.constant 0 : index
    %c0_6 = arith.constant 0 : index
    %7 = vector.load %arg6[%c0_5, %c0_6] : memref<64x144xbf16, #tpu.memory_space<vmem>>, vector<64x144xbf16>
    %8 = arith.extf %7 : vector<64x144xbf16> to vector<64x144xf32>
    %c0_7 = arith.constant 0 : index
    %c0_8 = arith.constant 0 : index
    %9 = vector.load %arg7[%c0_7, %c0_8] : memref<64x32xbf16, #tpu.memory_space<vmem>>, vector<64x32xbf16>
    %c0_9 = arith.constant 0 : index
    %c0_10 = arith.constant 0 : index
    %10 = vector.load %arg11[%c0_9, %c0_10] : memref<32x144xbf16, #tpu.memory_space<vmem>>, vector<32x144xbf16>
    %cst_11 = arith.constant dense<0.000000e+00> : vector<64x144xf32>
    %11 = tpu.matmul %9, %10, %cst_11 {dimension_numbers = #tpu.dot_dimension_numbers<[1], [0], [0], [1], [0, 0, 1, 1], [], []>} : vector<64x32xbf16>, vector<32x144xbf16>, vector<64x144xf32> -> vector<64x144xf32>
    %12 = arith.truncf %6 : vector<64x144xf32> to vector<64x144xbf16>
    %c0_12 = arith.constant 0 : index
    %c0_13 = arith.constant 0 : index
    %13 = vector.load %arg9[%c0_12, %c0_13] : memref<144x144xbf16, #tpu.memory_space<vmem>>, vector<144x144xbf16>
    %cst_14 = arith.constant dense<0.000000e+00> : vector<64x144xf32>
    %14 = tpu.matmul %12, %13, %cst_14 {dimension_numbers = #tpu.dot_dimension_numbers<[1], [0], [0], [1], [0, 0, 1, 1], [], []>} : vector<64x144xbf16>, vector<144x144xbf16>, vector<64x144xf32> -> vector<64x144xf32>
    %15 = arith.mulf %6, %8 : vector<64x144xf32>
    %16 = arith.truncf %15 : vector<64x144xf32> to vector<64x144xbf16>
    %c0_15 = arith.constant 0 : index
    %c0_16 = arith.constant 0 : index
    %17 = vector.load %arg10[%c0_15, %c0_16] : memref<144x144xbf16, #tpu.memory_space<vmem>>, vector<144x144xbf16>
    %cst_17 = arith.constant dense<0.000000e+00> : vector<64x144xf32>
    %18 = tpu.matmul %16, %17, %cst_17 {dimension_numbers = #tpu.dot_dimension_numbers<[1], [0], [0], [1], [0, 0, 1, 1], [], []>} : vector<64x144xbf16>, vector<144x144xbf16>, vector<64x144xf32> -> vector<64x144xf32>
    %19 = arith.mulf %14, %8 : vector<64x144xf32>
    %20 = arith.addf %19, %18 : vector<64x144xf32>
    %21 = arith.mulf %20, %11 : vector<64x144xf32>
    %c0_18 = arith.constant 0 : index
    %c0_19 = arith.constant 0 : index
    %22 = vector.load %arg20[%c0_18, %c0_19] : memref<16x144xf32, #tpu.memory_space<vmem>>, vector<16x144xf32>
    %c0_20 = arith.constant 0 : index
    %c0_21 = arith.constant 0 : index
    %23 = vector.load %arg5[%c0_20, %c0_21] : memref<16x64xbf16, #tpu.memory_space<vmem>>, vector<16x64xbf16>
    %24 = arith.truncf %21 : vector<64x144xf32> to vector<64x144xbf16>
    %cst_22 = arith.constant dense<0.000000e+00> : vector<16x144xf32>
    %25 = tpu.matmul %23, %24, %cst_22 {dimension_numbers = #tpu.dot_dimension_numbers<[1], [0], [0], [1], [0, 0, 1, 1], [], []>} : vector<16x64xbf16>, vector<64x144xbf16>, vector<16x144xf32> -> vector<16x144xf32>
    %26 = arith.addf %22, %25 : vector<16x144xf32>
    %c0_23 = arith.constant 0 : index
    %c0_24 = arith.constant 0 : index
    %27 = vector.load %arg20[%c0_23, %c0_24] : memref<16x144xf32, #tpu.memory_space<vmem>>, vector<16x144xf32>
    tpu.vector_store %arg20[%c0_23, %c0_24], %26 {strides = array<i32>} : memref<16x144xf32, #tpu.memory_space<vmem>>, vector<16x144xf32>,
    %28 = arith.extui %1 : i1 to i32
    %c0_i32_25 = arith.constant 0 : i32
    %29 = arith.cmpi ne, %28, %c0_i32_25 : i32
    scf.if %29 {
      %c0_26 = arith.constant 0 : index
      %c0_27 = arith.constant 0 : index
      %30 = vector.load %arg20[%c0_26, %c0_27] : memref<16x144xf32, #tpu.memory_space<vmem>>, vector<16x144xf32>
      %31 = arith.truncf %30 : vector<16x144xf32> to vector<16x144xbf16>
      %c0_28 = arith.constant 0 : index
      %c0_29 = arith.constant 0 : index
      %32 = vector.load %arg12[%c0_28, %c0_29] : memref<144x144xbf16, #tpu.memory_space<vmem>>, vector<144x144xbf16>
      %cst_30 = arith.constant dense<0.000000e+00> : vector<16x144xf32>
      %33 = tpu.matmul %31, %32, %cst_30 {dimension_numbers = #tpu.dot_dimension_numbers<[1], [0], [0], [1], [0, 0, 1, 1], [], []>} : vector<16x144xbf16>, vector<144x144xbf16>, vector<16x144xf32> -> vector<16x144xf32>
      %c0_31 = arith.constant 0 : index
      %c0_32 = arith.constant 0 : index
      %34 = vector.load %arg1[%c0_31, %c0_32] : memref<16x144xf32, #tpu.memory_space<vmem>>, vector<16x144xf32>
      %35 = arith.truncf %34 : vector<16x144xf32> to vector<16x144xbf16>
      %c0_33 = arith.constant 0 : index
      %c0_34 = arith.constant 0 : index
      %36 = vector.load %arg13[%c0_33, %c0_34] : memref<144x144xbf16, #tpu.memory_space<vmem>>, vector<144x144xbf16>
      %cst_35 = arith.constant dense<0.000000e+00> : vector<16x144xf32>
      %37 = tpu.matmul %35, %36, %cst_35 {dimension_numbers = #tpu.dot_dimension_numbers<[1], [0], [0], [1], [0, 0, 1, 1], [], []>} : vector<16x144xbf16>, vector<144x144xbf16>, vector<16x144xf32> -> vector<16x144xf32>
      %38 = arith.addf %33, %37 : vector<16x144xf32>
      %c0_36 = arith.constant 0 : index
      %c0_37 = arith.constant 0 : index
      %39 = vector.load %arg2[%c0_36, %c0_37] : memref<16x4xbf16, #tpu.memory_space<vmem>>, vector<16x4xbf16>
      %c0_38 = arith.constant 0 : index
      %c0_39 = arith.constant 0 : index
      %40 = vector.load %arg14[%c0_38, %c0_39] : memref<4x144xbf16, #tpu.memory_space<vmem>>, vector<4x144xbf16>
      %cst_40 = arith.constant dense<0.000000e+00> : vector<16x144xf32>
      %41 = tpu.matmul %39, %40, %cst_40 {dimension_numbers = #tpu.dot_dimension_numbers<[1], [0], [0], [1], [0, 0, 1, 1], [], []>} : vector<16x4xbf16>, vector<4x144xbf16>, vector<16x144xf32> -> vector<16x144xf32>
      %42 = arith.addf %38, %41 : vector<16x144xf32>
      %c0_41 = arith.constant 0 : index
      %c0_42 = arith.constant 0 : index
      %43 = vector.load %arg17[%c0_41, %c0_42] : memref<16x144xf32, #tpu.memory_space<vmem>>, vector<16x144xf32>
      tpu.vector_store %arg17[%c0_41, %c0_42], %42 {strides = array<i32>} : memref<16x144xf32, #tpu.memory_space<vmem>>, vector<16x144xf32>,
      %44 = arith.truncf %42 : vector<16x144xf32> to vector<16x144xbf16>
      %c0_43 = arith.constant 0 : index
      %c0_44 = arith.constant 0 : index
      %45 = vector.load %arg15[%c0_43, %c0_44] : memref<144x16xbf16, #tpu.memory_space<vmem>>, vector<144x16xbf16>
      %cst_45 = arith.constant dense<0.000000e+00> : vector<16x16xf32>
      %46 = tpu.matmul %44, %45, %cst_45 {dimension_numbers = #tpu.dot_dimension_numbers<[1], [0], [0], [1], [0, 0, 1, 1], [], []>} : vector<16x144xbf16>, vector<144x16xbf16>, vector<16x16xf32> -> vector<16x16xf32>
      %47 = arith.negf %46 : vector<16x16xf32>
      %48 = math.exp %47 : vector<16x16xf32>
      %cst_46 = arith.constant 1.000000e+00 : f32
      %49 = vector.broadcast %cst_46 : f32 to vector<16x16xf32>
      %50 = arith.addf %49, %48 : vector<16x16xf32>
      %51 = arith.divf %49, %50 : vector<16x16xf32>
      %52 = arith.mulf %46, %51 : vector<16x16xf32>
      %53 = arith.truncf %52 : vector<16x16xf32> to vector<16x16xbf16>
      %c0_47 = arith.constant 0 : index
      %c0_48 = arith.constant 0 : index
      %54 = vector.load %arg16[%c0_47, %c0_48] : memref<16x1xbf16, #tpu.memory_space<vmem>>, vector<16x1xbf16>
      %cst_49 = arith.constant dense<0.000000e+00> : vector<16x1xf32>
      %55 = tpu.matmul %53, %54, %cst_49 {dimension_numbers = #tpu.dot_dimension_numbers<[1], [0], [0], [1], [0, 0, 1, 1], [], []>} : vector<16x16xbf16>, vector<16x1xbf16>, vector<16x1xf32> -> vector<16x1xf32>
      %c0_50 = arith.constant 0 : index
      %c0_51 = arith.constant 0 : index
      %56 = vector.load %arg3[%c0_50, %c0_51] : memref<2x16xf32, #tpu.memory_space<vmem>>, vector<2x16xf32>
      %cst_52 = arith.constant dense<0.000000e+00> : vector<2x1xf32>
      %57 = tpu.matmul %56, %55, %cst_52 {dimension_numbers = #tpu.dot_dimension_numbers<[1], [0], [0], [1], [0, 0, 1, 1], [], []>} : vector<2x16xf32>, vector<16x1xf32>, vector<2x1xf32> -> vector<2x1xf32>
      %c0_53 = arith.constant 0 : index
      %c0_54 = arith.constant 0 : index
      %58 = vector.load %arg18[%c0_53, %c0_54] : memref<2x1xf32, #tpu.memory_space<vmem>>, vector<2x1xf32>
      tpu.vector_store %arg18[%c0_53, %c0_54], %57 {strides = array<i32>} : memref<2x1xf32, #tpu.memory_space<vmem>>, vector<2x1xf32>,
    } else {
    }
    return
  }
  func.func @transform_0(%arg0: i32) -> (i32, i32) {
    %c0_i32 = arith.constant 0 : i32
    %c0_i32_0 = arith.constant 0 : i32
    %c0_i32_1 = arith.constant 0 : i32
    return %c0_i32, %c0_i32_0 : i32, i32
  }
  func.func @transform_1(%arg0: i32) -> (i32, i32) {
    %c0_i32 = arith.constant 0 : i32
    %c0_i32_0 = arith.constant 0 : i32
    %c0_i32_1 = arith.constant 0 : i32
    return %c0_i32, %c0_i32_0 : i32, i32
  }
  func.func @transform_2(%arg0: i32) -> (i32, i32) {
    %c0_i32 = arith.constant 0 : i32
    %c0_i32_0 = arith.constant 0 : i32
    %c0_i32_1 = arith.constant 0 : i32
    return %c0_i32, %c0_i32_0 : i32, i32
  }
  func.func @transform_3(%arg0: i32) -> (i32, i32) {
    %c0_i32 = arith.constant 0 : i32
    %c0_i32_0 = arith.constant 0 : i32
    return %arg0, %c0_i32 : i32, i32
  }
  func.func @transform_4(%arg0: i32) -> (i32, i32) {
    %c0_i32 = arith.constant 0 : i32
    %c0_i32_0 = arith.constant 0 : i32
    return %c0_i32, %arg0 : i32, i32
  }
  func.func @transform_5(%arg0: i32) -> (i32, i32) {
    %c0_i32 = arith.constant 0 : i32
    %c0_i32_0 = arith.constant 0 : i32
    return %arg0, %c0_i32 : i32, i32
  }
  func.func @transform_6(%arg0: i32) -> (i32, i32) {
    %c0_i32 = arith.constant 0 : i32
    %c0_i32_0 = arith.constant 0 : i32
    return %arg0, %c0_i32 : i32, i32
  }
  func.func @transform_7(%arg0: i32) -> (i32, i32) {
    %c0_i32 = arith.constant 0 : i32
    %c0_i32_0 = arith.constant 0 : i32
    %c0_i32_1 = arith.constant 0 : i32
    return %c0_i32, %c0_i32_0 : i32, i32
  }
  func.func @transform_8(%arg0: i32) -> (i32, i32) {
    %c0_i32 = arith.constant 0 : i32
    %c0_i32_0 = arith.constant 0 : i32
    %c0_i32_1 = arith.constant 0 : i32
    return %c0_i32, %c0_i32_0 : i32, i32
  }
  func.func @transform_9(%arg0: i32) -> (i32, i32) {
    %c0_i32 = arith.constant 0 : i32
    %c0_i32_0 = arith.constant 0 : i32
    %c0_i32_1 = arith.constant 0 : i32
    return %c0_i32, %c0_i32_0 : i32, i32
  }
  func.func @transform_10(%arg0: i32) -> (i32, i32) {
    %c0_i32 = arith.constant 0 : i32
    %c0_i32_0 = arith.constant 0 : i32
    %c0_i32_1 = arith.constant 0 : i32
    return %c0_i32, %c0_i32_0 : i32, i32
  }
  func.func @transform_11(%arg0: i32) -> (i32, i32) {
    %c0_i32 = arith.constant 0 : i32
    %c0_i32_0 = arith.constant 0 : i32
    %c0_i32_1 = arith.constant 0 : i32
    return %c0_i32, %c0_i32_0 : i32, i32
  }
  func.func @transform_12(%arg0: i32) -> (i32, i32) {
    %c0_i32 = arith.constant 0 : i32
    %c0_i32_0 = arith.constant 0 : i32
    %c0_i32_1 = arith.constant 0 : i32
    return %c0_i32, %c0_i32_0 : i32, i32
  }
  func.func @transform_13(%arg0: i32) -> (i32, i32) {
    %c0_i32 = arith.constant 0 : i32
    %c0_i32_0 = arith.constant 0 : i32
    %c0_i32_1 = arith.constant 0 : i32
    return %c0_i32, %c0_i32_0 : i32, i32
  }
  func.func @transform_14(%arg0: i32) -> (i32, i32) {
    %c0_i32 = arith.constant 0 : i32
    %c0_i32_0 = arith.constant 0 : i32
    %c0_i32_1 = arith.constant 0 : i32
    return %c0_i32, %c0_i32_0 : i32, i32
  }
  func.func @transform_15(%arg0: i32) -> (i32, i32) {
    %c0_i32 = arith.constant 0 : i32
    %c0_i32_0 = arith.constant 0 : i32
    %c0_i32_1 = arith.constant 0 : i32
    return %c0_i32, %c0_i32_0 : i32, i32
  }
  func.func @transform_16(%arg0: i32) -> (i32, i32) {
    %c0_i32 = arith.constant 0 : i32
    %c0_i32_0 = arith.constant 0 : i32
    %c0_i32_1 = arith.constant 0 : i32
    return %c0_i32, %c0_i32_0 : i32, i32
  }
  func.func @transform_17(%arg0: i32) -> (i32, i32) {
    %c0_i32 = arith.constant 0 : i32
    %c0_i32_0 = arith.constant 0 : i32
    %c0_i32_1 = arith.constant 0 : i32
    return %c0_i32, %c0_i32_0 : i32, i32
  }
}

</mosaic_0001>

<bundles_post_ra>
// kernel: sub.1
= control target key start
LH: loop header
LB: loop body
LE: loop exit
PB: predicated region body
PF: predicated region fallthrough
CT: control target
= control target key end

     0   :  { %s188_s0 = inlined_call_operand.vmem [shape: f32[60,3], index: 0, kind: input, shape index: {}]   ;;  %s189_s1 = inlined_call_operand.vmem [shape: f32[60,3], index: 1, kind: input, shape index: {}]   ;;  %s190_s2 = inlined_call_operand.vmem [shape: f32[60,3], index: 2, kind: output, shape index: {}]  }
   0x1   :  { %v3_v0 = vld [vmem:[%s188_s0] sm:$0xff]  ;;  %v80_v2 = vld [vmem:[%s188_s0 + $0x8] sm:$0xff]  ;;  %v83_v5 = vld [vmem:[%s188_s0 + $0x10] sm:$0xff] }
   0x2   :  { %v4_v1 = vld [vmem:[%s189_s1] sm:$0xff]  ;;  %v81_v4 = vld [vmem:[%s189_s1 + $0x8] sm:$0xff]  ;;  %v84_v6 = vld [vmem:[%s189_s1 + $0x10] sm:$0xff] }
   0x3   :  { %v7_v3 = vsub.f32 %v3_v0, %v4_v1  ;;  %v16_v7 = vsub.f32 %v80_v2, %v81_v4  ;;  %v26_v8 = vsub.f32 %v83_v5, %v84_v6  ;;  %v86_v9 = vld [vmem:[%s188_s0 + $0x18] sm:$0xff]  ;;  %v89_v11 = vld [vmem:[%s188_s0 + $0x20] sm:$0xff]  ;;  %v92_v14 = vld [vmem:[%s188_s0 + $0x28] sm:$0xff] }
   0x4   :  { %v87_v10 = vld [vmem:[%s189_s1 + $0x18] sm:$0xff]  ;;  %v90_v13 = vld [vmem:[%s189_s1 + $0x20] sm:$0xff]  ;;  %v93_v15 = vld [vmem:[%s189_s1 + $0x28] sm:$0xff] }
   0x5   :  { %9 = vst [vmem:[%s190_s2] sm:$0xff] %v7_v3  ;;  %v36_v12 = vsub.f32 %v86_v9, %v87_v10  ;;  %82 = vst [vmem:[%s190_s2 + $0x8] sm:$0xff] %v16_v7  ;;  %v46_v16 = vsub.f32 %v89_v11, %v90_v13  ;;  %v56_v17 = vsub.f32 %v92_v14, %v93_v15  ;;  %v95_v18 = vld [vmem:[%s188_s0 + $0x30] sm:$0xff]  ;;  %v98_v20 = vld [vmem:[%s188_s0 + $0x38] sm:$0xff] }
   0x6   :  { %85 = vst [vmem:[%s190_s2 + $0x10] sm:$0xff] %v26_v8  ;;  %v96_v19 = vld [vmem:[%s189_s1 + $0x30] sm:$0xff]  ;;  %v99_v22 = vld [vmem:[%s189_s1 + $0x38] sm:$0xff] }
   0x7   :  { %88 = vst [vmem:[%s190_s2 + $0x18] sm:$0xff] %v36_v12  ;;  %v66_v21 = vsub.f32 %v95_v18, %v96_v19  ;;  %91 = vst [vmem:[%s190_s2 + $0x20] sm:$0xff] %v46_v16  ;;  %v76_v23 = vsub.f32 %v98_v20, %v99_v22 }
   0x8   :  { %94 = vst [vmem:[%s190_s2 + $0x28] sm:$0xff] %v56_v17 }
   0x9   :  { %97 = vst [vmem:[%s190_s2 + $0x30] sm:$0xff] %v66_v21  ;;  %100 = vst [vmem:[%s190_s2 + $0x38] sm:$0xff] %v76_v23 }

// kernel: forward.5
= control target key start
LH: loop header
LB: loop body
LE: loop exit
PB: predicated region body
PF: predicated region fallthrough
CT: control target
= control target key end

     0   :  { %vm39_vm0 = vcmask 23552   ;;  %s2353_s20 = smov 127   ;;  %s2354_s21 = smov 126   ;;  %s3814_s0 = inlined_call_operand.vmem [shape: f32[64,3], index: 0, kind: input, shape index: {}]   ;;  %s3815_s1 = inlined_call_operand.vmem [shape: f32[1,8], index: 1, kind: input, shape index: {}]   ;;  %s3816_s2 = inlined_call_operand.vmem [shape: bf16[8,32], index: 2, kind: input, shape index: {}]   ;;  %s3817_s4 = inlined_call_operand.vmem [shape: bf16[9,144], index: 4, kind: input, shape index: {}]   ;;  %s3818_s3 = inlined_call_operand.vmem [shape: bf16[32,32], index: 3, kind: input, shape index: {}]   ;;  %s3819_s5 = inlined_call_operand.vmem [shape: bf16[64,144], index: 5, kind: output, shape index: {0}]   ;;  %s3820_s6 = inlined_call_operand.vmem [shape: bf16[64,32], index: 6, kind: output, shape index: {1}]  }
   0x1   :  { %v25_v0 = vld [vmem:[%s3814_s0 + $0x10] sm:$0xff]  ;;  %v23_v1 = vld [vmem:[%s3814_s0] sm:$0xff]  ;;  %v26_v2 = vld [vmem:[%s3814_s0 + $0x18] sm:$0xff]  ;;  %s2358_s12 = smov 7  }
   0x2   :  { %v33_v3 = vmul.f32 %v25_v0, %v25_v0  ;;  %v31_v4 = vmul.f32 %v23_v1, %v23_v1  ;;  %v34_v5 = vmul.f32 %v26_v2, %v26_v2  ;;  %v24_v6 = vld [vmem:[%s3814_s0 + $0x8] sm:$0xff]  ;;  %v27_v9 = vld [vmem:[%s3814_s0 + $0x20] sm:$0xff]  ;;  %v30_v16 = vld [vmem:[%s3814_s0 + $0x38] sm:$0xff] }
   0x3   :  { %v32_v7 = vmul.f32 %v24_v6, %v24_v6  ;;  %v28_v8 = vld [vmem:[%s3814_s0 + $0x28] sm:$0xff]  ;;  %v35_v15 = vmul.f32 %v27_v9, %v27_v9  ;;  %v29_v17 = vld [vmem:[%s3814_s0 + $0x30] sm:$0xff]  ;;  %v38_v20 = vmul.f32 %v30_v16, %v30_v16  ;;  %v2434_v31 = vld [vmem:[%s3815_s1] ss:$0 sm:$0xff] }
   0x4   :  { %v46_v10 = vsel %vm39_vm0, %v33_v3, 0.0  ;;  %v40_v11 = vsel %vm39_vm0, %v31_v4, 0.0  ;;  %v49_v12 = vsel %vm39_vm0, %v34_v5, 0.0  ;;  %v36_v14 = vmul.f32 %v28_v8, %v28_v8 }
   0x5   :  { %47 = vadd.xlane.f32.xlu1 %v46_v10  ;;  %41 = vadd.xlane.f32.xlu0 %v40_v11  ;;  %v43_v13 = vsel %vm39_vm0, %v32_v7, 0.0  ;;  %v52_v19 = vsel %vm39_vm0, %v35_v15, 0.0  ;;  %v37_v21 = vmul.f32 %v29_v17, %v29_v17  ;;  %v61_v22 = vsel %vm39_vm0, %v38_v20, 0.0 }
   0x6   :  { %v55_v18 = vsel %vm39_vm0, %v36_v14, 0.0  ;;  %v3827_v4 = vmov 683565275   ;;  %v3825_v8 = vmov 2475754826  }
   0x7   :  { %v58_v23 = vsel %vm39_vm0, %v37_v21, 0.0  ;;  %v3830_v10 = vmov 2131351028   ;;  %v3840_v14 = vmov 920167782  }
   0x8   :  { %v3833_v21 = vmov 1326507024  }
   0x9   :  { %50 = vadd.xlane.f32.xlu1 %v49_v12  ;;  %44 = vadd.xlane.f32.xlu0 %v43_v13  ;;  %v3823_v12 = vmov 2102212464  }
   0xd   :  { %56 = vadd.xlane.f32.xlu1 %v55_v18  ;;  %53 = vadd.xlane.f32.xlu0 %v52_v19 }
  0x11   :  { %62 = vadd.xlane.f32.xlu1 %v61_v22  ;;  %59 = vadd.xlane.f32.xlu0 %v58_v23 }
  0x8e   :  { %v48_v24 = vpop.xlane.xlu1 %47  ;;  %v42_v25 = vpop.xlane.xlu0 %41 }
  0x8f   :  { %v66_v26 = vmax.f32 %v48_v24, 1e-12  ;;  %v64_v27 = vmax.f32 %v42_v25, 1e-12 }
  0x91   :  { %2258 = vrsqrt.f32 %v66_v26 }
  0x92   :  { %2260 = vrsqrt.f32 %v64_v27  ;;  %v51_v28 = vpop.xlane.xlu1 %50  ;;  %v2453_v41 = vpop.xlane.xlu0 %44 }
  0x93   :  { %v67_v29 = vmax.f32 %v51_v28, 1e-12  ;;  %v65_v48 = vmax.f32 %v2453_v41, 1e-12 }
  0x95   :  { %2262 = vrsqrt.f32 %v67_v29 }
  0x96   :  { %v2460_v50 = vpop.xlane.xlu1 %56  ;;  %v2464_v55 = vpop.xlane.xlu0 %53  ;;  %2264 = vrsqrt.f32 %v65_v48 }
  0x97   :  { %v69_v58 = vmax.f32 %v2460_v50, 1e-12  ;;  %v68_v62 = vmax.f32 %v2464_v55, 1e-12 }
  0x99   :  { %2266 = vrsqrt.f32 %v69_v58 }
  0x9a   :  { %2268 = vrsqrt.f32 %v68_v62 }
  0x9e   :  { %v2429_v30 = vpop.eup %2258 }
  0x9f   :  { %3890 = vst [vmem:[#allocation2_spill] sm:$0xff] %v2429_v30  ;;  %v2436_v32 = vpop.eup %2260  ;;  %v82_v33 = vmul.f32 %v2429_v30, %v48_v24 }
  0xa0   :  { %3891 = vst [vmem:[#allocation3_spill] sm:$0xff] %v2436_v32  ;;  %v2440_v34 = vmul.f32 %v2436_v32, %v42_v25 }
  0xa1   :  { %v2443_v35 = vmul.f32 %v2434_v31, %v82_v33  ;;  %v2462_v52 = vmul.f32 0.33333334, %v82_v33 }
  0xa2   :  { %v2447_v36 = vmul.f32 %v2434_v31, %v2440_v34  ;;  %v2466_v56 = vpop.eup %2262 }
  0xa3   :  { %3892 = vst [vmem:[#allocation4_spill] sm:$0xff] %v2443_v35  ;;  %v3829_v37 = vand.u32 2147483647, %v2443_v35  ;;  %v897_v38 = vand.u32 2139095040, %v2443_v35  ;;  %3893 = vst [vmem:[#allocation5_spill] sm:$0xff] %v2462_v52  ;;  %v2474_v0 = vmul.f32 %v2462_v52, %v2462_v52  ;;  %v2479_v2 = vmul.f32 %v2466_v56, %v51_v28 }
  0xa4   :  { %v3822_v39 = vand.u32 2147483647, %v2447_v36  ;;  %v689_v40 = vand.u32 2139095040, %v2447_v36  ;;  %vm896_vm13 = vcmp.lt.s32.totalorder %v2443_v35, 0 }
  0xa5   :  { %v898_v42 = vshrl.u32 %v897_v38, 23  ;;  %v901_v43 = vand.u32 8388607, %v3829_v37 }
  0xa6   :  { %v690_v44 = vshrl.u32 %v689_v40, 23  ;;  %v693_v45 = vand.u32 8388607, %v3822_v39 }
  0xa7   :  { %v1998_v46 = vadd.s32 4294967169, %v898_v42  ;;  %v902_v51 = vor.u32 8388608, %v901_v43 }
  0xa8   :  { %v1990_v47 = vadd.s32 4294967169, %v690_v44  ;;  %v694_v53 = vor.u32 8388608, %v693_v45 }
  0xa9   :  { %v904_v49 = vadd.s32 1, %v1998_v46  ;;  %v2470_v63 = vshll.u32 %v902_v51, 8 }
  0xaa   :  { %v696_v54 = vadd.s32 1, %v1990_v47  ;;  %v2476_v1 = vshll.u32 %v694_v53, 8 }
  0xab   :  { %vm905_vm1 = vcmp.gt.s32.totalorder %v904_v49, 0 }
  0xac   :  { %v906_v57 = vsel %vm905_vm1, %v904_v49, 0  ;;  %vm697_vm2 = vcmp.gt.s32.totalorder %v696_v54, 0 }
  0xad   :  { %v907_v59 = vshrl.u32 %v906_v57, 5  ;;  %v908_v60 = vand.u32 31, %v906_v57  ;;  %v698_v61 = vsel %vm697_vm2, %v696_v54, 0 }
  0xae   :  { %v2482_v6 = vshrl.u32 %v698_v61, 5  ;;  %v700_v7 = vand.u32 31, %v698_v61 }
  0xaf   :  { %v909_v3 = vsub.s32 32, %v908_v60  ;;  %v911_v5 = vshll.u32 %v3827_v4, %v908_v60  ;;  %v914_v9 = vshll.u32 %v3825_v8, %v908_v60  ;;  %v917_v11 = vshll.u32 %v3830_v10, %v908_v60 }
  0xb0   :  { %v920_v13 = vshll.u32 %v3823_v12, %v908_v60  ;;  %v923_v15 = vshll.u32 %v3840_v14, %v908_v60  ;;  %vm926_vm3 = vcmp.lt.s32.totalorder %v907_v59, 1  ;;  %vm927_vm4 = vcmp.lt.s32.totalorder %v907_v59, 2  ;;  %v2504_v60 = vpop.eup %2264 }
  0xb1   :  { %v912_v16 = vshrl.u32 %v3825_v8, %v909_v3  ;;  %v915_v17 = vshrl.u32 %v3830_v10, %v909_v3  ;;  %v918_v18 = vshrl.u32 %v3823_v12, %v909_v3  ;;  %v910_v19 = vshrl.u32 %v3827_v4, %v909_v3  ;;  %3894 = vst [vmem:[#allocation6_spill] sm:$0xff] %v2504_v60 }
  0xb2   :  { %v921_v20 = vshrl.u32 %v3840_v14, %v909_v3  ;;  %v924_v22 = vshrl.u32 %v3833_v21, %v909_v3  ;;  %v701_v26 = vsub.s32 32, %v700_v7  ;;  %vm928_vm5 = vcmp.lt.s32.totalorder %v907_v59, 3 }
  0xb3   :  { %v913_v23 = vor.u32 %v912_v16, %v911_v5  ;;  %v916_v24 = vor.u32 %v915_v17, %v914_v9  ;;  %v919_v25 = vor.u32 %v918_v18, %v917_v11  ;;  %vm929_vm6 = vcmp.lt.s32.totalorder %v907_v59, 4 }
  0xb4   :  { %v922_v27 = vor.u32 %v921_v20, %v920_v13  ;;  %v925_v28 = vor.u32 %v924_v22, %v923_v15  ;;  %v703_v45 = vshll.u32 %v3827_v4, %v700_v7  ;;  %v704_v48 = vshrl.u32 %v3825_v8, %v701_v26 }
  0xb5   :  { %v930_v29 = vsel %vm926_vm3, %v910_v19, %v913_v23  ;;  %v931_v33 = vsel %vm929_vm6, %v919_v25, 2102212464  ;;  %v934_v38 = vsel %vm926_vm3, %v913_v23, %v916_v24  ;;  %v938_v40 = vsel %vm926_vm3, %v916_v24, %v919_v25 }
  0xb6   :  { %v932_v42 = vsel %vm928_vm5, %v916_v24, %v931_v33  ;;  %v935_v43 = vsel %vm929_vm6, %v922_v27, 920167782  ;;  %v939_v44 = vsel %vm929_vm6, %v925_v28, 1326507024  ;;  %v706_v49 = vshll.u32 %v3825_v8, %v700_v7 }
  0xb7   :  { %v936_v46 = vsel %vm928_vm5, %v919_v25, %v935_v43  ;;  %v940_v47 = vsel %vm928_vm5, %v922_v27, %v939_v44  ;;  %v933_v51 = vsel %vm927_vm4, %v930_v29, %v932_v42  ;;  %v707_v57 = vshrl.u32 %v3830_v10, %v701_v26  ;;  %v2535_v43 = vpop.xlane.xlu1 %62 }
  0xb8   :  { %v937_v53 = vsel %vm927_vm4, %v934_v38, %v936_v46  ;;  %v941_v54 = vsel %vm927_vm4, %v938_v40, %v940_v47  ;;  %v705_v11 = vor.u32 %v704_v48, %v703_v45  ;;  %v709_v15 = vshll.u32 %v3830_v10, %v700_v7 }
  0xb9   :  { %v2507_v61 = vmul.u32.u64.low %v2470_v63, %v941_v54  ;;  %v2508_v3 = vmul.u32.u64.high %v2470_v63, %v941_v54, %v2507_v61  ;;  %v2511_v5 = vmul.u32.u64.low %v2470_v63, %v937_v53  ;;  %v2512_v9 = vmul.u32.u64.high %v2470_v63, %v937_v53, %v2511_v5  ;;  %v2542_v54 = vpop.xlane.xlu0 %59 }
  0xba   :  { %v708_v13 = vor.u32 %v707_v57, %v706_v49  ;;  %v710_v59 = vshrl.u32 %v3823_v12, %v701_v26  ;;  %v712_v16 = vshll.u32 %v3823_v12, %v700_v7  ;;  %v713_v17 = vshrl.u32 %v3840_v14, %v701_v26 }
  0xbb   :  { %v716_v18 = vshrl.u32 %v3833_v21, %v701_v26  ;;  %v2522_v19 = vmul.f32 %v2434_v31, %v2479_v2  ;;  %v949_v20 = vmul.u32 %v2470_v63, %v933_v51  ;;  %v702_v22 = vshrl.u32 %v3827_v4, %v701_v26 }
  0xbc   :  { %v711_v23 = vor.u32 %v710_v59, %v709_v15  ;;  %v715_v24 = vshll.u32 %v3840_v14, %v700_v7  ;;  %vm951_vm7 = vc.u32 %v2508_v3, %v2511_v5  ;;  %v952_v25 = vadd.s32 1, %v2512_v9 }
  0xbd   :  { %3895 = vst [vmem:[#allocation7_spill] sm:$0xff] %v2522_v19  ;;  %v714_v27 = vor.u32 %v713_v17, %v712_v16  ;;  %vm718_vm8 = vcmp.lt.s32.totalorder %v2482_v6, 1  ;;  %vm720_vm9 = vcmp.lt.s32.totalorder %v2482_v6, 3  ;;  %vm721_vm10 = vcmp.lt.s32.totalorder %v2482_v6, 4 }
  0xbe   :  { %v717_v28 = vor.u32 %v716_v18, %v715_v24  ;;  %v726_v29 = vsel %vm718_vm8, %v705_v11, %v708_v13  ;;  %v953_v63 = vsel %vm951_vm7, %v952_v25, %v2512_v9  ;;  %v723_v26 = vsel %vm721_vm10, %v711_v23, 2102212464 }
  0xbf   :  { %v727_v33 = vsel %vm721_vm10, %v714_v27, 920167782  ;;  %v730_v38 = vsel %vm718_vm8, %v708_v13, %v711_v23  ;;  %v954_v7 = vadd.s32 %v953_v63, %v949_v20  ;;  %vm719_vm11 = vcmp.lt.s32.totalorder %v2482_v6, 2 }
  0xc0   :  { %v728_v40 = vsel %vm720_vm9, %v711_v23, %v727_v33  ;;  %v731_v42 = vsel %vm721_vm10, %v717_v28, 1326507024  ;;  %v722_v44 = vsel %vm718_vm8, %v702_v22, %v705_v11  ;;  %v724_v45 = vsel %vm720_vm9, %v708_v13, %v723_v26 }
  0xc1   :  { %v729_v46 = vsel %vm719_vm11, %v726_v29, %v728_v40  ;;  %v732_v47 = vsel %vm720_vm9, %v714_v27, %v731_v42  ;;  %v955_v48 = vadd.s32 536870912, %v954_v7  ;;  %v71_v61 = vmax.f32 %v2535_v43, 1e-12 }
  0xc2   :  { %v733_v49 = vsel %vm719_vm11, %v730_v38, %v732_v47  ;;  %v2538_v51 = vmul.u32.u64.low %v2476_v1, %v729_v46  ;;  %v2539_v53 = vmul.u32.u64.high %v2476_v1, %v729_v46, %v2538_v51  ;;  %v725_v11 = vsel %vm719_vm11, %v722_v44, %v724_v45 }
  0xc3   :  { %v2545_v57 = vmul.u32.u64.low %v2476_v1, %v733_v49  ;;  %v2546_v6 = vmul.u32.u64.high %v2476_v1, %v733_v49, %v2545_v57  ;;  %v956_v9 = vshrl.u32 %v955_v48, 30  ;;  %v1001_v13 = vand.u32 2139095040, %v2522_v19 }
  0xc4   :  { %v1553_v15 = vmul.f32 %v2474_v0, %v2474_v0  ;;  %v70_v59 = vmax.f32 %v2542_v54, 1e-12  ;;  %v1609_v17 = vmul.f32 %v2474_v0, %v2462_v52  ;;  %v744_v18 = vadd.s32 1, %v2539_v53 }
  0xc5   :  { %v957_v16 = vshll.u32 %v956_v9, 30  ;;  %v1002_v20 = vshrl.u32 %v1001_v13, 23  ;;  %v741_v22 = vmul.u32 %v2476_v1, %v725_v11  ;;  %vm743_vm12 = vc.u32 %v2546_v6, %v2538_v51 }
  0xc6   :  { %v3821_v58 = vand.u32 2147483647, %v2522_v19  ;;  %2270 = vrsqrt.f32 %v71_v61  ;;  %v745_v62 = vsel %vm743_vm12, %v744_v18, %v2539_v53  ;;  %v2568_v25 = vmul.f32 0.33333334, %v2479_v2 }
  0xc7   :  { %v2564_v23 = vsub.s32 %v954_v7, %v957_v16  ;;  %v2002_v24 = vadd.s32 4294967169, %v1002_v20  ;;  %v1561_v27 = vmul.f32 %v1553_v15, %v2462_v52  ;;  %v746_v28 = vadd.s32 %v745_v62, %v741_v22 }
  0xc8   :  { %3896 = vst [vmem:[#allocation8_spill] sm:$0xff] %v2568_v25  ;;  %v2572_v29 = vmul.f32 0.33333334, %v2440_v34  ;;  %2272 = vrsqrt.f32 %v70_v59  ;;  %v1585_v63 = vmul.f32 %v1553_v15, %v2474_v0  ;;  %v1617_v26 = vmul.f32 %v1609_v17, %v1553_v15  ;;  %v2615_v17 = vpop.eup %2266 }
  0xc9   :  { %v960_v1 = vsub.s32 0, %v2564_v23  ;;  %v1008_v33 = vadd.s32 1, %v2002_v24  ;;  %v747_v38 = vadd.s32 536870912, %v746_v28  ;;  %v1005_v2 = vand.u32 8388607, %v3821_v58  ;;  %v2623_v22 = vpop.eup %2268 }
  0xca   :  { %3897 = vst [vmem:[#allocation9_spill] sm:$0xff] %v2572_v29  ;;  %v2581_v7 = vmul.f32 %v2504_v60, %v2453_v41  ;;  %v980_v40 = vsub.s32 4, %v956_v9  ;;  %v2586_v42 = vmul.f32 %v2568_v25, %v2568_v25  ;;  %v2588_v0 = vmul.f32 21.0, %v1561_v27 }
  0xcb   :  { %v1999_v34 = vmin.u32 %v960_v1, %v2564_v23  ;;  %vm1009_vm14 = vcmp.gt.s32.totalorder %v1008_v33, 0  ;;  %v2590_v44 = vshrl.u32 %v747_v38, 30  ;;  %v2594_v45 = vmul.f32 %v2572_v29, %v2572_v29 }
  0xcc   :  { %v1010_v46 = vsel %vm1009_vm14, %v1008_v33, 0  ;;  %v2596_v41 = vmul.f32 35.0, %v1585_v63  ;;  %v2598_v48 = vmul.f32 15.0, %v1617_v26  ;;  %v950_v53 = vadd.s32 %v2511_v5, %v2508_v3 }
  0xcd   :  { %3898 = vst [vmem:[#allocation10_spill] sm:$0xff] %v2594_v45  ;;  %v962_v47 = vclz %v1999_v34  ;;  %v1012_v49 = vand.u32 31, %v1010_v46  ;;  %v749_v57 = vshll.u32 %v2590_v44, 30  ;;  %v1006_v61 = vor.u32 8388608, %v1005_v2 }
  0xce   :  { %3899 = vst [vmem:[#allocation11_spill] sm:$0xff] %v2598_v48  ;;  %v2605_v11 = vmul.f32 %v2434_v31, %v2581_v7  ;;  %v2609_v15 = vsel %vm896_vm13, %v980_v40, %v956_v9  ;;  %v2613_v16 = vmul.f32 %v2586_v42, %v2586_v42  ;;  %v2619_v5 = vshrl.u32 %v1010_v46, 5 }
  0xcf   :  { %v2000_v13 = vadd.s32 4294967294, %v962_v47  ;;  %v1013_v59 = vsub.s32 32, %v1012_v49  ;;  %v2617_v3 = vsub.s32 %v746_v28, %v749_v57  ;;  %v1015_v18 = vshll.u32 %v3827_v4, %v1012_v49 }
  0xd0   :  { %v1018_v20 = vshll.u32 %v3825_v8, %v1012_v49  ;;  %v1024_v24 = vshll.u32 %v3823_v12, %v1012_v49  ;;  %v1021_v2 = vshll.u32 %v3830_v10, %v1012_v49  ;;  %v1027_v34 = vshll.u32 %v3840_v14, %v1012_v49 }
  0xd1   :  { %vm2001_vm15 = vcmp.lt.s32.totalorder %v2000_v13, 0  ;;  %v1016_v9 = vshrl.u32 %v3825_v8, %v1013_v59  ;;  %v1019_v62 = vshrl.u32 %v3830_v10, %v1013_v59  ;;  %v752_v1 = vsub.s32 0, %v2617_v3 }
  0xd2   :  { %v965_v27 = vsel %vm2001_vm15, 0, %v2000_v13  ;;  %v1022_v28 = vshrl.u32 %v3823_v12, %v1013_v59  ;;  %v1025_v63 = vshrl.u32 %v3840_v14, %v1013_v59  ;;  %v1028_v8 = vshrl.u32 %v3833_v21, %v1013_v59 }
  0xd3   :  { %v2631_v26 = vpop.eup %2270  ;;  %v966_v33 = vsub.s32 32, %v965_v27  ;;  %v970_v38 = vsub.s32 4294967266, %v965_v27  ;;  %v1991_v40 = vmin.u32 %v752_v1, %v2617_v3  ;;  %v1017_v46 = vor.u32 %v1016_v9, %v1015_v18 }
  0xd4   :  { %v1020_v47 = vor.u32 %v1019_v62, %v1018_v20  ;;  %v1026_v57 = vor.u32 %v1025_v63, %v1024_v24  ;;  %v1023_v12 = vor.u32 %v1022_v28, %v1021_v2  ;;  %v967_v4 = vshll.u32 %v2564_v23, %v965_v27 }
  0xd5   :  { %v2636_v13 = vpop.eup %2272  ;;  %v968_v58 = vshrl.u32 %v950_v53, %v966_v33  ;;  %v971_v39 = vadd.s32 127, %v970_v38  ;;  %v754_v37 = vclz %v1991_v40  ;;  %vm1030_vm1 = vcmp.lt.s32.totalorder %v2619_v5, 1 }
  0xd6   :  { %v1046_v10 = vshll.u32 %v1006_v61, 8  ;;  %v1029_v49 = vor.u32 %v1028_v8, %v1027_v34  ;;  %vm1031_vm2 = vcmp.lt.s32.totalorder %v2619_v5, 2  ;;  %vm1033_vm3 = vcmp.lt.s32.totalorder %v2619_v5, 4 }
  0xd7   :  { %v972_v48 = vshll.u32 %v971_v39, 23  ;;  %v3900_v18 = vand.u32 2147483647, %v2443_v35  ;;  %v1992_v20 = vadd.s32 4294967294, %v754_v37  ;;  %vm1032_vm5 = vcmp.lt.s32.totalorder %v2619_v5, 3 }
  0xd8   :  { %v1038_v23 = vsel %vm1030_vm1, %v1017_v46, %v1020_v47  ;;  %v1039_v39 = vsel %vm1033_vm3, %v1026_v57, 920167782  ;;  %v969_v8 = vor.u32 %v968_v58, %v967_v4  ;;  %v1035_v9 = vsel %vm1033_vm3, %v1023_v12, 2102212464 }
  0xd9   :  { %vm2645_vm4 = vcmp.le.f32.partialorder %v3900_v18, 0.7853982  ;;  %v973_v61 = vor.u32 4788187, %v972_v48  ;;  %v1040_v62 = vsel %vm1032_vm5, %v1023_v12, %v1039_v39  ;;  %vm1993_vm6 = vcmp.lt.s32.totalorder %v1992_v20, 0 }
  0xda   :  { %v3903_v24 = vmov 683565275   ;;  %v1041_v37 = vsel %vm1031_vm2, %v1038_v23, %v1040_v62  ;;  %v1042_v1 = vsel %vm1030_vm1, %v1020_v47, %v1023_v12  ;;  %v757_v63 = vsel %vm1993_vm6, 0, %v1992_v20 }
  0xdb   :  { %v1014_v27 = vshrl.u32 %v3903_v24, %v1013_v59  ;;  %v974_v28 = vand.u32 2147483647, %v973_v61  ;;  %v1043_v4 = vsel %vm1033_vm3, %v1029_v49, 1326507024  ;;  %v1562_v58 = vmul.f32 %v2613_v16, %v2568_v25 }
  0xdc   :  { %v762_v48 = vsub.s32 4294967266, %v757_v63  ;;  %v1036_v59 = vsel %vm1032_vm5, %v1020_v47, %v1035_v9  ;;  %v1044_v38 = vsel %vm1032_vm5, %v1026_v57, %v1043_v4  ;;  %v976_v2 = vcvt.s32.f32 %v969_v8 }
  0xdd   :  { %v1034_v33 = vsel %vm1030_vm1, %v1014_v27, %v1017_v46  ;;  %v1045_v12 = vsel %vm1031_vm2, %v1042_v1, %v1044_v38  ;;  %v2675_v34 = vmul.u32.u64.low %v1046_v10, %v1041_v37  ;;  %v2676_v40 = vmul.u32.u64.high %v1046_v10, %v1041_v37, %v2675_v34 }
  0xde   :  { %v758_v49 = vsub.s32 32, %v757_v63  ;;  %v763_v18 = vadd.s32 127, %v762_v48  ;;  %v2679_v20 = vmul.u32.u64.low %v1046_v10, %v1045_v12  ;;  %v2680_v23 = vmul.u32.u64.high %v1046_v10, %v1045_v12, %v2679_v20 }
  0xdf   :  { %v977_v46 = vmul.f32 %v976_v2, %v974_v28  ;;  %v2684_v47 = vmul.f32 %v2594_v45, %v2594_v45  ;;  %v1037_v57 = vsel %vm1031_vm2, %v1034_v33, %v1036_v59  ;;  %v793_v39 = vand.u32 2139095040, %v2605_v11 }
  0xe0   :  { %v1577_v8 = vsub.f32 1.0, %v2588_v0  ;;  %v742_v61 = vadd.s32 %v2538_v51, %v2546_v6  ;;  %v764_v9 = vshll.u32 %v763_v18, 23  ;;  %v3832_v62 = vand.u32 2147483647, %v2605_v11 }
  0xe1   :  { %3904 = vst [vmem:[#allocation12_spill] sm:$0xff] %v2684_v47  ;;  %v983_v27 = vsel %vm2645_vm4, 0, %v2609_v15  ;;  %v1056_v37 = vadd.s32 1, %v2676_v40  ;;  %v1586_v5 = vmul.f32 %v2613_v16, %v2586_v42  ;;  %v794_v1 = vshrl.u32 %v793_v39, 23 }
  0xe2   :  { %v760_v28 = vshrl.u32 %v742_v61, %v758_v49  ;;  %v1053_v4 = vmul.u32 %v1046_v10, %v1037_v57  ;;  %v1570_v48 = vmul.f32 21.0, %v1562_v58  ;;  %v1610_v0 = vmul.f32 %v2586_v42, %v2568_v25 }
  0xe3   :  { %v978_v51 = vxor.u32 2147483648, %v977_v46  ;;  %v759_v6 = vshll.u32 %v2617_v3, %v757_v63  ;;  %vm1055_vm7 = vc.u32 %v2680_v23, %v2675_v34  ;;  %v1994_v33 = vadd.s32 4294967169, %v794_v1 }
  0xe4   :  { %v765_v15 = vor.u32 4788187, %v764_v9  ;;  %v1057_v59 = vsel %vm1055_vm7, %v1056_v37, %v2676_v40  ;;  %v797_v38 = vand.u32 8388607, %v3832_v62  ;;  %v85_v10 = vmul.f32 %v2615_v17, %v2460_v50 }
  0xe5   :  { %v2711_v58 = vmul.f32 %v2594_v45, %v2572_v29  ;;  %v1058_v42 = vadd.s32 %v1057_v59, %v1053_v4  ;;  %v800_v2 = vadd.s32 1, %v1994_v33  ;;  %v2714_v3 = vmul.f32 0.33333334, %v2581_v7 }
  0xe6   :  { %v987_v63 = vadd.s32 3, %v983_v27  ;;  %v761_v12 = vor.u32 %v760_v28, %v759_v6  ;;  %v1578_v49 = vsub.f32 1.0, %v1570_v48  ;;  %v1618_v40 = vmul.f32 %v1610_v0, %v2613_v16 }
  0xe7   :  { %3905 = vst [vmem:[#allocation13_spill] sm:$0xff] %v2711_v58  ;;  %3906 = vst [vmem:[#allocation14_spill] sm:$0xff] %v2714_v3  ;;  %v979_v18 = vsel %vm896_vm13, %v978_v51, %v977_v46  ;;  %v1059_v20 = vadd.s32 536870912, %v1058_v42  ;;  %v1594_v57 = vmul.f32 35.0, %v1586_v5  ;;  %vm801_vm8 = vcmp.gt.s32.totalorder %v800_v2, 0 }
  0xe8   :  { %v766_v50 = vand.u32 2147483647, %v765_v15  ;;  %v798_v39 = vor.u32 8388608, %v797_v38  ;;  %v802_v61 = vsel %vm801_vm8, %v800_v2, 0  ;;  %v2720_v9 = vmul.f32 %v2434_v31, %v85_v10 }
  0xe9   :  { %v2723_v7 = vadd.f32 %v2596_v41, %v1577_v8  ;;  %v2727_v27 = vmul.f32 %v2684_v47, %v2572_v29  ;;  %v2729_v16 = vshrl.u32 %v1059_v20, 30  ;;  %v804_v37 = vand.u32 31, %v802_v61 }
  0xea   :  { %v2731_v46 = vand.u32 3, %v987_v63  ;;  %v768_v5 = vcvt.s32.f32 %v761_v12  ;;  %v2733_v1 = vadd.f32 %v1594_v57, %v1578_v49  ;;  %v2735_v28 = vmul.f32 15.0, %v1618_v40 }
  0xeb   :  { %3907 = vst [vmem:[#allocation15_spill] sm:$0xff] %v2723_v7  ;;  %3908 = vst [vmem:[#allocation16_spill] sm:$0xff] %v2727_v27  ;;  %v2740_v4 = vsel %vm2645_vm4, %v2443_v35, %v979_v18  ;;  %v1061_v41 = vshll.u32 %v2729_v16, 30  ;;  %v805_v8 = vsub.s32 32, %v804_v37  ;;  %v2745_v48 = vmul.f32 %v2714_v3, %v2714_v3 }
  0xec   :  { %3909 = vst [vmem:[#allocation17_spill] sm:$0xff] %v2731_v46  ;;  %3910 = vst [vmem:[#allocation18_spill] sm:$0xff] %v2733_v1  ;;  %v769_v0 = vmul.f32 %v768_v5, %v766_v50  ;;  %v2747_v51 = vshll.u32 %v798_v39, 8  ;;  %v1209_v6 = vand.u32 2139095040, %v2720_v9  ;;  %v2750_v33 = vmul.f32 0.33333334, %v85_v10 }
  0xed   :  { %3911 = vst [vmem:[#allocation19_spill] sm:$0xff] %v2735_v28  ;;  %3912 = vst [vmem:[#allocation20_spill] sm:$0xff] %v2745_v48  ;;  %v2752_v15 = vsub.s32 %v1058_v42, %v1061_v41  ;;  %v803_v59 = vshrl.u32 %v802_v61, 5  ;;  %v807_v53 = vshll.u32 %v3903_v24, %v804_v37  ;;  %v3914_v38 = vmov 2475754826  }
  0xee   :  { %3913 = vst [vmem:[#allocation21_spill] sm:$0xff] %v2750_v33  ;;  %v810_v2 = vshll.u32 %v3914_v38, %v804_v37  ;;  %v808_v63 = vshrl.u32 %v3914_v38, %v805_v8  ;;  %v3915_v12 = vmov 2131351028   ;;  %v3916_v18 = vmov 2102212464  }
  0xef   :  { %v811_v49 = vshrl.u32 %v3915_v12, %v805_v8  ;;  %v813_v40 = vshll.u32 %v3915_v12, %v804_v37  ;;  %v814_v20 = vshrl.u32 %v3916_v18, %v805_v8  ;;  %v1064_v57 = vsub.s32 0, %v2752_v15 }
  0xf0   :  { %v816_v10 = vshll.u32 %v3916_v18, %v804_v37  ;;  %v817_v42 = vshrl.u32 %v3840_v14, %v805_v8  ;;  %v770_v39 = vxor.u32 2147483648, %v769_v0  ;;  %v809_v61 = vor.u32 %v808_v63, %v807_v53 }
  0xf1   :  { %v812_v5 = vor.u32 %v811_v49, %v810_v2  ;;  %v815_v41 = vor.u32 %v814_v20, %v813_v40  ;;  %vm688_vm9 = vcmp.lt.s32.totalorder %v2447_v36, 0  ;;  %v2003_v62 = vmin.u32 %v1064_v57, %v2752_v15 }
  0xf2   :  { %v818_v21 = vor.u32 %v817_v42, %v816_v10  ;;  %v819_v1 = vshll.u32 %v3840_v14, %v804_v37  ;;  %v3917_v28 = vmov 1326507024   ;;  %v806_v46 = vshrl.u32 %v3903_v24, %v805_v8 }
  0xf3   :  { %v820_v7 = vshrl.u32 %v3917_v28, %v805_v8  ;;  %vm822_vm10 = vcmp.lt.s32.totalorder %v803_v59, 1  ;;  %vm825_vm11 = vcmp.lt.s32.totalorder %v803_v59, 4  ;;  %v1210_v35 = vshrl.u32 %v1209_v6, 23 }
  0xf4   :  { %v1066_v25 = vclz %v2003_v62  ;;  %vm823_vm12 = vcmp.lt.s32.totalorder %v803_v59, 2  ;;  %v827_v53 = vsel %vm825_vm11, %v815_v41, 2102212464  ;;  %vm824_vm13 = vcmp.lt.s32.totalorder %v803_v59, 3 }
  0xf5   :  { %v821_v50 = vor.u32 %v820_v7, %v819_v1  ;;  %v830_v2 = vsel %vm822_vm10, %v809_v61, %v812_v5  ;;  %v831_v63 = vsel %vm825_vm11, %v818_v21, 920167782  ;;  %v834_v49 = vsel %vm822_vm10, %v812_v5, %v815_v41 }
  0xf6   :  { %v2004_v40 = vadd.s32 4294967294, %v1066_v25  ;;  %v826_v20 = vsel %vm822_vm10, %v806_v46, %v809_v61  ;;  %v832_v57 = vsel %vm824_vm13, %v815_v41, %v831_v63  ;;  %v3918_v37 = vand.u32 2147483647, %v2447_v36 }
  0xf7   :  { %v835_v10 = vsel %vm825_vm11, %v821_v50, 1326507024  ;;  %v3919_v42 = vmov 0  ;;  %v828_v8 = vsel %vm824_vm13, %v812_v5, %v827_v53  ;;  %v833_v62 = vsel %vm823_vm12, %v830_v2, %v832_v57 }
  0xf8   :  { %vm2771_vm14 = vcmp.le.f32.partialorder %v3918_v37, 0.7853982  ;;  %v836_v7 = vsel %vm824_vm13, %v818_v21, %v835_v10  ;;  %v2010_v1 = vadd.s32 4294967169, %v1210_v35  ;;  %vm2005_vm15 = vcmp.lt.s32.totalorder %v2004_v40, 0 }
  0xf9   :  { %v3920_v42 = vsel %vm2771_vm14, 4294967295, %v3919_v42  ;;  %v837_v6 = vsel %vm823_vm12, %v834_v49, %v836_v7  ;;  %v2778_v14 = vmul.u32.u64.low %v2747_v51, %v833_v62  ;;  %v2779_v25 = vmul.u32.u64.high %v2747_v51, %v833_v62, %v2778_v14 }
  0xfa   :  { %3921 = vst [vmem:[#allocation22_spill] sm:$0xff] %v3920_v42  ;;  %v1069_v46 = vsel %vm2005_vm15, 0, %v2004_v40  ;;  %v2783_v50 = vmul.u32.u64.low %v2747_v51, %v837_v6  ;;  %v2784_v61 = vmul.u32.u64.high %v2747_v51, %v837_v6, %v2783_v50  ;;  %v2788_v5 = vmul.f32 %v2623_v22, %v2464_v55 }
  0xfb   :  { %v1070_v41 = vsub.s32 32, %v1069_v46  ;;  %v1074_v21 = vsub.s32 4294967266, %v1069_v46  ;;  %v829_v35 = vsel %vm823_vm12, %v826_v20, %v828_v8  ;;  %v1216_v53 = vadd.s32 1, %v2010_v1 }
  0xfc   :  { %2274 = vcosq.f32 %v2740_v4  ;;  %v771_v2 = vsel %vm688_vm9, %v770_v39, %v769_v0  ;;  %v1054_v63 = vadd.s32 %v2675_v34, %v2680_v23  ;;  %v2798_v49 = vmul.f32 %v2750_v33, %v2750_v33 }
  0xfd   :  { %v1075_v40 = vadd.s32 127, %v1074_v21  ;;  %v848_v55 = vadd.s32 1, %v2779_v25  ;;  %v3922_v57 = vand.u32 2147483647, %v2720_v9  ;;  %vm1217_vm1 = vcmp.gt.s32.totalorder %v1216_v53, 0 }
  0xfe   :  { %v1072_v20 = vshrl.u32 %v1054_v63, %v1070_v41  ;;  %v845_v10 = vmul.u32 %v2747_v51, %v829_v35  ;;  %vm847_vm2 = vc.u32 %v2784_v61, %v2778_v14  ;;  %v1218_v0 = vsel %vm1217_vm1, %v1216_v53, 0 }
  0xff   :  { %v1213_v59 = vand.u32 8388607, %v3922_v57  ;;  %2276 = vsinq.f32 %v2740_v4  ;;  %v1076_v34 = vshll.u32 %v1075_v40, 23  ;;  %v849_v23 = vsel %vm847_vm2, %v848_v55, %v2779_v25 }
 0x100   :  { %v2810_v39 = vmul.f32 %v2745_v48, %v2745_v48  ;;  %v1071_v37 = vshll.u32 %v2752_v15, %v1069_v46  ;;  %v850_v8 = vadd.s32 %v849_v23, %v845_v10  ;;  %v1220_v62 = vand.u32 31, %v1218_v0 }
 0x101   :  { %v2815_v51 = vmul.f32 %v2434_v31, %v2788_v5  ;;  %v2820_v7 = vsel %vm2771_vm14, %v2447_v36, %v771_v2  ;;  %v1084_v4 = vsub.s32 4, %v2729_v16  ;;  %v1214_v1 = vor.u32 8388608, %v1213_v59 }
 0x102   :  { %3923 = vst [vmem:[#allocation23_spill] sm:$0xff] %v2810_v39  ;;  %v2825_v6 = vmul.f32 %v2798_v49, %v2798_v49  ;;  %v1073_v25 = vor.u32 %v1072_v20, %v1071_v37  ;;  %v851_v15 = vadd.s32 536870912, %v850_v8  ;;  %v1219_v46 = vshrl.u32 %v1218_v0, 5 }
 0x103   :  { %v1221_v50 = vsub.s32 32, %v1220_v62  ;;  %v1077_v41 = vor.u32 4788187, %v1076_v34  ;;  %v1223_v31 = vshll.u32 %v3903_v24, %v1220_v62  ;;  %v1226_v21 = vshll.u32 %v3914_v38, %v1220_v62 }
 0x104   :  { %v1229_v35 = vshll.u32 %v3915_v12, %v1220_v62  ;;  %vm1000_vm3 = vcmp.lt.s32.totalorder %v2522_v19, 0  ;;  %v2831_v53 = vshrl.u32 %v851_v15, 30  ;;  %v1232_v40 = vshll.u32 %v3916_v18, %v1220_v62 }
 0x105   :  { %v1224_v2 = vshrl.u32 %v3914_v38, %v1221_v50  ;;  %v1227_v63 = vshrl.u32 %v3915_v12, %v1221_v50  ;;  %v1230_v55 = vshrl.u32 %v3916_v18, %v1221_v50  ;;  %v3924_v57 = vmov 920167782  }
 0x106   :  { %v1233_v59 = vshrl.u32 %v3924_v57, %v1221_v50  ;;  %v1235_v20 = vshll.u32 %v3924_v57, %v1220_v62  ;;  %v1236_v10 = vshrl.u32 %v3917_v28, %v1221_v50  ;;  %v853_v0 = vshll.u32 %v2831_v53, 30 }
 0x107   :  { %v1225_v34 = vor.u32 %v1224_v2, %v1223_v31  ;;  %v1228_v23 = vor.u32 %v1227_v63, %v1226_v21  ;;  %vm1238_vm4 = vcmp.lt.s32.totalorder %v1219_v46, 1  ;;  %v1078_v37 = vand.u32 2147483647, %v1077_v41 }
 0x108   :  { %v1231_v15 = vor.u32 %v1230_v55, %v1229_v35  ;;  %v1234_v52 = vor.u32 %v1233_v59, %v1232_v40  ;;  %v1237_v29 = vor.u32 %v1236_v10, %v1235_v20  ;;  %v3925_v58 = vand.u32 2147483647, %v2522_v19 }
 0x109   :  { %v1080_v45 = vcvt.s32.f32 %v1073_v25  ;;  %v2847_v27 = vsub.s32 %v850_v8, %v853_v0  ;;  %vm1241_vm6 = vcmp.lt.s32.totalorder %v1219_v46, 4  ;;  %v1246_v62 = vsel %vm1238_vm4, %v1225_v34, %v1228_v23  ;;  %v2850_v42 = vpop.eup %2274 }
 0x10a   :  { %vm2843_vm5 = vcmp.le.f32.partialorder %v3925_v58, 0.7853982  ;;  %3928 = vst [vmem:[#allocation24_spill] sm:$0xff] %v2850_v42  ;;  %vm1239_vm7 = vcmp.lt.s32.totalorder %v1219_v46, 2  ;;  %vm1240_vm8 = vcmp.lt.s32.totalorder %v1219_v46, 3  ;;  %v1222_v35 = vshrl.u32 %v3903_v24, %v1221_v50 }
 0x10b   :  { %v1243_v41 = vsel %vm1241_vm6, %v1231_v15, 2102212464  ;;  %v1247_v31 = vsel %vm1241_vm6, %v1234_v52, 920167782  ;;  %v856_v21 = vsub.s32 0, %v2847_v27  ;;  %v1250_v2 = vsel %vm1238_vm4, %v1228_v23, %v1231_v15 }
 0x10c   :  { %v1248_v58 = vsel %vm1240_vm8, %v1231_v15, %v1247_v31  ;;  %v1081_v63 = vmul.f32 %v1080_v45, %v1078_v37  ;;  %v1251_v25 = vsel %vm1241_vm6, %v1237_v29, 1326507024  ;;  %v1254_v40 = vshll.u32 %v1214_v1, 8  ;;  %v2856_v55 = vpop.eup %2276 }
 0x10d   :  { %v1249_v8 = vsel %vm1239_vm7, %v1246_v62, %v1248_v58  ;;  %3929 = vst [vmem:[#allocation25_spill] sm:$0xff] %v2856_v55  ;;  %v1995_v59 = vmin.u32 %v856_v21, %v2847_v27  ;;  %v1242_v20 = vsel %vm1238_vm4, %v1222_v35, %v1225_v34  ;;  %v1244_v10 = vsel %vm1240_vm8, %v1228_v23, %v1243_v41 }
 0x10e   :  { %v1252_v0 = vsel %vm1240_vm8, %v1234_v52, %v1251_v25  ;;  %v1085_v50 = vsel %vm1000_vm3, %v1084_v4, %v2729_v16  ;;  %v2864_v15 = vmul.u32.u64.low %v1254_v40, %v1249_v8  ;;  %v2865_v45 = vmul.u32.u64.high %v1254_v40, %v1249_v8, %v2864_v15 }
 0x10f   :  { %v1253_v31 = vsel %vm1239_vm7, %v1250_v2, %v1252_v0  ;;  %v858_v29 = vclz %v1995_v59  ;;  %v1564_v62 = vmul.f32 %v2825_v6, %v2750_v33  ;;  %2278 = vcosq.f32 %v2820_v7 }
 0x110   :  { %v2868_v1 = vmul.u32.u64.low %v1254_v40, %v1253_v31  ;;  %v2869_v37 = vmul.u32.u64.high %v1254_v40, %v1253_v31, %v2868_v1  ;;  %v1082_v52 = vxor.u32 2147483648, %v1081_v63  ;;  %v1245_v34 = vsel %vm1239_vm7, %v1242_v20, %v1244_v10 }
 0x111   :  { %v1105_v16 = vand.u32 2139095040, %v2815_v51  ;;  %2280 = vsinq.f32 %v2820_v7  ;;  %v1996_v4 = vadd.s32 4294967294, %v858_v29  ;;  %v2879_v23 = vmul.f32 %v2810_v39, %v2714_v3 }
 0x112   :  { %v2883_v41 = vmul.f32 %v2745_v48, %v2714_v3  ;;  %v1087_v21 = vsel %vm2843_vm5, 0, %v1085_v50  ;;  %v846_v46 = vadd.s32 %v2778_v14, %v2784_v61  ;;  %v1264_v35 = vadd.s32 1, %v2865_v45 }
 0x113   :  { %3930 = vst [vmem:[#allocation26_spill] sm:$0xff] %v2879_v23  ;;  %v1106_v58 = vshrl.u32 %v1105_v16, 23  ;;  %vm1997_vm10 = vcmp.lt.s32.totalorder %v1996_v4, 0  ;;  %v1261_v7 = vmul.u32 %v1254_v40, %v1245_v34  ;;  %vm1263_vm11 = vc.u32 %v2869_v37, %v2864_v15 }
 0x114   :  { %3931 = vst [vmem:[#allocation27_spill] sm:$0xff] %v2883_v41  ;;  %v1572_v2 = vmul.f32 21.0, %v1564_v62  ;;  %v1083_v8 = vsel %vm1000_vm3, %v1082_v52, %v1081_v63  ;;  %v861_v25 = vsel %vm1997_vm10, 0, %v1996_v4  ;;  %v1265_v59 = vsel %vm1263_vm11, %v1264_v35, %v2865_v45 }
 0x115   :  { %v2006_v20 = vadd.s32 4294967169, %v1106_v58  ;;  %v862_v10 = vsub.s32 32, %v861_v25  ;;  %v866_v0 = vsub.s32 4294967266, %v861_v25  ;;  %v1266_v50 = vadd.s32 %v1265_v59, %v1261_v7 }
 0x116   :  { %v3850_v14 = vand.u32 2147483647, %v2815_v51  ;;  %v1091_v61 = vadd.s32 3, %v1087_v21  ;;  %v1588_v40 = vmul.f32 %v2825_v6, %v2798_v49  ;;  %v1612_v31 = vmul.f32 %v2798_v49, %v2750_v33 }
 0x117   :  { %v1112_v29 = vadd.s32 1, %v2006_v20  ;;  %v1086_v63 = vsel %vm2843_vm5, %v2522_v19, %v1083_v8  ;;  %v864_v1 = vshrl.u32 %v846_v46, %v862_v10  ;;  %v867_v45 = vadd.s32 127, %v866_v0 }
 0x118   :  { %v1267_v62 = vadd.s32 536870912, %v1266_v50  ;;  %v863_v52 = vshll.u32 %v2847_v27, %v861_v25  ;;  %v1580_v34 = vsub.f32 1.0, %v1572_v2  ;;  %v2905_v16 = vmul.f32 0.33333334, %v2788_v5 }
 0x119   :  { %vm1113_vm12 = vcmp.gt.s32.totalorder %v1112_v29, 0  ;;  %v868_v4 = vshll.u32 %v867_v45, 23  ;;  %v1109_v49 = vand.u32 8388607, %v3850_v14  ;;  %2282 = vcosq.f32 %v1086_v63 }
 0x11a   :  { %3932 = vst [vmem:[#allocation28_spill] sm:$0xff] %v2905_v16  ;;  %v1268_v21 = vshrl.u32 %v1267_v62, 30  ;;  %v1114_v35 = vsel %vm1113_vm12, %v1112_v29, 0  ;;  %v865_v58 = vor.u32 %v864_v1, %v863_v52  ;;  %v1596_v47 = vmul.f32 35.0, %v1588_v40 }
 0x11b   :  { %v1116_v7 = vand.u32 31, %v1114_v35  ;;  %2284 = vsinq.f32 %v1086_v63  ;;  %v2909_v46 = vand.u32 3, %v1091_v61  ;;  %v869_v8 = vor.u32 4788187, %v868_v4 }
 0x11c   :  { %vm1208_vm13 = vcmp.lt.s32.totalorder %v2720_v9, 0  ;;  %v1269_v27 = vshll.u32 %v1268_v21, 30  ;;  %v2912_v2 = vadd.f32 %v1596_v47, %v1580_v34  ;;  %v2915_v5 = vmul.f32 %v1612_v31, %v2825_v6  ;;  %v2921_v20 = vpop.eup %2278 }
 0x11d   :  { %3933 = vst [vmem:[#allocation29_spill] sm:$0xff] %v2909_v46  ;;  %v1117_v25 = vsub.s32 32, %v1116_v7  ;;  %v2919_v59 = vmul.f32 %v2631_v26, %v2535_v43  ;;  %v870_v10 = vand.u32 2147483647, %v869_v8  ;;  %v1110_v61 = vor.u32 8388608, %v1109_v49 }
 0x11e   :  { %3934 = vst [vmem:[#allocation30_spill] sm:$0xff] %v2912_v2  ;;  %v2923_v0 = vsub.s32 %v1266_v50, %v1269_v27  ;;  %v1547_v40 = vmul.f32 %v2905_v16, %v2905_v16  ;;  %v2927_v29 = vpop.eup %2280  ;;  %v872_v63 = vcvt.s32.f32 %v865_v58  ;;  %v1115_v1 = vshrl.u32 %v1114_v35, 5 }
 0x11f   :  { %v1120_v6 = vshrl.u32 %v3914_v38, %v1117_v25  ;;  %v1123_v31 = vshrl.u32 %v3915_v12, %v1117_v25  ;;  %v1119_v45 = vshll.u32 %v3903_v24, %v1116_v7  ;;  %v1122_v62 = vshll.u32 %v3914_v38, %v1116_v7 }
 0x120   :  { %v1272_v43 = vsub.s32 0, %v2923_v0  ;;  %v1126_v50 = vshrl.u32 %v3916_v18, %v1117_v25  ;;  %v1292_v52 = vsub.s32 4, %v1268_v21  ;;  %v1125_v34 = vshll.u32 %v3915_v12, %v1116_v7 }
 0x121   :  { %v1128_v4 = vshll.u32 %v3916_v18, %v1116_v7  ;;  %v1129_v49 = vshrl.u32 %v3924_v57, %v1117_v25  ;;  %v873_v35 = vmul.f32 %v872_v63, %v870_v10  ;;  %v1121_v47 = vor.u32 %v1120_v6, %v1119_v45 }
 0x122   :  { %v2011_v58 = vmin.u32 %v1272_v43, %v2923_v0  ;;  %v1124_v8 = vor.u32 %v1123_v31, %v1122_v62  ;;  %v1127_v27 = vor.u32 %v1126_v50, %v1125_v34  ;;  %v1131_v2 = vshll.u32 %v3924_v57, %v1116_v7 }
 0x123   :  { %v1130_v14 = vor.u32 %v1129_v49, %v1128_v4  ;;  %v1132_v33 = vshrl.u32 %v3917_v28, %v1117_v25  ;;  %v1262_v19 = vadd.s32 %v2864_v15, %v2869_v37  ;;  %v2943_v42 = vshll.u32 %v1110_v61, 8 }
 0x124   :  { %v1274_v46 = vclz %v2011_v58  ;;  %v2945_v55 = vmul.f32 %v1547_v40, %v1547_v40  ;;  %v3935_v10 = vand.u32 2147483647, %v2720_v9  ;;  %v1293_v6 = vsel %vm1208_vm13, %v1292_v52, %v1268_v21 }
 0x125   :  { %v1118_v7 = vshrl.u32 %v3903_v24, %v1117_v25  ;;  %v1133_v31 = vor.u32 %v1132_v33, %v1131_v2  ;;  %vm1134_vm1 = vcmp.lt.s32.totalorder %v1115_v1, 1  ;;  %vm792_vm2 = vcmp.lt.s32.totalorder %v2605_v11, 0 }
 0x126   :  { %vm2949_vm15 = vcmp.le.f32.partialorder %v3935_v10, 0.7853982  ;;  %v874_v15 = vxor.u32 2147483648, %v873_v35  ;;  %v2012_v37 = vadd.s32 4294967294, %v1274_v46  ;;  %vm1137_vm3 = vcmp.lt.s32.totalorder %v1115_v1, 4  ;;  %v2959_v50 = vpop.eup %2282 }
 0x127   :  { %v1142_v61 = vsel %vm1134_vm1, %v1121_v47, %v1124_v8  ;;  %vm1136_vm4 = vcmp.lt.s32.totalorder %v1115_v1, 3  ;;  %v1139_v43 = vsel %vm1137_vm3, %v1127_v27, 2102212464  ;;  %v1143_v45 = vsel %vm1137_vm3, %v1130_v14, 920167782  ;;  %3938 = vst [vmem:[#allocation31_spill] sm:$0xff] %v2959_v50 }
 0x128   :  { %v1146_v62 = vsel %vm1134_vm1, %v1124_v8, %v1127_v27  ;;  %vm2013_vm5 = vcmp.lt.s32.totalorder %v2012_v37, 0  ;;  %vm1135_vm6 = vcmp.lt.s32.totalorder %v1115_v1, 2  ;;  %v1144_v21 = vsel %vm1136_vm4, %v1127_v27, %v1143_v45  ;;  %v2962_v2 = vpop.eup %2284 }
 0x129   :  { %v1147_v33 = vsel %vm1137_vm3, %v1133_v31, 1326507024  ;;  %3939 = vst [vmem:[#allocation32_spill] sm:$0xff] %v2962_v2  ;;  %v1277_v25 = vsel %vm2013_vm5, 0, %v2012_v37  ;;  %v1138_v46 = vsel %vm1134_vm1, %v1118_v7, %v1121_v47  ;;  %v1145_v52 = vsel %vm1135_vm6, %v1142_v61, %v1144_v21 }
 0x12a   :  { %v1148_v34 = vsel %vm1136_vm4, %v1130_v14, %v1147_v33  ;;  %v3940_v4 = vand.u32 2147483647, %v2605_v11  ;;  %v1278_v58 = vsub.s32 32, %v1277_v25  ;;  %v1282_v10 = vsub.s32 4294967266, %v1277_v25 }
 0x12b   :  { %v1140_v27 = vsel %vm1136_vm4, %v1124_v8, %v1139_v43  ;;  %v1149_v31 = vsel %vm1135_vm6, %v1146_v62, %v1148_v34  ;;  %v2980_v47 = vmul.u32.u64.low %v2943_v42, %v1145_v52  ;;  %v2981_v7 = vmul.u32.u64.high %v2943_v42, %v1145_v52, %v2980_v47  ;;  %v2338_v43 = vld [vmem:[%s3815_s1] ss:$0 sm:$0xff] }
 0x12c   :  { %vm2969_vm7 = vcmp.le.f32.partialorder %v3940_v4, 0.7853982  ;;  %v2976_v37 = vmul.u32.u64.low %v2943_v42, %v1149_v31  ;;  %v2977_v45 = vmul.u32.u64.high %v2943_v42, %v1149_v31, %v2976_v37  ;;  %v1283_v14 = vadd.s32 127, %v1282_v10  ;;  %v2339_v34 = vld [vmem:[%s3814_s0] sm:$0xff]  ;;  %v2340_v10 = vld [vmem:[%s3814_s0 + $0x8] sm:$0xff] }
 0x12d   :  { %v1563_v61 = vmul.f32 %v2945_v55, %v2905_v16  ;;  %v1587_v21 = vmul.f32 %v2945_v55, %v1547_v40  ;;  %v1611_v33 = vmul.f32 %v1547_v40, %v2905_v16  ;;  %v1141_v8 = vsel %vm1135_vm6, %v1138_v46, %v1140_v27 }
 0x12e   :  { %v2993_v62 = vmul.f32 %v2338_v43, %v2919_v59  ;;  %v2996_v52 = vmul.f32 0.33333334, %v2919_v59  ;;  %v3002_v4 = vmul.f32 %v2339_v34, %v2436_v32  ;;  %v1280_v40 = vshrl.u32 %v1262_v19, %v1278_v58 }
 0x12f   :  { %v1284_v1 = vshll.u32 %v1283_v14, 23  ;;  %v1295_v46 = vsel %vm2949_vm15, 0, %v1293_v6  ;;  %v3010_v27 = vmul.f32 %v2340_v10, %v2504_v60  ;;  %v875_v59 = vsel %vm792_vm2, %v874_v15, %v873_v35 }
 0x130   :  { %3943 = vst [vmem:[#allocation33_spill] sm:$0xff] %v2996_v52  ;;  %vm1159_vm8 = vc.u32 %v2977_v45, %v2980_v47  ;;  %v1160_v31 = vadd.s32 1, %v2981_v7  ;;  %120 = vrot.lane.b32.xlu0 %v3002_v4, %s2353_s20  ;;  %v1279_v6 = vshll.u32 %v2923_v0, %v1277_v25  ;;  %v1157_v37 = vmul.u32 %v2943_v42, %v1141_v8 }
 0x131   :  { %v1285_v58 = vor.u32 4788187, %v1284_v1  ;;  %v1417_v14 = vand.u32 2139095040, %v2993_v62  ;;  %122 = vrot.lane.b32.xlu1 %v3010_v27, %s2353_s20  ;;  %v1299_v35 = vadd.s32 3, %v1295_v46  ;;  %v1571_v34 = vmul.f32 21.0, %v1563_v61 }
 0x132   :  { %v1161_v15 = vsel %vm1159_vm8, %v1160_v31, %v2981_v7  ;;  %v1550_v10 = vmul.f32 %v2996_v52, %v2996_v52  ;;  %v1281_v19 = vor.u32 %v1280_v40, %v1279_v6  ;;  %v3029_v16 = vmul.f32 15.0, %v2915_v5 }
 0x133   :  { %v1162_v0 = vadd.s32 %v1161_v15, %v1157_v37  ;;  %v1418_v25 = vshrl.u32 %v1417_v14, 23  ;;  %v878_v42 = vsel %vm2969_vm7, %v2605_v11, %v875_v59  ;;  %v1619_v8 = vmul.f32 %v1611_v33, %v2945_v55 }
 0x134   :  { %3944 = vst [vmem:[#allocation34_spill] sm:$0xff] %v3029_v16  ;;  %v3945_v1 = vand.u32 2147483647, %v2993_v62  ;;  %v86_v7 = vmul.f32 %v2636_v13, %v2542_v54  ;;  %184 = vrot.lane.b32.xlu0 %v3002_v4, %s2354_s21  ;;  %v1286_v5 = vand.u32 2147483647, %v1285_v58  ;;  %vm1104_vm10 = vcmp.lt.s32.totalorder %v2815_v51, 0 }
 0x135   :  { %v1163_v61 = vadd.s32 536870912, %v1162_v0  ;;  %v2018_v40 = vadd.s32 4294967169, %v1418_v25  ;;  %v1558_v31 = vmul.f32 %v1550_v10, %v1550_v10  ;;  %186 = vrot.lane.b32.xlu1 %v3010_v27, %s2354_s21  ;;  %v3044_v55 = vand.u32 3, %v1299_v35  ;;  %v2341_v54 = vld [vmem:[%s3814_s0 + $0x10] sm:$0xff] }
 0x136   :  { %v1421_v46 = vand.u32 8388607, %v3945_v1  ;;  %v1579_v33 = vsub.f32 1.0, %v1571_v34  ;;  %v1595_v59 = vmul.f32 35.0, %v1587_v21  ;;  %v3050_v6 = vmul.f32 %v2341_v54, %v2429_v30 }
 0x137   :  { %3946 = vst [vmem:[#allocation35_spill] sm:$0xff] %v3044_v55  ;;  %2286 = vcosq.f32 %v878_v42  ;;  %v1288_v58 = vcvt.s32.f32 %v1281_v19  ;;  %v1164_v37 = vshrl.u32 %v1163_v61, 30  ;;  %v1424_v14 = vadd.s32 1, %v2018_v40 }
 0x138   :  { %2288 = vsinq.f32 %v878_v42  ;;  %v1422_v15 = vor.u32 8388608, %v1421_v46  ;;  %v1614_v25 = vmul.f32 %v1550_v10, %v2996_v52  ;;  %v3053_v1 = vmul.f32 %v2338_v43, %v86_v7  ;;  %124 = vrot.lane.b32.xlu0 %v3050_v6, %s2353_s20 }
 0x139   :  { %v3057_v21 = vmul.f32 %v1288_v58, %v1286_v5  ;;  %v1165_v35 = vshll.u32 %v1164_v37, 30  ;;  %vm1425_vm11 = vcmp.gt.s32.totalorder %v1424_v14, 0  ;;  %v1566_v34 = vmul.f32 %v1558_v31, %v2996_v52 }
 0x13a   :  { %v1188_v54 = vsub.s32 4, %v1164_v37  ;;  %v3060_v16 = vadd.f32 %v1595_v59, %v1579_v33  ;;  %v3062_v19 = vmul.f32 15.0, %v1619_v8  ;;  %v1426_v42 = vsel %vm1425_vm11, %v1424_v14, 0 }
 0x13b   :  { %v1158_v46 = vadd.s32 %v2980_v47, %v2977_v45  ;;  %v3066_v43 = vsub.s32 %v1162_v0, %v1165_v35  ;;  %v3068_v61 = vshrl.u32 %v1426_v42, 5  ;;  %v3070_v40 = vmul.f32 0.33333334, %v86_v7 }
 0x13c   :  { %3947 = vst [vmem:[#allocation36_spill] sm:$0xff] %v3060_v16  ;;  %3948 = vst [vmem:[#allocation37_spill] sm:$0xff] %v3062_v19  ;;  %v1428_v5 = vand.u32 31, %v1426_v42  ;;  %v3072_v58 = vshll.u32 %v1422_v15, 8  ;;  %v3074_v55 = vmul.f32 %v1558_v31, %v1550_v10  ;;  %v3076_v52 = vmul.f32 %v1614_v25, %v1558_v31  ;;  %188 = vrot.lane.b32.xlu0 %v3050_v6, %s2354_s21 }
 0x13d   :  { %v1290_v8 = vxor.u32 2147483648, %v3057_v21  ;;  %v1168_v45 = vsub.s32 0, %v3066_v43  ;;  %v3082_v47 = vmul.f32 21.0, %v1566_v34  ;;  %v3087_v7 = vsel %vm1104_vm10, %v1188_v54, %v1164_v37 }
 0x13e   :  { %v1429_v33 = vsub.s32 32, %v1428_v5  ;;  %vm1446_vm12 = vcmp.lt.s32.totalorder %v3068_v61, 1  ;;  %vm1447_vm1 = vcmp.lt.s32.totalorder %v3068_v61, 2  ;;  %v1431_v31 = vshll.u32 %v3903_v24, %v1428_v5 }
 0x13f   :  { %v2007_v10 = vmin.u32 %v1168_v45, %v3066_v43  ;;  %v1434_v59 = vshll.u32 %v3914_v38, %v1428_v5  ;;  %v1437_v14 = vshll.u32 %v3915_v12, %v1428_v5  ;;  %v1440_v35 = vshll.u32 %v3916_v18, %v1428_v5 }
 0x140   :  { %v1432_v15 = vshrl.u32 %v3914_v38, %v1429_v33  ;;  %v1435_v25 = vshrl.u32 %v3915_v12, %v1429_v33  ;;  %v1438_v37 = vshrl.u32 %v3916_v18, %v1429_v33  ;;  %v3949_v34 = vand.u32 2147483647, %v2815_v51 }
 0x141   :  { %v1170_v42 = vclz %v2007_v10  ;;  %v1441_v45 = vshrl.u32 %v3924_v57, %v1429_v33  ;;  %v1443_v0 = vshll.u32 %v3924_v57, %v1428_v5  ;;  %v1444_v16 = vshrl.u32 %v3917_v28, %v1429_v33 }
 0x142   :  { %vm3101_vm3 = vcmp.le.f32.partialorder %v3949_v34, 0.7853982  ;;  %v1430_v19 = vshrl.u32 %v3903_v24, %v1429_v33  ;;  %v1433_v30 = vor.u32 %v1432_v15, %v1431_v31  ;;  %v1436_v50 = vor.u32 %v1435_v25, %v1434_v59 }
 0x143   :  { %v1439_v2 = vor.u32 %v1438_v37, %v1437_v14  ;;  %v2008_v60 = vadd.s32 4294967294, %v1170_v42  ;;  %v1442_v3 = vor.u32 %v1441_v45, %v1440_v35  ;;  %v1445_v32 = vor.u32 %v1444_v16, %v1443_v0 }
 0x144   :  { %vm1449_vm4 = vcmp.lt.s32.totalorder %v3068_v61, 4  ;;  %v3110_v34 = vpop.eup %2286  ;;  %vm1448_vm5 = vcmp.lt.s32.totalorder %v3068_v61, 3  ;;  %v1454_v5 = vsel %vm1446_vm12, %v1433_v30, %v1436_v50  ;;  %v1313_v41 = vand.u32 2139095040, %v3053_v1 }
 0x145   :  { %3952 = vst [vmem:[#allocation38_spill] sm:$0xff] %v3110_v34  ;;  %v1451_v10 = vsel %vm1449_vm4, %v1439_v2, 2102212464  ;;  %v3116_v39 = vpop.eup %2288  ;;  %vm2009_vm6 = vcmp.lt.s32.totalorder %v2008_v60, 0  ;;  %v1455_v33 = vsel %vm1449_vm4, %v1442_v3, 920167782  ;;  %v1458_v31 = vsel %vm1446_vm12, %v1436_v50, %v1439_v2 }
 0x146   :  { %v1459_v16 = vsel %vm1449_vm4, %v1445_v32, 1326507024  ;;  %v1173_v0 = vsel %vm2009_vm6, 0, %v2008_v60  ;;  %v1450_v59 = vsel %vm1446_vm12, %v1430_v19, %v1433_v30  ;;  %v1456_v14 = vsel %vm1448_vm5, %v1439_v2, %v1455_v33 }
 0x147   :  { %v1460_v15 = vsel %vm1448_vm5, %v1442_v3, %v1459_v16  ;;  %v1174_v25 = vsub.s32 32, %v1173_v0  ;;  %v1178_v37 = vsub.s32 4294967266, %v1173_v0  ;;  %v1452_v35 = vsel %vm1448_vm5, %v1436_v50, %v1451_v10 }
 0x148   :  { %v1457_v42 = vsel %vm1447_vm1, %v1454_v5, %v1456_v14  ;;  %v1175_v45 = vshll.u32 %v3066_v43, %v1173_v0  ;;  %v1461_v48 = vsel %vm1447_vm1, %v1458_v31, %v1460_v15  ;;  %v1291_v50 = vsel %vm1208_vm13, %v1290_v8, %v3057_v21  ;;  %v2343_v21 = vld [vmem:[%s3814_s0 + $0x20] sm:$0xff] }
 0x149   :  { %v3128_v23 = vmul.u32.u64.low %v3072_v58, %v1457_v42  ;;  %v3129_v32 = vmul.u32.u64.high %v3072_v58, %v1457_v42, %v3128_v23  ;;  %v1176_v60 = vshrl.u32 %v1158_v46, %v1174_v25  ;;  %v1179_v34 = vadd.s32 127, %v1178_v37  ;;  %v2342_v46 = vld [vmem:[%s3814_s0 + $0x18] sm:$0xff] }
 0x14a   :  { %v3132_v30 = vmul.u32.u64.low %v3072_v58, %v1461_v48  ;;  %v3133_v3 = vmul.u32.u64.high %v3072_v58, %v1461_v48, %v3132_v30  ;;  %v1191_v2 = vsel %vm3101_vm3, 0, %v3087_v7  ;;  %v1453_v19 = vsel %vm1447_vm1, %v1450_v59, %v1452_v35 }
 0x14b   :  { %v1314_v43 = vshrl.u32 %v1313_v41, 23  ;;  %v1177_v10 = vor.u32 %v1176_v60, %v1175_v45  ;;  %v1180_v5 = vshll.u32 %v1179_v34, 23  ;;  %v3147_v48 = vmul.f32 %v2342_v46, %v2466_v56 }
 0x14c   :  { %v3153_v8 = vmul.f32 %v2343_v21, %v2623_v22  ;;  %v1472_v61 = vadd.s32 1, %v3129_v32  ;;  %v3954_v41 = vand.u32 2147483647, %v3053_v1  ;;  %v1549_v33 = vmul.f32 %v3070_v40, %v3070_v40 }
 0x14d   :  { %v2014_v7 = vadd.s32 4294967169, %v1314_v43  ;;  %v1181_v31 = vor.u32 4788187, %v1180_v5  ;;  %v1469_v16 = vmul.u32 %v3072_v58, %v1453_v19  ;;  %vm1471_vm13 = vc.u32 %v3133_v3, %v3128_v23  ;;  %126 = vrot.lane.b32.xlu1 %v3147_v48, %s2353_s20 }
 0x14e   :  { %3953 = vst [vmem:[#allocation39_spill] sm:$0xff] %v3153_v8  ;;  %v1317_v34 = vand.u32 8388607, %v3954_v41  ;;  %v1598_v0 = vmul.f32 35.0, %v3074_v55  ;;  %128 = vrot.lane.b32.xlu0 %v3153_v8, %s2353_s20  ;;  %v1294_v59 = vsel %vm2949_vm15, %v2720_v9, %v1291_v50  ;;  %v1473_v14 = vsel %vm1471_vm13, %v1472_v61, %v3129_v32 }
 0x14f   :  { %v1582_v15 = vsub.f32 1.0, %v3082_v47  ;;  %v1320_v25 = vadd.s32 1, %v2014_v7  ;;  %v1182_v58 = vand.u32 2147483647, %v1181_v31  ;;  %v1184_v37 = vcvt.s32.f32 %v1177_v10 }
 0x150   :  { %v1195_v35 = vadd.s32 3, %v1191_v2  ;;  %v1474_v42 = vadd.s32 %v1473_v14, %v1469_v16  ;;  %v1318_v55 = vor.u32 8388608, %v1317_v34  ;;  %v3172_v45 = vmul.f32 %v1549_v33, %v1549_v33 }
 0x151   :  { %vm1321_vm8 = vcmp.gt.s32.totalorder %v1320_v25, 0  ;;  %v3176_v60 = vmul.f32 %v3050_v6, %v3050_v6  ;;  %2290 = vcosq.f32 %v1294_v59  ;;  %v1185_v63 = vmul.f32 %v1184_v37, %v1182_v58  ;;  %190 = vrot.lane.b32.xlu1 %v3147_v48, %s2354_s21 }
 0x152   :  { %v1475_v30 = vadd.s32 536870912, %v1474_v42  ;;  %v1322_v50 = vsel %vm1321_vm8, %v1320_v25, 0  ;;  %2292 = vsinq.f32 %v1294_v59  ;;  %v3180_v47 = vadd.f32 %v1598_v0, %v1582_v15 }
 0x153   :  { %3955 = vst [vmem:[#allocation40_spill] sm:$0xff] %v3176_v60  ;;  %v3183_v32 = vmul.f32 15.0, %v3076_v52  ;;  %v1324_v2 = vand.u32 31, %v1322_v50  ;;  %236 = vrot.lane.b32.xlu0 %v3176_v60, %s2353_s20  ;;  %v3187_v19 = vand.u32 3, %v1195_v35  ;;  %v3190_v43 = vadd.s32 %v3128_v23, %v3133_v3 }
 0x154   :  { %v3192_v10 = vshrl.u32 %v1475_v30, 30  ;;  %v3196_v5 = vmul.f32 %v3002_v4, %v3002_v4  ;;  %v3198_v21 = vshll.u32 %v1318_v55, 8  ;;  %v1565_v52 = vmul.f32 %v3172_v45, %v3070_v40 }
 0x155   :  { %v1325_v46 = vsub.s32 32, %v1324_v2  ;;  %v3203_v61 = vmul.f32 %v3172_v45, %v1549_v33  ;;  %v1186_v7 = vxor.u32 2147483648, %v1185_v63  ;;  %v1323_v23 = vshrl.u32 %v1322_v50, 5 }
 0x156   :  { %v1477_v41 = vshll.u32 %v3192_v10, 30  ;;  %v3207_v3 = vmul.f32 %v1549_v33, %v3070_v40  ;;  %232 = vrot.lane.b32.xlu1 %v3196_v5, %s2353_s20  ;;  %v1327_v34 = vshll.u32 %v3903_v24, %v1324_v2  ;;  %v1330_v16 = vshll.u32 %v3914_v38, %v1324_v2 }
 0x157   :  { %v1328_v31 = vshrl.u32 %v3914_v38, %v1325_v46  ;;  %v1331_v0 = vshrl.u32 %v3915_v12, %v1325_v46  ;;  %192 = vrot.lane.b32.xlu0 %v3153_v8, %s2354_s21  ;;  %v1333_v14 = vshll.u32 %v3915_v12, %v1324_v2  ;;  %v1334_v33 = vshrl.u32 %v3916_v18, %v1325_v46  ;;  %v2344_v38 = vld [vmem:[%s3814_s0 + $0x28] sm:$0xff] }
 0x158   :  { %v3217_v59 = vsub.s32 %v1474_v42, %v1477_v41  ;;  %v3223_v15 = vmul.f32 %v3010_v27, %v3010_v27  ;;  %v3225_v37 = vmul.f32 21.0, %v1565_v52  ;;  %v3231_v35 = vmul.f32 %v2344_v38, %v2615_v17 }
 0x159   :  { %v1329_v25 = vor.u32 %v1328_v31, %v1327_v34  ;;  %v1332_v58 = vor.u32 %v1331_v0, %v1330_v16  ;;  %v1335_v12 = vor.u32 %v1334_v33, %v1333_v14  ;;  %v1336_v55 = vshll.u32 %v3916_v18, %v1324_v2 }
 0x15a   :  { %3956 = vst [vmem:[#allocation41_spill] sm:$0xff] %v3223_v15  ;;  %3957 = vst [vmem:[#allocation42_spill] sm:$0xff] %v3231_v35  ;;  %v1480_v42 = vsub.s32 0, %v3217_v59  ;;  %v1337_v30 = vshrl.u32 %v3924_v57, %v1325_v46  ;;  %234 = vrot.lane.b32.xlu1 %v3223_v15, %s2353_s20  ;;  %v1187_v50 = vsel %vm1104_vm10, %v1186_v7, %v1185_v63  ;;  %vm1416_vm15 = vcmp.lt.s32.totalorder %v2993_v62, 0 }
 0x15b   :  { %v1326_v52 = vshrl.u32 %v3903_v24, %v1325_v46  ;;  %v1339_v41 = vshll.u32 %v3924_v57, %v1324_v2  ;;  %v1340_v34 = vshrl.u32 %v3917_v28, %v1325_v46  ;;  %vm1342_vm11 = vcmp.lt.s32.totalorder %v1323_v23, 1 }
 0x15c   :  { %v2019_v31 = vmin.u32 %v1480_v42, %v3217_v59  ;;  %v1338_v16 = vor.u32 %v1337_v30, %v1336_v55  ;;  %vm1343_vm12 = vcmp.lt.s32.totalorder %v1323_v23, 2  ;;  %vm1344_vm1 = vcmp.lt.s32.totalorder %v1323_v23, 3 }
 0x15d   :  { %v1341_v18 = vor.u32 %v1340_v34, %v1339_v41  ;;  %vm1345_vm4 = vcmp.lt.s32.totalorder %v1323_v23, 4  ;;  %v1350_v0 = vsel %vm1342_vm11, %v1329_v25, %v1332_v58  ;;  %v3958_v14 = vand.u32 2147483647, %v2993_v62 }
 0x15e   :  { %v1482_v24 = vclz %v2019_v31  ;;  %v1347_v7 = vsel %vm1345_vm4, %v1335_v12, 2102212464  ;;  %v1351_v57 = vsel %vm1345_vm4, %v1338_v16, 920167782  ;;  %v1354_v2 = vsel %vm1342_vm11, %v1332_v58, %v1335_v12  ;;  %130 = vrot.lane.b32.xlu1 %v3231_v35, %s2353_s20  ;;  %v3253_v28 = vpop.eup %2290 }
 0x15f   :  { %vm3247_vm10 = vcmp.le.f32.partialorder %v3958_v14, 0.7853982  ;;  %v1346_v46 = vsel %vm1342_vm11, %v1326_v52, %v1329_v25  ;;  %v1348_v33 = vsel %vm1344_vm1, %v1332_v58, %v1347_v7  ;;  %v1352_v38 = vsel %vm1344_vm1, %v1335_v12, %v1351_v57  ;;  %v3257_v55 = vpop.eup %2292 }
 0x160   :  { %v1355_v42 = vsel %vm1345_vm4, %v1341_v18, 1326507024  ;;  %v2020_v30 = vadd.s32 4294967294, %v1482_v24  ;;  %v1500_v41 = vsub.s32 4, %v3192_v10  ;;  %v1353_v34 = vsel %vm1343_vm12, %v1350_v0, %v1352_v38 }
 0x161   :  { %v1356_v31 = vsel %vm1344_vm1, %v1338_v16, %v1355_v42  ;;  %v1190_v14 = vsel %vm3101_vm3, %v2815_v51, %v1187_v50  ;;  %v3267_v58 = vmul.u32.u64.low %v3198_v21, %v1353_v34  ;;  %v3268_v52 = vmul.u32.u64.high %v3198_v21, %v1353_v34, %v3267_v58 }
 0x162   :  { %v1357_v25 = vsel %vm1343_vm12, %v1354_v2, %v1356_v31  ;;  %vm2021_vm5 = vcmp.lt.s32.totalorder %v2020_v30, 0  ;;  %v1349_v12 = vsel %vm1343_vm12, %v1346_v46, %v1348_v33  ;;  %v3278_v54 = vmul.f32 %v3153_v8, %v3153_v8  ;;  %v2345_v33 = vld [vmem:[%s3814_s0 + $0x30] sm:$0xff]  ;;  %v3973_v8 = vld [vmem:[#allocation10_spill] sm:$0xff] }
 0x163   :  { %v3272_v18 = vmul.u32.u64.low %v3198_v21, %v1357_v25  ;;  %v3273_v24 = vmul.u32.u64.high %v3198_v21, %v1357_v25, %v3272_v18  ;;  %v1485_v0 = vsel %vm2021_vm5, 0, %v2020_v30  ;;  %v3282_v50 = vmul.f32 %v3147_v48, %v3147_v48 }
 0x164   :  { %3961 = vst [vmem:[#allocation43_spill] sm:$0xff] %v3278_v54  ;;  %2294 = vcosq.f32 %v1190_v14  ;;  %v1486_v7 = vsub.s32 32, %v1485_v0  ;;  %v1490_v57 = vsub.s32 4294967266, %v1485_v0  ;;  %v3287_v23 = vsel %vm1416_vm15, %v1500_v41, %v3192_v10  ;;  %240 = vrot.lane.b32.xlu0 %v3278_v54, %s2353_s20 }
 0x165   :  { %3962 = vst [vmem:[#allocation44_spill] sm:$0xff] %v3282_v50  ;;  %2296 = vsinq.f32 %v1190_v14  ;;  %v1365_v2 = vmul.u32 %v3198_v21, %v1349_v12  ;;  %v1368_v46 = vadd.s32 1, %v3268_v52  ;;  %238 = vrot.lane.b32.xlu1 %v3282_v50, %s2353_s20  ;;  %v3299_v38 = vmul.f32 %v2345_v33, %v2636_v13  ;;  %v2346_v12 = vld [vmem:[%s3814_s0 + $0x38] sm:$0xff]  ;;  %s2355_s0 = smov 3  }
 0x166   :  { %v1487_v10 = vshll.u32 %v3217_v59, %v1485_v0  ;;  %v1488_v42 = vshrl.u32 %v3190_v43, %v1486_v7  ;;  %v1491_v21 = vadd.s32 127, %v1490_v57  ;;  %vm1367_vm3 = vc.u32 %v3273_v24, %v3267_v58  ;;  %v1683_v57 = vld [vmem:[%s3816_s2] sm:$0xf]  ;;  %s2356_s2 = smov 4  }
 0x167   :  { %3963 = vst [vmem:[#allocation45_spill] sm:$0xff] %v3299_v38  ;;  %v1369_v41 = vsel %vm1367_vm3, %v1368_v46, %v3268_v52  ;;  %v3310_v34 = vmul.f32 %v3231_v35, %v3231_v35  ;;  %v152_v31 = vmul.f32 3.0, %v3002_v4  ;;  %v153_v43 = vmul.f32 3.0, %v3010_v27 }
 0x168   :  { %v1489_v14 = vor.u32 %v1488_v42, %v1487_v10  ;;  %v1492_v25 = vshll.u32 %v1491_v21, 23  ;;  %v1370_v59 = vadd.s32 %v1369_v41, %v1365_v2  ;;  %vm1312_vm6 = vcmp.lt.s32.totalorder %v3053_v1, 0  ;;  %132 = vrot.lane.b32.xlu0 %v3299_v38, %s2353_s20 }
 0x169   :  { %3964 = vst [vmem:[#allocation46_spill] sm:$0xff] %v3310_v34  ;;  %194 = vrot.lane.b32.xlu1 %v3231_v35, %s2354_s21  ;;  %v3321_v52 = vmul.f32 %v3299_v38, %v3299_v38  ;;  %v3327_v18 = vmul.f32 %v2346_v12, %v2631_v26  ;;  %v3330_v0 = vmul.f32 1.7320508, %v3002_v4  ;;  %v160_v7 = vmul.f32 %v152_v31, %v3002_v4 }
 0x16a   :  { %v1493_v2 = vor.u32 4788187, %v1492_v25  ;;  %v1371_v46 = vadd.s32 536870912, %v1370_v59  ;;  %v3337_v33 = vmul.f32 1.7320508, %v3010_v27  ;;  %v161_v10 = vmul.f32 %v153_v43, %v3010_v27 }
 0x16b   :  { %3965 = vst [vmem:[#allocation47_spill] sm:$0xff] %v3321_v52  ;;  %3966 = vst [vmem:[#allocation48_spill] sm:$0xff] %v3330_v0  ;;  %v1496_v42 = vcvt.s32.f32 %v1489_v14  ;;  %v1967_v21 = vadd.f32 -1.0, %v160_v7  ;;  %v3341_v41 = vmul.f32 1.7320508, %v3147_v48  ;;  %vm530_vm13 = vcmask 1043456  }
 0x16c   :  { %3967 = vst [vmem:[#allocation49_spill] sm:$0xff] %v3337_v33  ;;  %v1494_v12 = vand.u32 2147483647, %v1493_v2  ;;  %v1372_v16 = vshrl.u32 %v1371_v46, 30  ;;  %v1968_v31 = vadd.f32 -1.0, %v161_v10  ;;  %2105 = vmatprep.subr.msk.bf16.mxu1 %vm530_vm13, %v1683_v57  ;;  %v1697_v30 = vsel %vm530_vm13, %v1683_v57, 0  ;;  %244 = vrot.lane.b32.xlu0 %v3321_v52, %s2353_s20 }
 0x16d   :  { %v3346_v25 = vadd.s32 %v3267_v58, %v3273_v24  ;;  %242 = vrot.lane.b32.xlu1 %v3310_v34, %s2353_s20  ;;  %v3354_v14 = vmul.f32 %v3327_v18, %v3327_v18  ;;  %v3357_v43 = vmul.f32 1.7320508, %v3050_v6  ;;  %v772_v7 = vsub.s32 4, %v2590_v44  ;;  %2084 = vmatpush3.bf16.msra.mxu1 %v1697_v30 }
 0x16e   :  { %v1497_v2 = vmul.f32 %v1496_v42, %v1494_v12  ;;  %v1373_v57 = vshll.u32 %v1372_v16, 30  ;;  %v1396_v46 = vsub.s32 4, %v1372_v16  ;;  %v2153_v58 = vpack.i.bf16 %v3337_v33, %v3330_v0 }
 0x16f   :  { %3968 = vst [vmem:[#allocation50_spill] sm:$0xff] %v3354_v14  ;;  %v177_v24 = vmul.f32 1.118034, %v1968_v31  ;;  %v773_v52 = vsel %vm688_vm9, %v772_v7, %v2590_v44  ;;  %v876_v34 = vsub.s32 4, %v2831_v53  ;;  %v176_v42 = vmul.f32 1.118034, %v1967_v21 }
 0x170   :  { %v1498_v54 = vxor.u32 2147483648, %v1497_v2  ;;  %v3368_v50 = vsub.s32 %v1370_v59, %v1373_v57  ;;  %vm778_vm8 = vweird.f32 %v2447_v36  ;;  %196 = vrot.lane.b32.xlu0 %v3299_v38, %s2354_s21  ;;  %v775_v31 = vsel %vm2771_vm14, 0, %v773_v52  ;;  %v3970_v38 = vld [vmem:[#allocation38_spill] sm:$0xff] }
 0x171   :  { %v3371_v12 = vpop.eup %2294  ;;  %134 = vrot.lane.b32.xlu1 %v3327_v18, %s2353_s20  ;;  %v783_v44 = vxor.u32 2147483648, %v2927_v29  ;;  %v786_v7 = vxor.u32 2147483648, %v2921_v20  ;;  %v877_v59 = vsel %vm792_vm2, %v876_v34, %v2831_v53  ;;  %v3391_v33 = vsel %vm1312_vm6, %v1396_v46, %v1372_v16  ;;  %v3971_v46 = vld [vmem:[#allocation16_spill] sm:$0xff] }
 0x172   :  { %v3384_v21 = vpop.eup %2296  ;;  %v1499_v57 = vsel %vm1416_vm15, %v1498_v54, %v1497_v2  ;;  %v1376_v10 = vsub.s32 0, %v3368_v50  ;;  %v779_v52 = vadd.s32 3, %v775_v31  ;;  %v2163_v0 = vpack.i.bf16 %v177_v24, %v176_v42  ;;  %v3972_v24 = vld [vmem:[#allocation26_spill] sm:$0xff] }
 0x173   :  { %v1502_v30 = vsel %vm3247_vm10, %v2993_v62, %v1499_v57  ;;  %v879_v53 = vsel %vm2969_vm7, 0, %v877_v59  ;;  %vm882_vm9 = vweird.f32 %v2605_v11  ;;  %v887_v2 = vxor.u32 2147483648, %v3116_v39 }
 0x174   :  { %v2015_v34 = vmin.u32 %v1376_v10, %v3368_v50  ;;  %v780_v54 = vand.u32 3, %v779_v52  ;;  %v890_v60 = vxor.u32 2147483648, %v3970_v38  ;;  %2298 = vcosq.f32 %v1502_v30  ;;  %2154 = vrot.lane.b32.xlu0 %v2153_v58, %s2355_s0 }
 0x175   :  { %246 = vrot.lane.b32.xlu1 %v3354_v14, %s2353_s20  ;;  %v883_v16 = vadd.s32 3, %v879_v53  ;;  %v1567_v49 = vmul.f32 21.0, %v3971_v46  ;;  %v1568_v42 = vmul.f32 21.0, %v3972_v24  ;;  %v3974_v14 = vld [vmem:[#allocation12_spill] sm:$0xff]  ;;  %2300 = vsinq.f32 %v1502_v30  ;;  %v3978_v30 = vld [vmem:[#allocation13_spill] sm:$0xff] }
 0x176   :  { %v1378_v31 = vclz %v2015_v34  ;;  %vm781_vm14 = vcmp.lt.s32.totalorder %v780_v54, 2  ;;  %vm782_vm2 = vcmp.eq.s32.totalorder %v780_v54, 0  ;;  %vm785_vm7 = vcmp.eq.s32.totalorder %v780_v54, 2  ;;  %v3975_v54 = vld [vmem:[#allocation20_spill] sm:$0xff] }
 0x177   :  { %v784_v10 = vsel %vm782_vm2, %v2921_v20, %v783_v44  ;;  %v787_v59 = vsel %vm785_vm7, %v786_v7, %v2927_v29  ;;  %v884_v57 = vand.u32 3, %v883_v16  ;;  %v1575_v52 = vsub.f32 1.0, %v1567_v49  ;;  %v3976_v16 = vld [vmem:[#allocation23_spill] sm:$0xff] }
 0x178   :  { %v2016_v15 = vadd.s32 4294967294, %v1378_v31  ;;  %v788_v58 = vsel %vm781_vm14, %v784_v10, %v787_v59  ;;  %v1576_v35 = vsub.f32 1.0, %v1568_v42  ;;  %v1583_v53 = vmul.f32 %v3974_v14, %v3973_v8  ;;  %2164 = vrot.lane.b32.xlu0 %v2163_v0, %s2356_s2  ;;  %v3979_v59 = vld [vmem:[#allocation27_spill] sm:$0xff] }
 0x179   :  { %198 = vrot.lane.b32.xlu1 %v3327_v18, %s2354_s21  ;;  %v789_v34 = vsel %vm778_vm8, nan, %v788_v58  ;;  %vm885_vm15 = vcmp.lt.s32.totalorder %v884_v57, 2  ;;  %vm886_vm11 = vcmp.eq.s32.totalorder %v884_v57, 0  ;;  %vm889_vm12 = vcmp.eq.s32.totalorder %v884_v57, 2  ;;  %v3980_v57 = vld [vmem:[#allocation3_spill] sm:$0xff] }
 0x17a   :  { %vm2017_vm1 = vcmp.lt.s32.totalorder %v2016_v15, 0  ;;  %v888_v20 = vsel %vm886_vm11, %v3970_v38, %v887_v2  ;;  %v891_v29 = vsel %vm889_vm12, %v890_v60, %v3116_v39  ;;  %v1518_v44 = vmul.f32 0.8164966, %v789_v34  ;;  %v3982_v34 = vld [vmem:[#allocation14_spill] sm:$0xff] }
 0x17b   :  { %v1381_v7 = vsel %vm2017_vm1, 0, %v2016_v15  ;;  %v892_v8 = vsel %vm885_vm15, %v888_v20, %v891_v29  ;;  %v1584_v0 = vmul.f32 %v3976_v16, %v3975_v54  ;;  %v1591_v46 = vmul.f32 35.0, %v1583_v53  ;;  %v3981_v53 = vld [vmem:[#allocation9_spill] sm:$0xff] }
 0x17c   :  { %v1382_v49 = vsub.s32 32, %v1381_v7  ;;  %v1386_v24 = vsub.s32 4294967266, %v1381_v7  ;;  %v893_v36 = vsel %vm882_vm9, nan, %v892_v8  ;;  %v1383_v42 = vshll.u32 %v3368_v50, %v1381_v7  ;;  %v3983_v20 = vld [vmem:[#allocation5_spill] sm:$0xff]  ;;  %v3984_v8 = vld [vmem:[#allocation8_spill] sm:$0xff] }
 0x17d   :  { %v3977_v38 = vpack.i.bf16 %v3341_v41, %v3357_v43  ;;  %v1519_v39 = vmul.f32 0.8164966, %v893_v36  ;;  %v1592_v60 = vmul.f32 35.0, %v1584_v0  ;;  %v1599_v15 = vadd.f32 %v1591_v46, %v1575_v52  ;;  %v3990_v0 = vld [vmem:[#allocation17_spill] sm:$0xff] }
 0x17e   :  { %v1384_v2 = vshrl.u32 %v3346_v25, %v1382_v49  ;;  %v1387_v31 = vadd.s32 127, %v1386_v24  ;;  %v1615_v10 = vmul.f32 %v3978_v30, %v3974_v14  ;;  %v1616_v11 = vmul.f32 %v3979_v59, %v3976_v16  ;;  %v3989_v16 = vld [vmem:[#allocation4_spill] sm:$0xff] }
 0x17f   :  { %2159 = vrot.lane.b32.xlu1 %v3977_v38, %s2355_s0  ;;  %vm494_vm4 = vcmask 64512   ;;  %v1526_v50 = vmul.f32 %v3980_v57, %v1518_v44  ;;  %v1600_v58 = vadd.f32 %v1592_v60, %v1576_v35  ;;  %vm1639_vm5 = vcmp.lt.f32.partialorder %v3981_v53, 1.0  ;;  %v3988_v44 = vld [vmem:[#allocation6_spill] sm:$0xff] }
 0x180   :  { %vm1640_vm3 = vcmp.lt.f32.partialorder %v3982_v34, 1.0  ;;  %vm1641_vm8 = vcmp.lt.f32.partialorder %v3983_v20, 1.0  ;;  %v1385_v52 = vor.u32 %v1384_v2, %v1383_v42  ;;  %v1388_v29 = vshll.u32 %v1387_v31, 23  ;;  %v3991_v2 = vld [vmem:[#allocation25_spill] sm:$0xff] }
 0x181   :  { %v1623_v25 = vmul.f32 15.0, %v1615_v10  ;;  %v1624_v7 = vmul.f32 15.0, %v1616_v11  ;;  %vm1642_vm9 = vcmp.lt.f32.partialorder %v3984_v8, 1.0  ;;  %v3985_v14 = vand.u32 2147483647, %v3053_v1  ;;  %v3446_v46 = vpop.eup %2298  ;;  %v3992_v11 = vld [vmem:[#allocation24_spill] sm:$0xff] }
 0x182   :  { %v1527_v35 = vmul.f32 %v3988_v44, %v1519_v39  ;;  %vm986_vm2 = vweird.f32 %v3989_v16  ;;  %vm989_vm7 = vcmp.lt.s32.totalorder %v3990_v0, 2  ;;  %v1389_v49 = vor.u32 4788187, %v1388_v29  ;;  %v3995_v44 = vld [vmem:[#allocation31_spill] sm:$0xff] }
 0x183   :  { %vm3439_vm14 = vcmp.le.f32.partialorder %v3985_v14, 0.7853982  ;;  %v1631_v24 = vsub.f32 %v1599_v15, %v1623_v25  ;;  %v1632_v36 = vsub.f32 %v1600_v58, %v1624_v7  ;;  %vm990_vm15 = vcmp.eq.s32.totalorder %v3990_v0, 0  ;;  %v3993_v58 = vld [vmem:[#allocation29_spill] sm:$0xff]  ;;  %v3994_v7 = vld [vmem:[#allocation32_spill] sm:$0xff] }
 0x184   :  { %v1392_v42 = vcvt.s32.f32 %v1385_v52  ;;  %v2357_v38 = vmov 0.0   ;;  %v991_v31 = vxor.u32 2147483648, %v3991_v2  ;;  %v1390_v30 = vand.u32 2147483647, %v1389_v49 }
 0x185   :  { %v2022_v60 = vsel %vm1639_vm5, 1.0, %v2357_v38  ;;  %v2023_v39 = vsel %vm1640_vm3, 1.0, %v2357_v38  ;;  %v994_v15 = vxor.u32 2147483648, %v3992_v11  ;;  %vm993_vm11 = vcmp.eq.s32.totalorder %v3990_v0, 2 }
 0x186   :  { %v1663_v10 = vmul.f32 %v2022_v60, %v1631_v24  ;;  %v1664_v59 = vmul.f32 %v2023_v39, %v1632_v36  ;;  %v992_v57 = vsel %vm990_vm15, %v3992_v11, %v991_v31  ;;  %vm1093_vm12 = vcmp.lt.s32.totalorder %v3993_v58, 2  ;;  %v3996_v39 = vld [vmem:[#allocation11_spill] sm:$0xff]  ;;  %v4000_v11 = vld [vmem:[#allocation28_spill] sm:$0xff] }
 0x187   :  { %vm1094_vm1 = vcmp.eq.s32.totalorder %v3993_v58, 0  ;;  %v1393_v53 = vmul.f32 %v1392_v42, %v1390_v30  ;;  %v995_v34 = vsel %vm993_vm11, %v994_v15, %v3991_v2  ;;  %v1095_v14 = vxor.u32 2147483648, %v3994_v7  ;;  %v3997_v42 = vld [vmem:[#allocation15_spill] sm:$0xff] }
 0x188   :  { %v1671_v52 = vmul.f32 %v1663_v10, %v1526_v50  ;;  %v1672_v29 = vmul.f32 %v1664_v59, %v1527_v35  ;;  %v996_v25 = vsel %vm989_vm7, %v992_v57, %v995_v34  ;;  %vm1097_vm5 = vcmp.eq.s32.totalorder %v3993_v58, 2  ;;  %v3471_v35 = vpop.eup %2300  ;;  %v3998_v30 = vld [vmem:[#allocation19_spill] sm:$0xff]  ;;  %v3999_v10 = vld [vmem:[#allocation18_spill] sm:$0xff] }
 0x189   :  { %v1098_v49 = vxor.u32 2147483648, %v3995_v44  ;;  %v1394_v24 = vxor.u32 2147483648, %v1393_v53  ;;  %v997_v60 = vsel %vm986_vm2, nan, %v996_v25  ;;  %v1633_v50 = vsub.f32 %v3997_v42, %v3996_v39  ;;  %v4001_v57 = vld [vmem:[#allocation7_spill] sm:$0xff] }
 0x18a   :  { %v1679_v36 = vpack.c.bf16 %v1672_v29, %v1671_v52  ;;  %v1096_v2 = vsel %vm1094_vm1, %v3995_v44, %v1095_v14  ;;  %v1520_v31 = vmul.f32 0.8164966, %v997_v60  ;;  %v1634_v59 = vsub.f32 %v3999_v10, %v3998_v30  ;;  %v4002_v29 = vld [vmem:[#allocation21_spill] sm:$0xff] }
 0x18b   :  { %v1099_v0 = vsel %vm1097_vm5, %v1098_v49, %v3994_v7  ;;  %vm1643_vm3 = vcmp.lt.f32.partialorder %v4000_v11, 1.0  ;;  %v1395_v15 = vsel %vm1312_vm6, %v1394_v24, %v1393_v53  ;;  %v1399_v16 = vsel %vm3439_vm14, 0, %v3391_v33  ;;  %v4003_v7 = vld [vmem:[#allocation2_spill] sm:$0xff] }
 0x18c   :  { %2085 = vmatprep.mubr.msk.bf16.mxu1 %vm494_vm4, %v1679_v36  ;;  %vm1090_vm2 = vweird.f32 %v4001_v57  ;;  %v1100_v52 = vsel %vm1093_vm12, %v1096_v2, %v1099_v0  ;;  %vm1644_vm7 = vcmp.lt.f32.partialorder %v4002_v29, 1.0  ;;  %v1398_v34 = vsel %vm3439_vm14, %v3053_v1, %v1395_v15  ;;  %v4005_v2 = vld [vmem:[#allocation35_spill] sm:$0xff]  ;;  %v4009_v57 = vld [vmem:[#allocation30_spill] sm:$0xff] }
 0x18d   :  { %v1101_v25 = vsel %vm1090_vm2, nan, %v1100_v52  ;;  %v1528_v53 = vmul.f32 %v4003_v7, %v1520_v31  ;;  %v2024_v33 = vsel %vm1641_vm8, 1.0, %v2357_v38  ;;  %2302 = vcosq.f32 %v1398_v34 }
 0x18e   :  { %v1521_v14 = vmul.f32 0.8164966, %v1101_v25  ;;  %v2025_v58 = vsel %vm1642_vm9, 1.0, %v2357_v38  ;;  %v1665_v44 = vmul.f32 %v2024_v33, %v1633_v50  ;;  %v4004_v49 = vsel %vm3247_vm10, 0, %v3287_v23 }
 0x18f   :  { %v1507_v54 = vadd.s32 3, %v4004_v49  ;;  %2304 = vsinq.f32 %v1398_v34  ;;  %v1403_v24 = vadd.s32 3, %v1399_v16  ;;  %v1666_v36 = vmul.f32 %v2025_v58, %v1634_v59  ;;  %v4007_v59 = vld [vmem:[#allocation36_spill] sm:$0xff]  ;;  %v4008_v16 = vld [vmem:[#allocation34_spill] sm:$0xff]  ;;  %v4010_v34 = vld [vmem:[#allocation33_spill] sm:$0xff] }
 0x190   :  { %v1529_v60 = vmul.f32 %v2466_v56, %v1521_v14  ;;  %v1673_v39 = vmul.f32 %v1665_v44, %v1528_v53  ;;  %v1199_v20 = vxor.u32 2147483648, %v3384_v21  ;;  %v1202_v42 = vxor.u32 2147483648, %v3371_v12 }
 0x191   :  { %vm1197_vm6 = vcmp.lt.s32.totalorder %v3187_v19, 2  ;;  %vm1198_vm8 = vcmp.eq.s32.totalorder %v3187_v19, 0  ;;  %vm1201_vm9 = vcmp.eq.s32.totalorder %v3187_v19, 2  ;;  %v1303_v63 = vxor.u32 2147483648, %v3257_v55  ;;  %v4006_v19 = vld [vmem:[#allocation37_spill] sm:$0xff] }
 0x192   :  { %v1674_v23 = vmul.f32 %v1666_v36, %v1529_v60  ;;  %v1200_v8 = vsel %vm1198_vm8, %v3371_v12, %v1199_v20  ;;  %v1203_v50 = vsel %vm1201_vm9, %v1202_v42, %v3384_v21  ;;  %vm1302_vm10 = vcmp.eq.s32.totalorder %v4005_v2, 0 }
 0x193   :  { %vm1194_vm14 = vweird.f32 %v2815_v51  ;;  %v1204_v56 = vsel %vm1197_vm6, %v1200_v8, %v1203_v50  ;;  %v1304_v0 = vsel %vm1302_vm10, %v3253_v28, %v1303_v63  ;;  %v1306_v31 = vxor.u32 2147483648, %v3253_v28 }
 0x194   :  { %v1680_v30 = vpack.c.bf16 %v1674_v23, %v1673_v39  ;;  %v1205_v10 = vsel %vm1194_vm14, nan, %v1204_v56  ;;  %vm1305_vm15 = vcmp.eq.s32.totalorder %v4005_v2, 2  ;;  %v1635_v15 = vsub.f32 %v4007_v59, %v4006_v19 }
 0x195   :  { %vm1301_vm11 = vcmp.lt.s32.totalorder %v4005_v2, 2  ;;  %v1307_v12 = vsel %vm1305_vm15, %v1306_v31, %v3257_v55  ;;  %v1522_v21 = vmul.f32 0.8164966, %v1205_v10  ;;  %v1636_v51 = vsub.f32 %v4009_v57, %v4008_v16 }
 0x196   :  { %v1508_v52 = vand.u32 3, %v1507_v54  ;;  %vm1646_vm12 = vcmp.lt.f32.partialorder %v4010_v34, 1.0  ;;  %v1597_v28 = vmul.f32 35.0, %v3203_v61  ;;  %2086 = vmatmul.mubr.msk.bf16.vlgmr.msra.gmra.mxu1 %vm494_vm4, %v1680_v30  ;;  %vm1298_vm1 = vweird.f32 %v2720_v9 }
 0x197   :  { %v1308_v25 = vsel %vm1301_vm11, %v1304_v0, %v1307_v12  ;;  %v1621_v7 = vmul.f32 %v3207_v3, %v3172_v45  ;;  %v1530_v55 = vmul.f32 %v2623_v22, %v1522_v21  ;;  %v2026_v33 = vsel %vm1643_vm3, 1.0, %v2357_v38 }
 0x198   :  { %v1309_v53 = vsel %vm1298_vm1, nan, %v1308_v25  ;;  %v4011_v14 = vsub.f32 1.0, %v3225_v37  ;;  %v2027_v61 = vsel %vm1644_vm7, 1.0, %v2357_v38  ;;  %v1667_v9 = vmul.f32 %v2026_v33, %v1635_v15 }
 0x199   :  { %v1523_v44 = vmul.f32 0.8164966, %v1309_v53  ;;  %v1404_v49 = vand.u32 3, %v1403_v24  ;;  %v1668_v54 = vmul.f32 %v2027_v61, %v1636_v51  ;;  %v1511_v45 = vxor.u32 2147483648, %v3471_v35 }
 0x19a   :  { %v1605_v58 = vadd.f32 %v1597_v28, %v4011_v14  ;;  %v1514_v3 = vxor.u32 2147483648, %v3446_v46  ;;  %v1675_v36 = vmul.f32 %v1667_v9, %v1530_v55  ;;  %vm1510_vm5 = vcmp.eq.s32.totalorder %v1508_v52, 0  ;;  %v2303_v11 = vpop.eup %2302 }
 0x19b   :  { %v1531_v22 = vmul.f32 %v2615_v17, %v1523_v44  ;;  %vm1513_vm3 = vcmp.eq.s32.totalorder %v1508_v52, 2  ;;  %v1629_v37 = vmul.f32 15.0, %v1621_v7  ;;  %vm1509_vm2 = vcmp.lt.s32.totalorder %v1508_v52, 2 }
 0x19c   :  { %v1512_v60 = vsel %vm1510_vm5, %v3446_v46, %v1511_v45  ;;  %v1515_v29 = vsel %vm1513_vm3, %v1514_v3, %v3471_v35  ;;  %v2305_v39 = vpop.eup %2304  ;;  %v1410_v24 = vxor.u32 2147483648, %v2303_v11  ;;  %vm1506_vm7 = vweird.f32 %v2993_v62 }
 0x19d   :  { %v1676_v20 = vmul.f32 %v1668_v54, %v1531_v22  ;;  %v1516_v42 = vsel %vm1509_vm2, %v1512_v60, %v1515_v29  ;;  %vm1406_vm6 = vcmp.eq.s32.totalorder %v1404_v49, 0  ;;  %v1407_v63 = vxor.u32 2147483648, %v2305_v39  ;;  %v2253_v60 = vld [vmem:[%s3817_s4 + $0x4] ss:$8 sps:$4 sm:$0x1f]  }
 0x19e   :  { %vm1409_vm8 = vcmp.eq.s32.totalorder %v1404_v49, 2  ;;  %v1517_v17 = vsel %vm1506_vm7, nan, %v1516_v42  ;;  %v1638_v2 = vsub.f32 %v3180_v47, %v3183_v32  ;;  %vm1645_vm9 = vcmp.lt.f32.partialorder %v3070_v40, 1.0  ;;  %v4012_v42 = vld [vmem:[#allocation39_spill] sm:$0xff] }
 0x19f   :  { %v1681_v23 = vpack.c.bf16 %v1676_v20, %v1675_v36  ;;  %v1411_v8 = vsel %vm1409_vm8, %v1410_v24, %v2305_v39  ;;  %v1525_v50 = vmul.f32 0.8164966, %v1517_v17  ;;  %vm1405_vm10 = vcmp.lt.s32.totalorder %v1404_v49, 2  ;;  %v2255_v20 = vld [vmem:[%s3817_s4] ss:$8 sps:$4 sm:$0x1f]  }
 0x1a0   :  { %v1408_v46 = vsel %vm1406_vm6, %v2303_v11, %v1407_v63  ;;  %vm1402_vm14 = vweird.f32 %v3053_v1  ;;  %v1637_v56 = vsub.f32 %v1605_v58, %v1629_v37  ;;  %v2029_v31 = vsel %vm1646_vm12, 1.0, %v2357_v38  ;;  %v4013_v17 = vld [vmem:[#allocation42_spill] sm:$0xff]  ;;  %s2361_s4 = smov 8  }
 0x1a1   :  { %2089 = vmatprep.mubr.msk.bf16.mxu1 %vm494_vm4, %v1681_v23  ;;  %v1412_v62 = vsel %vm1405_vm10, %v1408_v46, %v1411_v8  ;;  %v1533_v35 = vmul.f32 %v2631_v26, %v1525_v50  ;;  %v155_v30 = vmul.f32 3.0, %v3147_v48  ;;  %v1670_v32 = vmul.f32 %v2029_v31, %v1638_v2  ;;  %v4014_v50 = vld [vmem:[#allocation41_spill] sm:$0xff] }
 0x1a2   :  { %v1413_v0 = vsel %vm1402_vm14, nan, %v1412_v62  ;;  %v2028_v40 = vsel %vm1645_vm9, 1.0, %v2357_v38  ;;  %v154_v10 = vmul.f32 3.0, %v3050_v6  ;;  %v104_v26 = vmul.f32 3.8729835, %v3002_v4  ;;  %v121_v15 = vpop.permute.xlu0 %120 }
 0x1a3   :  { %v1524_v47 = vmul.f32 0.8164966, %v1413_v0  ;;  %v1669_v1 = vmul.f32 %v2028_v40, %v1637_v56  ;;  %v1678_v59 = vmul.f32 %v1670_v32, %v1533_v35  ;;  %v105_v12 = vmul.f32 3.8729835, %v3010_v27  ;;  %v123_v57 = vpop.permute.xlu1 %122 }
 0x1a4   :  { %v163_v21 = vmul.f32 %v155_v30, %v3147_v48  ;;  %v144_v51 = vmul.f32 %v121_v15, %v104_v26  ;;  %v162_v34 = vmul.f32 %v154_v10, %v3050_v6  ;;  %v106_v61 = vmul.f32 3.8729835, %v3050_v6 }
 0x1a5   :  { %v1532_v19 = vmul.f32 %v2636_v13, %v1524_v47  ;;  %v145_v52 = vmul.f32 %v123_v57, %v105_v12  ;;  %v107_v9 = vmul.f32 3.8729835, %v3147_v48  ;;  %vm531_vm15 = vcmask 1044480  }
 0x1a6   :  { %v185_v25 = vpop.permute.xlu0 %184  ;;  %v1970_v7 = vadd.f32 -1.0, %v163_v21  ;;  %v1969_v27 = vadd.f32 -1.0, %v162_v34  ;;  %v2359_v39 = vmov 65535   ;;  %v156_v63 = vmul.f32 3.0, %v4012_v42 }
 0x1a7   :  { %v1677_v16 = vmul.f32 %v1669_v1, %v1532_v19  ;;  %v2168_v28 = vpack.i.bf16 %v145_v52, %v144_v51  ;;  %v187_v13 = vpop.permute.xlu1 %186  ;;  %v208_v53 = vmul.f32 %v185_v25, %v104_v26  ;;  %v532_v48 = vsel %vm530_vm13, 4294967295, %v2359_v39  ;;  %v4015_v52 = vld [vmem:[#allocation40_spill] sm:$0xff]  ;;  %v4019_v39 = vld [vmem:[#allocation46_spill] sm:$0xff] }
 0x1a8   :  { %v209_v4 = vmul.f32 %v187_v13, %v105_v12  ;;  %v179_v33 = vmul.f32 1.118034, %v1970_v7  ;;  %v178_v14 = vmul.f32 1.118034, %v1969_v27  ;;  %v157_v23 = vmul.f32 3.0, %v4013_v17  ;;  %v4016_v25 = vld [vmem:[#allocation44_spill] sm:$0xff] }
 0x1a9   :  { %v1682_v38 = vpack.c.bf16 %v1678_v59, %v1677_v16  ;;  %2169 = vrot.lane.b32.xlu1 %v2168_v28, %s2356_s2  ;;  %v533_v8 = vsel %vm531_vm15, %v532_v48, 0  ;;  %v2360_v35 = vmov 0   ;;  %v109_v31 = vmul.f32 3.8729835, %v4013_v17  ;;  %v4017_v13 = vld [vmem:[#allocation45_spill] sm:$0xff] }
 0x1aa   :  { %v2173_v55 = vpack.i.bf16 %v209_v4, %v208_v53  ;;  %v2178_v58 = vpack.i.bf16 %v179_v33, %v178_v14  ;;  %v125_v44 = vpop.permute.xlu0 %124  ;;  %v538_v46 = vand.u32 %v2253_v60, %v533_v8  ;;  %v535_v62 = vand.u32 %v2255_v20, %v533_v8  ;;  %572 = vmatprep.mubr.bf16.mxu0 %v2360_v35 }
 0x1ab   :  { %2090 = vmatmul.mubr.msk.bf16.gmra.mxu1 %vm494_vm4, %v1682_v38  ;;  %v146_v45 = vmul.f32 %v125_v44, %v106_v61  ;;  %v164_v47 = vmul.f32 %v156_v63, %v4012_v42  ;;  %v165_v32 = vmul.f32 %v157_v23, %v4013_v17  ;;  %v3585_v12 = vmul.f32 1.7320508, %v4012_v42 }
 0x1ac   :  { %554 = vmatprep.subr.bf16.mxu0 %v538_v46  ;;  %v3589_v16 = vmul.f32 1.7320508, %v4013_v17  ;;  %v158_v53 = vmul.f32 3.0, %v4017_v13  ;;  %v159_v4 = vmul.f32 3.0, %v3327_v18  ;;  %v3605_v60 = vmul.f32 1.7320508, %v4017_v13 }
 0x1ad   :  { %2174 = vrot.lane.b32.xlu1 %v2173_v55, %s2358_s12  ;;  %555 = vmatpush1.bf16.msra.mxu0 %v535_v62  ;;  %v1971_v57 = vadd.f32 -1.0, %v164_v47  ;;  %v1972_v51 = vadd.f32 -1.0, %v165_v32  ;;  %v111_v17 = vmul.f32 3.8729835, %v3327_v18  ;;  %v110_v23 = vmul.f32 3.8729835, %v4017_v13 }
 0x1ae   :  { %v189_v49 = vpop.permute.xlu0 %188  ;;  %v2198_v27 = vpack.i.bf16 %v3589_v16, %v3585_v12  ;;  %v4021_v32 = vld [vmem:[#allocation50_spill] sm:$0xff]  ;;  %vm432_vm11 = vcmask 7168   ;;  %vm441_vm12 = vcmask 15360   ;;  %vm458_vm1 = vcmask 31744  }
 0x1af   :  { %v210_v26 = vmul.f32 %v189_v49, %v106_v61  ;;  %v180_v55 = vmul.f32 1.118034, %v1971_v57  ;;  %v181_v33 = vmul.f32 1.118034, %v1972_v51  ;;  %v166_v49 = vmul.f32 %v158_v53, %v4017_v13  ;;  %v4023_v53 = vld [vmem:[#allocation49_spill] sm:$0xff] }
 0x1b0   :  { %vm467_vm5 = vcmask 39936   ;;  %vm476_vm3 = vcmask 48128   ;;  %vm485_vm2 = vcmask 56320   ;;  %vm517_vm7 = vcmask 72704  }
 0x1b1   :  { %2179 = vrot.lane.b32.xlu1 %v2178_v58, %s2356_s2  ;;  %v1973_v20 = vadd.f32 -1.0, %v166_v49 }
 0x1bf   :  { %v127_v54 = vpop.permute.xlu1 %126 }
 0x1c0   :  { %v147_v3 = vmul.f32 %v127_v54, %v107_v9  ;;  %v129_v11 = vpop.permute.xlu0 %128  ;;  %v167_v54 = vmul.f32 %v159_v4, %v3327_v18  ;;  %v434_v4 = vsel %vm432_vm11, 1.0, %v4023_v53 }
 0x1c2   :  { %v2183_v22 = vpack.i.bf16 %v147_v3, %v146_v45  ;;  %v2208_v3 = vpack.i.bf16 %v181_v33, %v180_v55 }
 0x1c3   :  { %v191_v36 = vpop.permute.xlu1 %190 }
 0x1c4   :  { %2184 = vrot.lane.b32.xlu0 %v2183_v22, %s2356_s2  ;;  %v211_v40 = vmul.f32 %v191_v36, %v107_v9  ;;  %v4018_v36 = vld [vmem:[#allocation43_spill] sm:$0xff] }
 0x1c5   :  { %v237_v6 = vpop.permute.xlu0 %236 }
 0x1c6   :  { %v2193_v21 = vpack.i.bf16 %v211_v40, %v210_v26  ;;  %v258_v34 = vsub.f32 %v4015_v52, %v237_v6  ;;  %v2256_v52 = vld [vmem:[%s3818_s3 + $0x8] sm:$0xff]  }
 0x1c7   :  { %2093 = vmatprep.subr.bf16.mxu1 %v2256_v52 }
 0x1c8   :  { %v233_v37 = vpop.permute.xlu1 %232  ;;  %v266_v14 = vmul.f32 1.9364917, %v258_v34  ;;  %v2257_v34 = vld [vmem:[%s3818_s3] sm:$0xff]   ;;  %2094 = vmatpush3.bf16.msra.mxu1 %v2256_v52 }
 0x1c9   :  { %v256_v29 = vsub.f32 %v3196_v5, %v233_v37  ;;  %v108_v5 = vmul.f32 3.8729835, %v4012_v42  ;;  %v193_v1 = vpop.permute.xlu0 %192  ;;  %2095 = vmatprep.subr.bf16.mxu1 %v2257_v34 }
 0x1cb   :  { %v264_v56 = vmul.f32 1.9364917, %v256_v29  ;;  %v148_v10 = vmul.f32 %v129_v11, %v108_v5  ;;  %v212_v22 = vmul.f32 %v193_v1, %v108_v5  ;;  %v3608_v29 = vmul.f32 1.7320508, %v3327_v18 }
 0x1cc   :  { %v235_v24 = vpop.permute.xlu1 %234  ;;  %v182_v5 = vmul.f32 1.118034, %v1973_v20  ;;  %2096 = vmatpush3.bf16.msra.mxu1 %v2257_v34  ;;  %v435_v20 = vsel %vm432_vm11, 1.0, %v3357_v43 }
 0x1cd   :  { %v257_v2 = vsub.f32 %v4014_v50, %v235_v24  ;;  %v1974_v24 = vadd.f32 -1.0, %v167_v54 }
 0x1cf   :  { %v265_v0 = vmul.f32 1.9364917, %v257_v2  ;;  %v2223_v2 = vpack.i.bf16 %v3608_v29, %v3605_v60 }
 0x1d0   :  { %v131_v30 = vpop.permute.xlu1 %130 }
 0x1d1   :  { %v2188_v19 = vpack.i.bf16 %v265_v0, %v264_v56  ;;  %v149_v59 = vmul.f32 %v131_v30, %v109_v31  ;;  %v183_v56 = vmul.f32 1.118034, %v1974_v24 }
 0x1d3   :  { %v2203_v15 = vpack.i.bf16 %v149_v59, %v148_v10  ;;  %2189 = vrot.lane.b32.xlu0 %v2188_v19, %s2361_s4  ;;  %v2238_v10 = vpack.i.bf16 %v183_v56, %v182_v5  ;;  %v444_v5 = vsel %vm441_vm12, %v435_v20, %v3357_v43 }
 0x1d5   :  { %2204 = vrot.lane.b32.xlu1 %v2203_v15, %s2356_s2 }
 0x1d6   :  { %v241_v38 = vpop.permute.xlu0 %240 }
 0x1d7   :  { %v239_v28 = vpop.permute.xlu1 %238  ;;  %2194 = vrot.lane.b32.xlu0 %v2193_v21, %s2358_s12  ;;  %v260_v11 = vsub.f32 %v4018_v36, %v241_v38 }
 0x1d8   :  { %v259_v7 = vsub.f32 %v4016_v25, %v239_v28 }
 0x1d9   :  { %v268_v42 = vmul.f32 1.9364917, %v260_v11 }
 0x1da   :  { %v267_v58 = vmul.f32 1.9364917, %v259_v7  ;;  %v133_v45 = vpop.permute.xlu0 %132  ;;  %v4022_v7 = vld [vmem:[#allocation48_spill] sm:$0xff] }
 0x1db   :  { %v195_v44 = vpop.permute.xlu1 %194  ;;  %2199 = vrot.lane.b32.xlu0 %v2198_v27, %s2355_s0  ;;  %v150_v0 = vmul.f32 %v133_v45, %v110_v23  ;;  %v433_v13 = vsel %vm432_vm11, 1.0, %v4022_v7 }
 0x1dc   :  { %v2213_v61 = vpack.i.bf16 %v267_v58, %v266_v14  ;;  %v213_v9 = vmul.f32 %v195_v44, %v109_v31  ;;  %v4020_v31 = vld [vmem:[#allocation47_spill] sm:$0xff]  ;;  %v442_v58 = vsel %vm441_vm12, %v433_v13, %v4022_v7  ;;  %v443_v44 = vsel %vm441_vm12, %v434_v4, %v4023_v53 }
 0x1de   :  { %2214 = vrot.lane.b32.xlu1 %v2213_v61, %s2361_s4  ;;  %v2218_v6 = vpack.i.bf16 %v213_v9, %v212_v22  ;;  %v245_v8 = vpop.permute.xlu0 %244 }
 0x1df   :  { %v243_v37 = vpop.permute.xlu1 %242  ;;  %2209 = vrot.lane.b32.xlu0 %v2208_v3, %s2356_s2  ;;  %v262_v30 = vsub.f32 %v4020_v31, %v245_v8 }
 0x1e0   :  { %v261_v48 = vsub.f32 %v4019_v39, %v243_v37 }
 0x1e1   :  { %v270_v1 = vmul.f32 1.9364917, %v262_v30 }
 0x1e2   :  { %v269_v63 = vmul.f32 1.9364917, %v261_v48  ;;  %2219 = vrot.lane.b32.xlu1 %v2218_v6, %s2358_s12  ;;  %v197_v19 = vpop.permute.xlu0 %196 }
 0x1e3   :  { %v135_v50 = vpop.permute.xlu1 %134  ;;  %v214_v15 = vmul.f32 %v197_v19, %v110_v23 }
 0x1e4   :  { %v2228_v46 = vpack.i.bf16 %v269_v63, %v268_v42  ;;  %v151_v62 = vmul.f32 %v135_v50, %v111_v17  ;;  %v436_v63 = vsel %vm432_vm11, 1.0, %v3341_v41 }
 0x1e5   :  { %v445_v31 = vsel %vm441_vm12, %v436_v63, %v3341_v41  ;;  %v437_v41 = vsel %vm432_vm11, 1.0, %v3585_v12 }
 0x1e6   :  { %2224 = vrot.lane.b32.xlu1 %v2223_v2, %s2355_s0  ;;  %2229 = vrot.lane.b32.xlu0 %v2228_v46, %s2361_s4  ;;  %v2233_v18 = vpack.i.bf16 %v151_v62, %v150_v0  ;;  %v2155_v28 = vpop.permute.xlu0 %2154  ;;  %v446_v53 = vsel %vm441_vm12, %v437_v41, %v3585_v12 }
 0x1e7   :  { %v247_v47 = vpop.permute.xlu1 %246  ;;  %v2157_v27 = vunpack.i.h.bf16 %v2155_v28  ;;  %v2156_v55 = vunpack.i.l.bf16 %v2155_v28 }
 0x1e8   :  { %v263_v40 = vsub.f32 %v4021_v32, %v247_v47 }
 0x1e9   :  { %v451_v61 = vsel %vm39_vm0, %v443_v44, %v2157_v27  ;;  %v450_v9 = vsel %vm39_vm0, %v442_v58, %v2156_v55 }
 0x1ea   :  { %v271_v59 = vmul.f32 1.9364917, %v263_v40  ;;  %2239 = vrot.lane.b32.xlu1 %v2238_v10, %s2356_s2  ;;  %2234 = vrot.lane.b32.xlu0 %v2233_v18, %s2356_s2  ;;  %v2165_v49 = vpop.permute.xlu0 %2164 }
 0x1eb   :  { %v199_v26 = vpop.permute.xlu1 %198  ;;  %v2167_v37 = vunpack.i.h.bf16 %v2165_v49  ;;  %v2166_v6 = vunpack.i.l.bf16 %v2165_v49 }
 0x1ec   :  { %v2248_v21 = vpack.i.bf16 %v271_v59, %v270_v1  ;;  %v215_v57 = vmul.f32 %v199_v26, %v111_v17  ;;  %v438_v26 = vsel %vm432_vm11, 1.0, %v3589_v16 }
 0x1ed   :  { %v447_v4 = vsel %vm441_vm12, %v438_v26, %v3589_v16 }
 0x1ee   :  { %v2243_v51 = vpack.i.bf16 %v215_v57, %v214_v15  ;;  %2249 = vrot.lane.b32.xlu1 %v2248_v21, %s2361_s4 }
 0x1f0   :  { %2244 = vrot.lane.b32.xlu0 %v2243_v51, %s2358_s12 }
 0x1f1   :  { %v2160_v38 = vpop.permute.xlu1 %2159 }
 0x1f2   :  { %v2162_v17 = vunpack.i.h.bf16 %v2160_v38  ;;  %v2161_v23 = vunpack.i.l.bf16 %v2160_v38 }
 0x1f4   :  { %v453_v32 = vsel %vm39_vm0, %v445_v31, %v2162_v17  ;;  %v452_v40 = vsel %vm39_vm0, %v444_v5, %v2161_v23 }
 0x21b   :  { %v2170_v25 = vpop.permute.xlu1 %2169 }
 0x21c   :  { %v2172_v33 = vunpack.i.h.bf16 %v2170_v25  ;;  %v2171_v14 = vunpack.i.l.bf16 %v2170_v25 }
 0x21e   :  { %v459_v54 = vsel %vm458_vm1, %v450_v9, %v2171_v14  ;;  %v460_v45 = vsel %vm458_vm1, %v451_v61, %v2172_v33 }
 0x21f   :  { %v2175_v3 = vpop.permute.xlu1 %2174  ;;  %v468_v22 = vsel %vm467_vm5, %v459_v54, %v2171_v14  ;;  %v469_v36 = vsel %vm467_vm5, %v460_v45, %v2172_v33 }
 0x220   :  { %v2177_v39 = vunpack.i.h.bf16 %v2175_v3  ;;  %v2176_v48 = vunpack.i.l.bf16 %v2175_v3  ;;  %v477_v24 = vsel %vm476_vm3, %v468_v22, %v2166_v6  ;;  %v478_v42 = vsel %vm476_vm3, %v469_v36, %v2167_v37 }
 0x222   :  { %v486_v56 = vsel %vm485_vm2, %v477_v24, %v2176_v48  ;;  %v487_v0 = vsel %vm485_vm2, %v478_v42, %v2177_v39 }
 0x223   :  { %v2180_v30 = vpop.permute.xlu1 %2179 }
 0x224   :  { %v2182_v15 = vunpack.i.h.bf16 %v2180_v30  ;;  %v2181_v21 = vunpack.i.l.bf16 %v2180_v30 }
 0x236   :  { %v2185_v11 = vpop.permute.xlu0 %2184 }
 0x237   :  { %v2187_v50 = vunpack.i.h.bf16 %v2185_v11  ;;  %v2186_v2 = vunpack.i.l.bf16 %v2185_v11 }
 0x239   :  { %v462_v43 = vsel %vm458_vm1, %v453_v32, %v2187_v50  ;;  %v461_v1 = vsel %vm458_vm1, %v452_v40, %v2186_v2 }
 0x23a   :  { %v471_v57 = vsel %vm467_vm5, %v462_v43, %v2187_v50  ;;  %v470_v51 = vsel %vm467_vm5, %v461_v1, %v2186_v2  ;;  %v439_v50 = vsel %vm432_vm11, 1.0, %v3605_v60  ;;  %v440_v2 = vsel %vm432_vm11, 1.0, %v3608_v29 }
 0x23b   :  { %v479_v27 = vsel %vm476_vm3, %v470_v51, %v2181_v21  ;;  %v480_v55 = vsel %vm476_vm3, %v471_v57, %v2182_v15  ;;  %v448_v26 = vsel %vm441_vm12, %v439_v50, %v3605_v60  ;;  %v449_v15 = vsel %vm441_vm12, %v440_v2, %v3608_v29 }
 0x245   :  { %v2190_v8 = vpop.permute.xlu0 %2189 }
 0x246   :  { %v2192_v46 = vunpack.i.h.bf16 %v2190_v8  ;;  %v2191_v62 = vunpack.i.l.bf16 %v2190_v8 }
 0x247   :  { %v2205_v59 = vpop.permute.xlu1 %2204 }
 0x248   :  { %v495_v47 = vsel %vm494_vm4, %v486_v56, %v2191_v62  ;;  %v496_v18 = vsel %vm494_vm4, %v487_v0, %v2192_v46  ;;  %v2207_v7 = vunpack.i.h.bf16 %v2205_v59  ;;  %v2206_v13 = vunpack.i.l.bf16 %v2205_v59 }
 0x249   :  { %v503_v10 = vpack.c.bf16 %v496_v18, %v495_v47  ;;  %v2195_v19 = vpop.permute.xlu0 %2194 }
 0x24a   :  { %v2197_v34 = vunpack.i.h.bf16 %v2195_v19  ;;  %v2196_v38 = vunpack.i.l.bf16 %v2195_v19 }
 0x24b   :  { %1977 = vmatmul.mubr.msk.bf16.vlgmr.msra.gmra.mxu0 %vm517_vm7, %v503_v10 }
 0x24c   :  { %582 = vmatprep.mubr.bf16.mxu0 %v2360_v35  ;;  %v488_v12 = vsel %vm485_vm2, %v479_v27, %v2196_v38  ;;  %v489_v16 = vsel %vm485_vm2, %v480_v55, %v2197_v34 }
 0x24d   :  { %v2200_v52 = vpop.permute.xlu0 %2199 }
 0x24e   :  { %v2202_v28 = vunpack.i.h.bf16 %v2200_v52  ;;  %v2201_v25 = vunpack.i.l.bf16 %v2200_v52 }
 0x250   :  { %v2215_v33 = vpop.permute.xlu1 %2214  ;;  %v455_v14 = vsel %vm39_vm0, %v447_v4, %v2202_v28  ;;  %v454_v58 = vsel %vm39_vm0, %v446_v53, %v2201_v25 }
 0x251   :  { %v2217_v44 = vunpack.i.h.bf16 %v2215_v33  ;;  %v2216_v61 = vunpack.i.l.bf16 %v2215_v33  ;;  %v464_v9 = vsel %vm458_vm1, %v455_v14, %v2207_v7  ;;  %v463_v49 = vsel %vm458_vm1, %v454_v58, %v2206_v13  ;;  %v2210_v54 = vpop.permute.xlu0 %2209 }
 0x252   :  { %v2212_v45 = vunpack.i.h.bf16 %v2210_v54  ;;  %v2211_v3 = vunpack.i.l.bf16 %v2210_v54  ;;  %v472_v11 = vsel %vm467_vm5, %v463_v49, %v2206_v13  ;;  %v473_v37 = vsel %vm467_vm5, %v464_v9, %v2207_v7 }
 0x253   :  { %v497_v22 = vsel %vm494_vm4, %v488_v12, %v2216_v61  ;;  %v498_v36 = vsel %vm494_vm4, %v489_v16, %v2217_v44 }
 0x254   :  { %v504_v6 = vpack.c.bf16 %v498_v36, %v497_v22  ;;  %v2220_v39 = vpop.permute.xlu1 %2219  ;;  %v481_v63 = vsel %vm476_vm3, %v472_v11, %v2211_v3  ;;  %v482_v17 = vsel %vm476_vm3, %v473_v37, %v2212_v45 }
 0x255   :  { %v2222_v20 = vunpack.i.h.bf16 %v2220_v39  ;;  %v2221_v24 = vunpack.i.l.bf16 %v2220_v39 }
 0x256   :  { %v3686_v48 = vpop.f32.mrf.mxu1  ;;  %1978 = vmatmul.mubr.msk.bf16.gmra.mxu0 %vm517_vm7, %v504_v6 }
 0x257   :  { %v2036_v42 = vmul.f32 -1.442695, %v3686_v48  ;;  %592 = vmatprep.mubr.bf16.mxu0 %v2360_v35  ;;  %v490_v0 = vsel %vm485_vm2, %v481_v63, %v2221_v24  ;;  %v491_v31 = vsel %vm485_vm2, %v482_v17, %v2222_v20 }
 0x258   :  { %v3692_v23 = vpop.f32.mrf.mxu1  ;;  %v2225_v46 = vpop.permute.xlu1 %2224 }
 0x259   :  { %2306 = vpow2.f32 %v2036_v42  ;;  %v2034_v8 = vmul.f32 -1.442695, %v3692_v23  ;;  %v2230_v62 = vpop.permute.xlu0 %2229  ;;  %v2227_v47 = vunpack.i.h.bf16 %v2225_v46  ;;  %v2226_v18 = vunpack.i.l.bf16 %v2225_v46 }
 0x25a   :  { %v2232_v5 = vunpack.i.h.bf16 %v2230_v62  ;;  %v2231_v56 = vunpack.i.l.bf16 %v2230_v62  ;;  %v3702_v30 = vpop.f32.mrf.mxu1 }
 0x25b   :  { %2308 = vpow2.f32 %v2034_v8  ;;  %v2037_v32 = vmul.f32 -1.442695, %v3702_v30  ;;  %v457_v51 = vsel %vm39_vm0, %v449_v15, %v2227_v47  ;;  %v456_v52 = vsel %vm39_vm0, %v448_v26, %v2226_v18 }
 0x25c   :  { %v499_v40 = vsel %vm494_vm4, %v490_v0, %v2231_v56  ;;  %v500_v10 = vsel %vm494_vm4, %v491_v31, %v2232_v5  ;;  %v3707_v19 = vpop.f32.mrf.mxu1  ;;  %v2240_v1 = vpop.permute.xlu1 %2239  ;;  %vm1840_vm0 = vcmask 261120  }
 0x25d   :  { %v505_v43 = vpack.c.bf16 %v500_v10, %v499_v40  ;;  %v2235_v59 = vpop.permute.xlu0 %2234  ;;  %2310 = vpow2.f32 %v2037_v32  ;;  %v2035_v41 = vmul.f32 -1.442695, %v3707_v19  ;;  %v2242_v25 = vunpack.i.h.bf16 %v2240_v1 }
 0x25e   :  { %v2237_v21 = vunpack.i.h.bf16 %v2235_v59  ;;  %v2236_v57 = vunpack.i.l.bf16 %v2235_v59  ;;  %v2241_v7 = vunpack.i.l.bf16 %v2240_v1 }
 0x25f   :  { %1979 = vmatmul.mubr.msk.bf16.gmra.mxu0 %vm517_vm7, %v505_v43  ;;  %2312 = vpow2.f32 %v2035_v41 }
 0x260   :  { %v466_v34 = vsel %vm458_vm1, %v457_v51, %v2237_v21  ;;  %v465_v38 = vsel %vm458_vm1, %v456_v52, %v2236_v57  ;;  %602 = vmatprep.mubr.bf16.mxu0 %v2360_v35  ;;  %v2250_v29 = vpop.permute.xlu1 %2249 }
 0x261   :  { %v475_v60 = vsel %vm467_vm5, %v466_v34, %v2237_v21  ;;  %v474_v28 = vsel %vm467_vm5, %v465_v38, %v2236_v57  ;;  %v2252_v55 = vunpack.i.h.bf16 %v2250_v29  ;;  %v2251_v33 = vunpack.i.l.bf16 %v2250_v29 }
 0x262   :  { %v2245_v13 = vpop.permute.xlu0 %2244  ;;  %v483_v14 = vsel %vm476_vm3, %v474_v28, %v2241_v7  ;;  %v484_v58 = vsel %vm476_vm3, %v475_v60, %v2242_v25 }
 0x263   :  { %v2247_v53 = vunpack.i.h.bf16 %v2245_v13  ;;  %v2246_v4 = vunpack.i.l.bf16 %v2245_v13 }
 0x265   :  { %v492_v44 = vsel %vm485_vm2, %v483_v14, %v2246_v4  ;;  %v493_v35 = vsel %vm485_vm2, %v484_v58, %v2247_v53 }
 0x266   :  { %v2307_v27 = vpop.eup %2306  ;;  %v501_v9 = vsel %vm494_vm4, %v492_v44, %v2251_v33  ;;  %v502_v49 = vsel %vm494_vm4, %v493_v35, %v2252_v55  ;;  %vm661_vm4 = vcmask 130052  }
 0x267   :  { %v1790_v61 = vadd.f32 1.0, %v2307_v27  ;;  %v506_v12 = vpack.c.bf16 %v502_v49, %v501_v9  ;;  %vm3738_vm6 = vmor %vm661_vm4, %vm530_vm13  ;;  %vm1950_vm13 = vcmask 257024  }
 0x268   :  { %v2309_v54 = vpop.eup %2308 }
 0x269   :  { %v1788_v16 = vadd.f32 1.0, %v2309_v54  ;;  %2314 = vrcp.f32 %v1790_v61  ;;  %1980 = vmatmul.mubr.msk.bf16.gmra.mxu0 %vm517_vm7, %v506_v12 }
 0x26a   :  { %v2311_v3 = vpop.eup %2310 }
 0x26b   :  { %v2091_v45 = vpop.f32.mrf.mxu1  ;;  %2316 = vrcp.f32 %v1788_v16  ;;  %v1791_v36 = vadd.f32 1.0, %v2311_v3 }
 0x26c   :  { %v2040_v22 = vmul.f32 -1.442695, %v2091_v45  ;;  %v2313_v37 = vpop.eup %2312 }
 0x26d   :  { %v1749_v11 = vpop.f32.mrf.mxu1  ;;  %v1789_v39 = vadd.f32 1.0, %v2313_v37 }
 0x26e   :  { %2318 = vpow2.f32 %v2040_v22  ;;  %v2038_v6 = vmul.f32 -1.442695, %v1749_v11 }
 0x26f   :  { %2320 = vrcp.f32 %v1791_v36  ;;  %v2092_v20 = vpop.f32.mrf.mxu1 }
 0x270   :  { %2322 = vpow2.f32 %v2038_v6  ;;  %v2041_v24 = vmul.f32 -1.442695, %v2092_v20 }
 0x271   :  { %2324 = vrcp.f32 %v1789_v39  ;;  %v1752_v42 = vpop.f32.mrf.mxu1 }
 0x272   :  { %2326 = vpow2.f32 %v2041_v24  ;;  %v2039_v63 = vmul.f32 -1.442695, %v1752_v42 }
 0x274   :  { %2328 = vpow2.f32 %v2039_v63 }
 0x276   :  { %v2315_v17 = vpop.eup %2314 }
 0x277   :  { %v1814_v32 = vmul.f32 %v2315_v17, %v3686_v48 }
 0x278   :  { %v2317_v8 = vpop.eup %2316 }
 0x279   :  { %v1812_v31 = vmul.f32 %v2317_v8, %v3692_v23 }
 0x27b   :  { %v2319_v50 = vpop.eup %2318 }
 0x27c   :  { %v2321_v2 = vpop.eup %2320  ;;  %v1794_v18 = vadd.f32 1.0, %v2319_v50 }
 0x27d   :  { %v2323_v46 = vpop.eup %2322  ;;  %v1815_v5 = vmul.f32 %v2321_v2, %v3702_v30 }
 0x27e   :  { %v2325_v62 = vpop.eup %2324  ;;  %v1792_v56 = vadd.f32 1.0, %v2323_v46 }
 0x27f   :  { %v2327_v0 = vpop.eup %2326  ;;  %v1813_v47 = vmul.f32 %v2325_v62, %v3707_v19  ;;  %v1821_v1 = vpack.c.bf16 %v1815_v5, %v1814_v32 }
 0x280   :  { %v1795_v40 = vadd.f32 1.0, %v2327_v0  ;;  %2330 = vrcp.f32 %v1792_v56 }
 0x281   :  { %v2329_v10 = vpop.eup %2328  ;;  %v1820_v43 = vpack.c.bf16 %v1813_v47, %v1812_v31 }
 0x282   :  { %2332 = vrcp.f32 %v1795_v40  ;;  %v1793_v59 = vadd.f32 1.0, %v2329_v10 }
 0x283   :  { %2334 = vrcp.f32 %v1794_v18  ;;  %2097 = vmatprep.mubr.msk.bf16.mxu1 %vm1840_vm0, %v1820_v43 }
 0x284   :  { %2336 = vrcp.f32 %v1793_v59  ;;  %2098 = vmatmul.mubr.msk.bf16.vlgmr.msra.gmra.mxu1 %vm1840_vm0, %v1821_v1 }
 0x28d   :  { %v2331_v23 = vpop.eup %2330 }
 0x28e   :  { %v1816_v48 = vmul.f32 %v2331_v23, %v1749_v11 }
 0x28f   :  { %v2333_v30 = vpop.eup %2332 }
 0x290   :  { %v2335_v19 = vpop.eup %2334  ;;  %v1819_v26 = vmul.f32 %v2333_v30, %v2092_v20 }
 0x291   :  { %v2337_v41 = vpop.eup %2336  ;;  %v1818_v21 = vmul.f32 %v2335_v19, %v2091_v45 }
 0x292   :  { %v1817_v15 = vmul.f32 %v2337_v41, %v1752_v42 }
 0x293   :  { %v1823_v51 = vpack.c.bf16 %v1819_v26, %v1818_v21 }
 0x294   :  { %v1822_v57 = vpack.c.bf16 %v1817_v15, %v1816_v48 }
 0x296   :  { %2101 = vmatprep.mubr.msk.bf16.mxu1 %vm1840_vm0, %v1822_v57 }
 0x297   :  { %2102 = vmatmul.mubr.msk.bf16.gmra.mxu1 %vm1840_vm0, %v1823_v51 }
 0x30b   :  { %v574_v52 = vpop.f32.mrf.mxu0 }
 0x30d   :  { %v576_v38 = vpop.f32.mrf.mxu0 }
 0x30e   :  { %v2056_v60 = vpack.c.bf16 %v576_v38, %v574_v52 }
 0x30f   :  { %v578_v28 = vpop.f32.mrf.mxu0 }
 0x310   :  { %663 = vst.msk [vmem:[%s3819_s5] sm:$0xff] %vm3738_vm6, %v2056_v60 }
 0x311   :  { %v580_v29 = vpop.f32.mrf.mxu0 }
 0x312   :  { %v2057_v25 = vpack.c.bf16 %v580_v29, %v578_v28 }
 0x314   :  { %664 = vst.msk [vmem:[%s3819_s5 + $0x8] sm:$0xff] %vm3738_vm6, %v2057_v25 }
 0x316   :  { %v584_v7 = vpop.f32.mrf.mxu0 }
 0x318   :  { %v586_v13 = vpop.f32.mrf.mxu0 }
 0x319   :  { %v2058_v53 = vpack.c.bf16 %v586_v13, %v584_v7 }
 0x31a   :  { %v588_v4 = vpop.f32.mrf.mxu0 }
 0x31b   :  { %665 = vst.msk [vmem:[%s3819_s5 + $0x10] sm:$0xff] %vm3738_vm6, %v2058_v53 }
 0x31c   :  { %v590_v27 = vpop.f32.mrf.mxu0 }
 0x31d   :  { %v2059_v55 = vpack.c.bf16 %v590_v27, %v588_v4 }
 0x31f   :  { %v594_v33 = vpop.f32.mrf.mxu0  ;;  %666 = vst.msk [vmem:[%s3819_s5 + $0x18] sm:$0xff] %vm3738_vm6, %v2059_v55 }
 0x321   :  { %v596_v14 = vpop.f32.mrf.mxu0 }
 0x322   :  { %v2060_v58 = vpack.c.bf16 %v596_v14, %v594_v33 }
 0x323   :  { %v598_v44 = vpop.f32.mrf.mxu0 }
 0x324   :  { %667 = vst.msk [vmem:[%s3819_s5 + $0x20] sm:$0xff] %vm3738_vm6, %v2060_v58 }
 0x325   :  { %v600_v35 = vpop.f32.mrf.mxu0 }
 0x326   :  { %v2061_v61 = vpack.c.bf16 %v600_v35, %v598_v44 }
 0x328   :  { %668 = vst.msk [vmem:[%s3819_s5 + $0x28] sm:$0xff] %vm3738_vm6, %v2061_v61 }
 0x329   :  { %v604_v9 = vpop.f32.mrf.mxu0 }
 0x32b   :  { %v606_v49 = vpop.f32.mrf.mxu0 }
 0x32c   :  { %v2062_v54 = vpack.c.bf16 %v606_v49, %v604_v9 }
 0x32d   :  { %v608_v12 = vpop.f32.mrf.mxu0 }
 0x32e   :  { %669 = vst.msk [vmem:[%s3819_s5 + $0x30] sm:$0xff] %vm3738_vm6, %v2062_v54 }
 0x32f   :  { %v610_v16 = vpop.f32.mrf.mxu0 }
 0x330   :  { %v2063_v45 = vpack.c.bf16 %v610_v16, %v608_v12 }
 0x332   :  { %670 = vst.msk [vmem:[%s3819_s5 + $0x38] sm:$0xff] %vm3738_vm6, %v2063_v45 }
 0x344   :  { %v2099_v3 = vpop.f32.mrf.mxu1 }
 0x345   :  { %v2066_v22 = vpack.c.bf16 %v2099_v3, %v2099_v3 }
 0x346   :  { %v1887_v36 = vpop.f32.mrf.mxu1 }
 0x347   :  { %1953 = vst.msk [vmem:[%s3820_s6 + $0x8] sm:$0xf] %vm1950_vm13, %v2066_v22  ;;  %v2064_v11 = vpack.c.bf16 %v1887_v36, %v1887_v36 }
 0x348   :  { %v2100_v37 = vpop.f32.mrf.mxu1 }
 0x349   :  { %1951 = vst.msk [vmem:[%s3820_s6] sm:$0xf] %vm1950_vm13, %v2064_v11  ;;  %v2067_v6 = vpack.c.bf16 %v2100_v37, %v2100_v37 }
 0x34a   :  { %v1890_v39 = vpop.f32.mrf.mxu1 }
 0x34b   :  { %1954 = vst.msk [vmem:[%s3820_s6 + $0xc] sm:$0xf] %vm1950_vm13, %v2067_v6  ;;  %v2065_v20 = vpack.c.bf16 %v1890_v39, %v1890_v39 }
 0x34d   :  { %1952 = vst.msk [vmem:[%s3820_s6 + $0x4] sm:$0xf] %vm1950_vm13, %v2065_v20 }
 0x357   :  { %v2103_v24 = vpop.f32.mrf.mxu1 }
 0x358   :  { %v2070_v42 = vpack.c.bf16 %v2103_v24, %v2103_v24 }
 0x359   :  { %v1903_v63 = vpop.f32.mrf.mxu1 }
 0x35a   :  { %1957 = vst.msk [vmem:[%s3820_s6 + $0x18] sm:$0xf] %vm1950_vm13, %v2070_v42  ;;  %v2068_v17 = vpack.c.bf16 %v1903_v63, %v1903_v63 }
 0x35b   :  { %v2104_v8 = vpop.f32.mrf.mxu1 }
 0x35c   :  { %1955 = vst.msk [vmem:[%s3820_s6 + $0x10] sm:$0xf] %vm1950_vm13, %v2068_v17  ;;  %v2071_v50 = vpack.c.bf16 %v2104_v8, %v2104_v8 }
 0x35d   :  { %v1906_v2 = vpop.f32.mrf.mxu1 }
 0x35e   :  { %1958 = vst.msk [vmem:[%s3820_s6 + $0x1c] sm:$0xf] %vm1950_vm13, %v2071_v50  ;;  %v2069_v46 = vpack.c.bf16 %v1906_v2, %v1906_v2 }
 0x360   :  { %1956 = vst.msk [vmem:[%s3820_s6 + $0x14] sm:$0xf] %vm1950_vm13, %v2069_v46 }

// kernel: forward.4
= control target key start
LH: loop header
LB: loop body
LE: loop exit
PB: predicated region body
PF: predicated region fallthrough
CT: control target
= control target key end

     0   :  { %vm99_vm0 = vcmask 1043456   ;;  %vm33_vm1 = vcmask 31744   ;;  %vm37_vm2 = vcmask 1041408   ;;  %v290_v3 = vmov 0   ;;  %s356_s3 = inlined_call_operand.vmem [shape: f32[4,1], index: 3, kind: input, shape index: {}]   ;;  %s357_s0 = inlined_call_operand.vmem [shape: f32[16,4], index: 0, kind: input, shape index: {}]   ;;  %s358_s2 = inlined_call_operand.vmem [shape: bf16[4,144], index: 2, kind: input, shape index: {}]   ;;  %s359_s1 = inlined_call_operand.vmem [shape: f32[2,16], index: 1, kind: input, shape index: {}]   ;;  %s360_s4 = inlined_call_operand.vmem [shape: f32[16,144], index: 4, kind: output, shape index: {0}]   ;;  %s361_s5 = inlined_call_operand.vmem [shape: f32[2,1], index: 5, kind: output, shape index: {1}]  }
   0x1   :  { %v92_v0 = vld [vmem:[%s356_s3] sm:$0xf]  ;;  %v21_v2 = vld [vmem:[%s357_s0 + $0x8] sm:$0xff]  ;;  %76 = vmatprep.mubr.bf16.mxu0 %v290_v3  ;;  %v291_v8 = vmov 0.0   ;;  %vm292_vm3 = vmmov 0   ;;  %vm88_vm4 = vcmask 130048  }
   0x2   :  { %v20_v1 = vld [vmem:[%s357_s0] sm:$0xff]  ;;  %275 = vmatprep.subr.msk.mxu1 %vm99_vm0, %v92_v0  ;;  %vm252_vm5 = vcmask 1024  }
   0x3   :  { %277 = vmatprep.mubr.msk.f32.mxu1 %vm33_vm1, %v20_v1  ;;  %v262_v4 = vld.sshfl [vmem:[%s358_s2] sm:$0x33 pattern:$0x76325410]  ;;  %276 = vmatpush3.msk.msra.mxu1 %vm99_vm0, %v92_v0  ;;  %v22_v7 = vpack.c.bf16 %v21_v2, %v20_v1 }
   0x4   :  { %v32_v5 = vcombine.high %v262_v4, %v262_v4  ;;  %v39_v6 = vsel %vm37_vm2, %v262_v4, 0  ;;  %278 = vmatmul.mubr.msk.f32.vlgmr.msra.gmra.mxu1 %vm33_vm1, %v21_v2  ;;  %280 = vmatprep.subr.mxu1 %v291_v8  ;;  %v178_v10 = vld [vmem:[%s359_s1] sm:$0x3] }
   0x5   :  { %284 = vmatprep.mubr.msk.f32.mxu1 %vm292_vm3, %v291_v8 }
   0x6   :  { %263 = vmatprep.subr.msk.bf16.mxu0 %vm37_vm2, %v32_v5 }
   0x7   :  { %59 = vmatpush1.bf16.msra.mxu0 %v39_v6 }
   0xa   :  { %264 = vmatmul.mubr.msk.bf16.vlgmr.msra.gmra.mxu0 %vm33_vm1, %v22_v7 }
  0xc4   :  { %v279_v9 = vpop.f32.mrf.mxu1 }
  0xc5   :  { %281 = vmatpush3.msra.mxu1 %v279_v9 }
  0xc6   :  { %v169_v11 = vpop.f32.mrf.mxu1  ;;  %282 = vmatprep.subr.mxu1 %v291_v8 }
  0xc7   :  { %283 = vmatpush3.msra.mxu1 %v169_v11 }
  0xc8   :  { %285 = vmatmul.mubr.msk.f32.vlgmr.msra.gmra.mxu1 %vm88_vm4, %v178_v10 }
  0xca   :  { %v78_v12 = vpop.f32.mrf.mxu0 }
  0xcb   :  { %87 = vst [vmem:[%s360_s4] sm:$0xff] %v78_v12 }
  0xcc   :  { %v80_v13 = vpop.f32.mrf.mxu0 }
  0xcd   :  { %89 = vst.msk [vmem:[%s360_s4 + $0x8] sm:$0xff] %vm88_vm4, %v80_v13 }
  0xce   :  { %v82_v14 = vpop.f32.mrf.mxu0 }
  0xcf   :  { %90 = vst [vmem:[%s360_s4 + $0x10] sm:$0xff] %v82_v14 }
  0xd0   :  { %v84_v15 = vpop.f32.mrf.mxu0 }
  0xd1   :  { %91 = vst.msk [vmem:[%s360_s4 + $0x18] sm:$0xff] %vm88_vm4, %v84_v15 }
 0x188   :  { %v248_v16 = vpop.f32.mrf.mxu1 }
 0x189   :  { %253 = vst.msk [vmem:[%s361_s5] sm:$0x3] %vm252_vm5, %v248_v16 }
 0x18a   :  { %v286_v17 = vpop.f32.mrf.mxu1 }

// kernel: forward.6
= control target key start
LH: loop header
LB: loop body
LE: loop exit
PB: predicated region body
PF: predicated region fallthrough
CT: control target
= control target key end

     0   :  { %vm176_vm0 = vcmask 130048   ;;  %v2710_v24 = vmov 0   ;;  %vm235_vm1 = vcmask 1043456   ;;  %vm236_vm2 = vcmask 130052   ;;  %s2689_s7 = inlined_call_operand.vmem [shape: bf16[144,144], index: 7, kind: input, shape index: {}]   ;;  %s2690_s15 = inlined_call_operand.<no memory space> [shape: bf16[1,1], index: 15, kind: input, shape index: {}]   ;;  %s2691_s0 = inlined_call_operand.vmem [shape: f32[16,144], index: 0, kind: input, shape index: {}]   ;;  %s2692_s3 = inlined_call_operand.vmem [shape: bf16[64,16], index: 3, kind: input, shape index: {}]   ;;  %s2693_s10 = inlined_call_operand.vmem [shape: bf16[32,144], index: 10, kind: input, shape index: {}]   ;;  %s2694_s6 = inlined_call_operand.vmem [shape: bf16[64,32], index: 6, kind: input, shape index: {}]   ;;  %s2695_s8 = inlined_call_operand.vmem [shape: bf16[144,144], index: 8, kind: input, shape index: {}]   ;;  %s2696_s9 = inlined_call_operand.vmem [shape: bf16[144,144], index: 9, kind: input, shape index: {}]   ;;  %s2697_s5 = inlined_call_operand.vmem [shape: bf16[64,144], index: 5, kind: input, shape index: {}]   ;;  %s2698_s4 = inlined_call_operand.vmem [shape: bf16[16,64], index: 4, kind: input, shape index: {}]   ;;  %s2699_s12 = inlined_call_operand.vmem [shape: bf16[144,144], index: 12, kind: input, shape index: {}]   ;;  %s2700_s11 = inlined_call_operand.vmem [shape: bf16[144,144], index: 11, kind: input, shape index: {}]   ;;  %s2701_s13 = inlined_call_operand.vmem [shape: bf16[4,144], index: 13, kind: input, shape index: {}]   ;;  %s2702_s1 = inlined_call_operand.vmem [shape: bf16[16,4], index: 1, kind: input, shape index: {}]   ;;  %s2703_s14 = inlined_call_operand.vmem [shape: bf16[144,1], index: 14, kind: input, shape index: {}]   ;;  %s2704_s16 = inlined_call_operand.vmem [shape: f32[16,144], index: 16, kind: output, shape index: {0}]   ;;  %s2705_s2 = inlined_call_operand.vmem [shape: f32[2,16], index: 2, kind: input, shape index: {}]   ;;  %s2706_s17 = inlined_call_operand.vmem [shape: f32[2,1], index: 17, kind: output, shape index: {1}]  }
   0x1   :  { %2722 = sst [smem:[#allocation10_spill]] %s2689_s7  ;;  %v63_v9 = vld [vmem:[%s2691_s0 + $0x8] sm:$0xff]  ;;  %v65_v10 = vld [vmem:[%s2691_s0 + $0x18] sm:$0xff]  ;;  %v62_v21 = vld [vmem:[%s2691_s0] sm:$0xff]  ;;  %329 = vmatprep.mubr.bf16.mxu1 %v2710_v24  ;;  %vm446_vm4 = vcmask 261120   ;;  %vm1017_vm5 = vcmask 523264  }
   0x2   :  { %s2723_s26 = sld [smem:[#allocation10_spill]]  ;;  %v67_v11 = vpack.c.bf16 %v65_v10, %v63_v9  ;;  %v64_v22 = vld [vmem:[%s2691_s0 + $0x10] sm:$0xff]  ;;  %v1882_v27 = vld [vmem:[%s2695_s8 + $0x64] ss:$8 sps:$4 sm:$0xff]   ;;  %v1880_v28 = vld [vmem:[%s2695_s8 + $0x60] ss:$8 sps:$4 sm:$0xff]  }
   0x3   :  { %v66_v23 = vpack.c.bf16 %v64_v22, %v62_v21  ;;  %v1874_v25 = vld [vmem:[%s2695_s8 + $0x70] ss:$8 sps:$4 sm:$0xff]   ;;  %v1876_v26 = vld [vmem:[%s2695_s8 + $0x74] ss:$8 sps:$4 sm:$0xff]   ;;  %v1895_v31 = vld [vmem:[%s2695_s8 + $0x44] ss:$8 sps:$4 sm:$0xff]  }
   0x4   :  { %1694 = vmatprep.mubr.msk.bf16.mxu0 %vm176_vm0, %v67_v11  ;;  %v1889_v29 = vld [vmem:[%s2695_s8 + $0x54] ss:$8 sps:$4 sm:$0xff]   ;;  %v1887_v30 = vld [vmem:[%s2695_s8 + $0x50] ss:$8 sps:$4 sm:$0xff]   ;;  %v1893_v32 = vld [vmem:[%s2695_s8 + $0x40] ss:$8 sps:$4 sm:$0xff]  }
   0x5   :  { %v1902_v33 = vld [vmem:[%s2695_s8 + $0x34] ss:$8 sps:$4 sm:$0xff]   ;;  %v1900_v34 = vld [vmem:[%s2695_s8 + $0x30] ss:$8 sps:$4 sm:$0xff]   ;;  %v1908_v35 = vld [vmem:[%s2695_s8 + $0x24] ss:$8 sps:$4 sm:$0xff]  }
   0x6   :  { %v1906_v36 = vld [vmem:[%s2695_s8 + $0x20] ss:$8 sps:$4 sm:$0xff]   ;;  %v1915_v37 = vld [vmem:[%s2695_s8 + $0x14] ss:$8 sps:$4 sm:$0xff]   ;;  %v1913_v38 = vld [vmem:[%s2695_s8 + $0x10] ss:$8 sps:$4 sm:$0xff]  }
   0x7   :  { %vm237_vm3 = vmor %vm236_vm2, %vm235_vm1  ;;  %v1869_v45 = vld [vmem:[%s2693_s10 + $0x14] ss:$8 sps:$4 sm:$0xff]   ;;  %v1863_v48 = vld [vmem:[%s2692_s3] sm:$0xff]   ;;  %vm1416_vm6 = vcmask 1041408   ;;  %vm1412_vm7 = vcmask 31744   ;;  %vm1998_vm8 = vmmov 0  }
   0x8   :  { %v1833_v0 = vld [vmem:[%s2723_s26 + $0x74] ss:$8 sps:$4 sm:$0xff]   ;;  %v1835_v1 = vld [vmem:[%s2723_s26 + $0x70] ss:$8 sps:$4 sm:$0xff]   ;;  %v1836_v2 = vld [vmem:[%s2723_s26 + $0x64] ss:$8 sps:$4 sm:$0xff]  }
   0x9   :  { %180 = vmatprep.subr.bf16.mxu0 %v1833_v0  ;;  %v1838_v3 = vld [vmem:[%s2723_s26 + $0x60] ss:$8 sps:$4 sm:$0xff]   ;;  %v1839_v4 = vld [vmem:[%s2723_s26 + $0x54] ss:$8 sps:$4 sm:$0xff]   ;;  %v1841_v5 = vld [vmem:[%s2723_s26 + $0x50] ss:$8 sps:$4 sm:$0xff]  }
   0xa   :  { %181 = vmatpush1.bf16.msra.mxu0 %v1835_v1  ;;  %v1842_v6 = vld [vmem:[%s2723_s26 + $0x44] ss:$8 sps:$4 sm:$0xff]   ;;  %v1844_v7 = vld [vmem:[%s2723_s26 + $0x40] ss:$8 sps:$4 sm:$0xff]   ;;  %v1845_v8 = vld [vmem:[%s2723_s26 + $0x34] ss:$8 sps:$4 sm:$0xff]  }
   0xb   :  { %182 = vmatprep.subr.bf16.mxu0 %v1836_v2  ;;  %v1847_v12 = vld [vmem:[%s2723_s26 + $0x30] ss:$8 sps:$4 sm:$0xff]   ;;  %v1848_v13 = vld [vmem:[%s2723_s26 + $0x24] ss:$8 sps:$4 sm:$0xff]   ;;  %v1850_v14 = vld [vmem:[%s2723_s26 + $0x20] ss:$8 sps:$4 sm:$0xff]  }
   0xc   :  { %v1851_v15 = vld [vmem:[%s2723_s26 + $0x14] ss:$8 sps:$4 sm:$0xff]   ;;  %v1853_v16 = vld [vmem:[%s2723_s26 + $0x10] ss:$8 sps:$4 sm:$0xff]   ;;  %v1854_v17 = vld [vmem:[%s2723_s26 + $0x4] ss:$8 sps:$4 sm:$0xff]  }
   0xd   :  { %v1856_v18 = vld [vmem:[%s2723_s26] ss:$8 sps:$4 sm:$0xff]   ;;  %v1857_v19 = vld [vmem:[%s2723_s26 + $0x84] ss:$8 sps:$4 sm:$0xff]   ;;  %v1867_v49 = vld [vmem:[%s2693_s10 + $0x10] ss:$8 sps:$4 sm:$0xff]  }
   0xe   :  { %183 = vmatpush1.bf16.msra.mxu0 %v1838_v3  ;;  %v1859_v20 = vld [vmem:[%s2723_s26 + $0x80] ss:$8 sps:$4 sm:$0xff]   ;;  %v1872_v50 = vld [vmem:[%s2693_s10 + $0x4] ss:$8 sps:$4 sm:$0xff]   ;;  %v1879_v52 = vld [vmem:[%s2696_s9 + $0x74] ss:$8 sps:$4 sm:$0xff]  }
   0xf   :  { %184 = vmatprep.subr.bf16.mxu0 %v1839_v4  ;;  %v1870_v51 = vld [vmem:[%s2693_s10] ss:$8 sps:$4 sm:$0xff]   ;;  %v1865_v54 = vld [vmem:[%s2692_s3 + $0x10] sm:$0xff]   ;;  %v1866_v55 = vld [vmem:[%s2692_s3 + $0x18] sm:$0xff]   ;;  %vm1666_vm9 = vcmask 1024  }
  0x10   :  { %v1864_v53 = vld [vmem:[%s2692_s3 + $0x8] sm:$0xff]   ;;  %v1873_v56 = vld [vmem:[%s2694_s6] sm:$0xff]   ;;  %v1877_v57 = vld [vmem:[%s2696_s9 + $0x70] ss:$8 sps:$4 sm:$0xff]  }
  0x11   :  { %v1885_v58 = vld [vmem:[%s2696_s9 + $0x64] ss:$8 sps:$4 sm:$0xff]   ;;  %v1883_v59 = vld [vmem:[%s2696_s9 + $0x60] ss:$8 sps:$4 sm:$0xff]   ;;  %v1892_v60 = vld [vmem:[%s2696_s9 + $0x54] ss:$8 sps:$4 sm:$0xff]  }
  0x12   :  { %185 = vmatpush1.bf16.msra.mxu0 %v1841_v5  ;;  %v1886_v61 = vld [vmem:[%s2694_s6 + $0x8] sm:$0xff]   ;;  %v1890_v62 = vld [vmem:[%s2696_s9 + $0x50] ss:$8 sps:$4 sm:$0xff]   ;;  %v1905_v1 = vld [vmem:[%s2696_s9 + $0x34] ss:$8 sps:$4 sm:$0xff]  }
  0x13   :  { %186 = vmatprep.subr.bf16.mxu0 %v1842_v6  ;;  %v1898_v63 = vld [vmem:[%s2696_s9 + $0x44] ss:$8 sps:$4 sm:$0xff]   ;;  %v1896_v0 = vld [vmem:[%s2696_s9 + $0x40] ss:$8 sps:$4 sm:$0xff]   ;;  %v1899_v2 = vld [vmem:[%s2694_s6 + $0x10] sm:$0xff]  }
  0x14   :  { %v1903_v3 = vld [vmem:[%s2696_s9 + $0x30] ss:$8 sps:$4 sm:$0xff]   ;;  %v1911_v4 = vld [vmem:[%s2696_s9 + $0x24] ss:$8 sps:$4 sm:$0xff]   ;;  %v1909_v5 = vld [vmem:[%s2696_s9 + $0x20] ss:$8 sps:$4 sm:$0xff]  }
  0x15   :  { %v1912_v6 = vld [vmem:[%s2694_s6 + $0x18] sm:$0xff]   ;;  %v1921_v9 = vld [vmem:[%s2695_s8 + $0x4] ss:$8 sps:$4 sm:$0xff]   ;;  %v1919_v10 = vld [vmem:[%s2695_s8] ss:$8 sps:$4 sm:$0xff]  }
  0x16   :  { %187 = vmatpush1.bf16.msra.mxu0 %v1844_v7  ;;  %v1918_v7 = vld [vmem:[%s2696_s9 + $0x14] ss:$8 sps:$4 sm:$0xff]   ;;  %v1924_v11 = vld [vmem:[%s2696_s9 + $0x4] ss:$8 sps:$4 sm:$0xff]  }
  0x17   :  { %188 = vmatprep.subr.bf16.mxu0 %v1845_v8  ;;  %v1916_v8 = vld [vmem:[%s2696_s9 + $0x10] ss:$8 sps:$4 sm:$0xff]  }
  0x1a   :  { %189 = vmatpush1.bf16.msra.mxu0 %v1847_v12  ;;  %v1922_v12 = vld [vmem:[%s2696_s9] ss:$8 sps:$4 sm:$0xff]  }
  0x1b   :  { %190 = vmatprep.subr.bf16.mxu0 %v1848_v13  ;;  %v1927_v13 = vld [vmem:[%s2695_s8 + $0x84] ss:$8 sps:$4 sm:$0xff]  }
  0x1e   :  { %191 = vmatpush1.bf16.msra.mxu0 %v1850_v14  ;;  %v1925_v14 = vld [vmem:[%s2695_s8 + $0x80] ss:$8 sps:$4 sm:$0xff]  }
  0x1f   :  { %192 = vmatprep.subr.bf16.mxu0 %v1851_v15  ;;  %v1930_v15 = vld [vmem:[%s2696_s9 + $0x84] ss:$8 sps:$4 sm:$0xff]  }
  0x22   :  { %193 = vmatpush1.bf16.msra.mxu0 %v1853_v16  ;;  %v1928_v16 = vld [vmem:[%s2696_s9 + $0x80] ss:$8 sps:$4 sm:$0xff]  }
  0x23   :  { %194 = vmatprep.subr.bf16.mxu0 %v1854_v17  ;;  %v2319_v17 = vld [vmem:[%s2697_s5 + $0x8] sm:$0xff] }
  0x24   :  { %v2713_v21 = vunpack.c.l.bf16 %v2319_v17 }
  0x26   :  { %195 = vmatpush1.bf16.msra.mxu0 %v1856_v18 }
  0x27   :  { %210 = vmatprep.subr.bf16.mxu0 %v1857_v19  ;;  %v2324_v19 = vld [vmem:[%s2697_s5] sm:$0xff] }
  0x28   :  { %v2714_v22 = vunpack.c.h.bf16 %v2324_v19 }
  0x2a   :  { %211 = vmatpush2.bf16.msra.mxu0 %v1859_v20 }
  0x2b   :  { %660 = vmatprep.subr.bf16.mxu0 %v1876_v26 }
  0x2d   :  { %213 = vmatmul.mubr.bf16.vlgmr.msra.gmra.mxu0 %v66_v23  ;;  %v2717_v23 = vunpack.c.h.bf16 %v2319_v17 }
  0x2e   :  { %661 = vmatpush1.bf16.msra.mxu0 %v1874_v25  ;;  %v2712_v25 = vunpack.c.l.bf16 %v2324_v19 }
  0x2f   :  { %662 = vmatprep.subr.bf16.mxu0 %v1882_v27 }
  0x32   :  { %663 = vmatpush1.bf16.msra.mxu0 %v1880_v28 }
  0x33   :  { %664 = vmatprep.subr.bf16.mxu0 %v1889_v29 }
  0x36   :  { %665 = vmatpush1.bf16.msra.mxu0 %v1887_v30 }
  0x37   :  { %666 = vmatprep.subr.bf16.mxu0 %v1895_v31 }
  0x3a   :  { %667 = vmatpush1.bf16.msra.mxu0 %v1893_v32  ;;  %v2339_v32 = vld [vmem:[%s2697_s5 + $0x18] sm:$0xff] }
  0x3b   :  { %668 = vmatprep.subr.bf16.mxu0 %v1902_v33 }
  0x3e   :  { %669 = vmatpush1.bf16.msra.mxu0 %v1900_v34 }
  0x3f   :  { %670 = vmatprep.subr.bf16.mxu0 %v1908_v35 }
  0x42   :  { %671 = vmatpush1.bf16.msra.mxu0 %v1906_v36 }
  0x43   :  { %672 = vmatprep.subr.bf16.mxu0 %v1915_v37  ;;  %v2346_v37 = vld [vmem:[%s2697_s5 + $0x10] sm:$0xff] }
  0x46   :  { %673 = vmatpush1.bf16.msra.mxu0 %v1913_v38 }
  0x47   :  { %674 = vmatprep.subr.bf16.mxu0 %v1921_v9  ;;  %v2394_v9 = vld [vmem:[%s2697_s5 + $0x30] sm:$0xff] }
  0x4a   :  { %675 = vmatpush1.bf16.msra.mxu0 %v1919_v10 }
  0x4b   :  { %690 = vmatprep.subr.bf16.mxu0 %v1927_v13  ;;  %v391_v13 = vunpack.c.h.bf16 %v2394_v9 }
  0x4e   :  { %691 = vmatpush2.bf16.msra.mxu0 %v1925_v14 }
  0xed   :  { %v214_v39 = vpop.f32.mrf.mxu0 }
  0xef   :  { %v216_v40 = vpop.f32.mrf.mxu0 }
  0xf0   :  { %v1818_v41 = vpack.c.bf16 %v216_v40, %v214_v39  ;;  %v2716_v40 = vunpack.c.l.bf16 %v2339_v32 }
  0xf1   :  { %v218_v42 = vpop.f32.mrf.mxu0 }
  0xf2   :  { %238 = vst.msk [vmem:[#allocation2] sm:$0xff] %vm237_vm3, %v1818_v41  ;;  %v2718_v41 = vunpack.c.h.bf16 %v2346_v37 }
  0xf3   :  { %v220_v43 = vpop.f32.mrf.mxu0 }
  0xf4   :  { %v1819_v44 = vpack.c.bf16 %v220_v43, %v218_v42  ;;  %v385_v42 = vunpack.c.h.bf16 %v2339_v32  ;;  %v2715_v43 = vunpack.c.l.bf16 %v2346_v37 }
  0xf6   :  { %239 = vst.msk [vmem:[#allocation2 + $0x8] sm:$0xff] %vm237_vm3, %v1819_v44 }
  0xfd   :  { %v1860_v46 = vld [vmem:[#allocation2 + $0x4] ss:$8 sps:$4 sm:$0xff]   ;;  %v1862_v47 = vld [vmem:[#allocation2] ss:$8 sps:$4 sm:$0xff]  }
  0xfe   :  { %311 = vmatprep.subr.bf16.mxu1 %v1860_v46 }
  0xff   :  { %312 = vmatpush1.bf16.msra.mxu1 %v1862_v47 }
 0x100   :  { %471 = vmatprep.subr.bf16.mxu1 %v1869_v45 }
 0x102   :  { %1703 = vmatmul.mubr.msk.bf16.vlgmr.msra.gmra.mxu1 %vm176_vm0, %v1863_v48 }
 0x103   :  { %339 = vmatprep.mubr.bf16.mxu1 %v2710_v24  ;;  %472 = vmatpush1.bf16.msra.mxu1 %v1867_v49 }
 0x104   :  { %473 = vmatprep.subr.bf16.mxu1 %v1872_v50  ;;  %v2363_v50 = vld [vmem:[%s2697_s5 + $0x28] sm:$0xff] }
 0x107   :  { %474 = vmatpush1.bf16.msra.mxu1 %v1870_v51 }
 0x108   :  { %877 = vmatprep.subr.bf16.mxu1 %v1879_v52 }
 0x10a   :  { %1704 = vmatmul.mubr.msk.bf16.gmra.mxu1 %vm176_vm0, %v1864_v53 }
 0x10b   :  { %349 = vmatprep.mubr.bf16.mxu1 %v2710_v24 }
 0x112   :  { %1705 = vmatmul.mubr.msk.bf16.gmra.mxu1 %vm176_vm0, %v1865_v54 }
 0x113   :  { %359 = vmatprep.mubr.bf16.mxu1 %v2710_v24 }
 0x11a   :  { %1706 = vmatmul.mubr.msk.bf16.gmra.mxu1 %vm176_vm0, %v1866_v55  ;;  %v2370_v55 = vld [vmem:[%s2697_s5 + $0x20] sm:$0xff] }
 0x11b   :  { %491 = vmatprep.mubr.bf16.mxu1 %v2710_v24 }
 0x122   :  { %1715 = vmatmul.mubr.msk.bf16.vlgmr.msra.gmra.mxu1 %vm446_vm4, %v1873_v56 }
 0x123   :  { %878 = vmatpush1.bf16.msra.mxu1 %v1877_v57  ;;  %501 = vmatprep.mubr.bf16.mxu1 %v2710_v24 }
 0x124   :  { %879 = vmatprep.subr.bf16.mxu1 %v1885_v58  ;;  %v2721_v58 = vunpack.c.l.bf16 %v2363_v50 }
 0x127   :  { %880 = vmatpush1.bf16.msra.mxu1 %v1883_v59  ;;  %v387_v59 = vunpack.c.h.bf16 %v2370_v55 }
 0x128   :  { %881 = vmatprep.subr.bf16.mxu1 %v1892_v60  ;;  %v389_v60 = vunpack.c.h.bf16 %v2363_v50 }
 0x12a   :  { %1716 = vmatmul.mubr.msk.bf16.gmra.mxu1 %vm446_vm4, %v1886_v61  ;;  %v2719_v61 = vunpack.c.l.bf16 %v2370_v55 }
 0x12b   :  { %882 = vmatpush1.bf16.msra.mxu1 %v1890_v62  ;;  %511 = vmatprep.mubr.bf16.mxu1 %v2710_v24 }
 0x12c   :  { %883 = vmatprep.subr.bf16.mxu1 %v1898_v63 }
 0x12f   :  { %884 = vmatpush1.bf16.msra.mxu1 %v1896_v0 }
 0x130   :  { %885 = vmatprep.subr.bf16.mxu1 %v1905_v1 }
 0x132   :  { %1717 = vmatmul.mubr.msk.bf16.gmra.mxu1 %vm446_vm4, %v1899_v2 }
 0x133   :  { %886 = vmatpush1.bf16.msra.mxu1 %v1903_v3  ;;  %521 = vmatprep.mubr.bf16.mxu1 %v2710_v24 }
 0x134   :  { %887 = vmatprep.subr.bf16.mxu1 %v1911_v4  ;;  %v2387_v4 = vld [vmem:[%s2697_s5 + $0x38] sm:$0xff] }
 0x135   :  { %v2720_v14 = vunpack.c.h.bf16 %v2387_v4 }
 0x137   :  { %888 = vmatpush1.bf16.msra.mxu1 %v1909_v5 }
 0x138   :  { %889 = vmatprep.subr.bf16.mxu1 %v1918_v7 }
 0x13a   :  { %1718 = vmatmul.mubr.msk.bf16.gmra.mxu1 %vm446_vm4, %v1912_v6 }
 0x13b   :  { %890 = vmatpush1.bf16.msra.mxu1 %v1916_v8 }
 0x13c   :  { %891 = vmatprep.subr.bf16.mxu1 %v1924_v11 }
 0x13f   :  { %892 = vmatpush1.bf16.msra.mxu1 %v1922_v12  ;;  %v392_v12 = vunpack.c.l.bf16 %v2387_v4 }
 0x140   :  { %907 = vmatprep.subr.bf16.mxu1 %v1930_v15  ;;  %v390_v15 = vunpack.c.l.bf16 %v2394_v9 }
 0x143   :  { %908 = vmatpush2.bf16.msra.mxu1 %v1928_v16 }
 0x1c2   :  { %v331_v18 = vpop.f32.mrf.mxu1 }
 0x1c3   :  { %v733_v33 = vmul.f32 %v2712_v25, %v331_v18 }
 0x1c4   :  { %v333_v20 = vpop.f32.mrf.mxu1 }
 0x1c5   :  { %v734_v29 = vmul.f32 %v2714_v22, %v333_v20 }
 0x1c6   :  { %v335_v26 = vpop.f32.mrf.mxu1 }
 0x1c7   :  { %v735_v27 = vmul.f32 %v2713_v21, %v335_v26  ;;  %v532_v34 = vpack.c.bf16 %v335_v26, %v331_v18 }
 0x1c8   :  { %v337_v28 = vpop.f32.mrf.mxu1 }
 0x1c9   :  { %v533_v30 = vpack.c.bf16 %v337_v28, %v333_v20  ;;  %v736_v31 = vmul.f32 %v2717_v23, %v337_v28  ;;  %v749_v38 = vpack.c.bf16 %v735_v27, %v733_v33 }
 0x1ca   :  { %v341_v35 = vpop.f32.mrf.mxu1 }
 0x1cb   :  { %v750_v36 = vpack.c.bf16 %v736_v31, %v734_v29  ;;  %1737 = vmatprep.mubr.msk.bf16.mxu0 %vm176_vm0, %v533_v30  ;;  %v737_v51 = vmul.f32 %v2715_v43, %v341_v35 }
 0x1cc   :  { %v343_v39 = vpop.f32.mrf.mxu1  ;;  %693 = vmatmul.mubr.bf16.vlgmr.msra.gmra.mxu0 %v532_v34  ;;  %v1932_v34 = vld [vmem:[%s2699_s12 + $0x70] ss:$8 sps:$4 sm:$0xff]  }
 0x1cd   :  { %1759 = vmatprep.mubr.msk.bf16.mxu1 %vm176_vm0, %v750_v36  ;;  %v738_v47 = vmul.f32 %v2718_v41, %v343_v39  ;;  %v1937_v36 = vld [vmem:[%s2699_s12 + $0x64] ss:$8 sps:$4 sm:$0xff]  }
 0x1ce   :  { %v345_v44 = vpop.f32.mrf.mxu1  ;;  %910 = vmatmul.mubr.bf16.vlgmr.msra.gmra.mxu1 %v749_v38  ;;  %v1935_v38 = vld [vmem:[%s2699_s12 + $0x60] ss:$8 sps:$4 sm:$0xff]  }
 0x1cf   :  { %v739_v45 = vmul.f32 %v2716_v40, %v345_v44  ;;  %v534_v52 = vpack.c.bf16 %v345_v44, %v341_v35  ;;  %v1934_v35 = vld [vmem:[%s2699_s12 + $0x74] ss:$8 sps:$4 sm:$0xff]   ;;  %v1941_v44 = vld [vmem:[%s2699_s12 + $0x50] ss:$8 sps:$4 sm:$0xff]  }
 0x1d0   :  { %v347_v46 = vpop.f32.mrf.mxu1  ;;  %1216 = vmatprep.subr.bf16.mxu1 %v1934_v35 }
 0x1d1   :  { %v535_v48 = vpack.c.bf16 %v347_v46, %v343_v39  ;;  %v740_v49 = vmul.f32 %v385_v42, %v347_v46  ;;  %v751_v56 = vpack.c.bf16 %v739_v45, %v737_v51  ;;  %1217 = vmatpush1.bf16.msra.mxu1 %v1932_v34  ;;  %v1943_v39 = vld [vmem:[%s2699_s12 + $0x54] ss:$8 sps:$4 sm:$0xff]   ;;  %v1949_v45 = vld [vmem:[%s2699_s12 + $0x44] ss:$8 sps:$4 sm:$0xff]   ;;  %v1947_v46 = vld [vmem:[%s2699_s12 + $0x40] ss:$8 sps:$4 sm:$0xff]  }
 0x1d2   :  { %v351_v53 = vpop.f32.mrf.mxu1  ;;  %1218 = vmatprep.subr.bf16.mxu1 %v1937_v36  ;;  %v1953_v51 = vld [vmem:[%s2699_s12 + $0x30] ss:$8 sps:$4 sm:$0xff]  }
 0x1d3   :  { %v752_v54 = vpack.c.bf16 %v740_v49, %v738_v47  ;;  %1738 = vmatprep.mubr.msk.bf16.mxu0 %vm176_vm0, %v535_v48  ;;  %v741_v5 = vmul.f32 %v2719_v61, %v351_v53  ;;  %v1955_v47 = vld [vmem:[%s2699_s12 + $0x34] ss:$8 sps:$4 sm:$0xff]   ;;  %v2708_v48 = vmov 0.0  }
 0x1d4   :  { %v353_v57 = vpop.f32.mrf.mxu1  ;;  %703 = vmatmul.mubr.bf16.gmra.mxu0 %v534_v52  ;;  %241 = vst.msk [vmem:[#allocation3 + $0x8] sm:$0xff] %vm176_vm0, %v2708_v48  ;;  %243 = vst.msk [vmem:[#allocation3 + $0x18] sm:$0xff] %vm176_vm0, %v2708_v48  ;;  %v1961_v52 = vld [vmem:[%s2699_s12 + $0x24] ss:$8 sps:$4 sm:$0xff]  }
 0x1d5   :  { %1760 = vmatprep.mubr.msk.bf16.mxu1 %vm176_vm0, %v752_v54  ;;  %v742_v1 = vmul.f32 %v387_v59, %v353_v57  ;;  %1219 = vmatpush1.bf16.msra.mxu1 %v1935_v38  ;;  %v1959_v54 = vld [vmem:[%s2699_s12 + $0x20] ss:$8 sps:$4 sm:$0xff]  }
 0x1d6   :  { %v355_v62 = vpop.f32.mrf.mxu1  ;;  %920 = vmatmul.mubr.bf16.gmra.mxu1 %v751_v56  ;;  %1220 = vmatprep.subr.bf16.mxu1 %v1943_v39 }
 0x1d7   :  { %v743_v63 = vmul.f32 %v2721_v58, %v355_v62  ;;  %v536_v6 = vpack.c.bf16 %v355_v62, %v351_v53 }
 0x1d8   :  { %v357_v0 = vpop.f32.mrf.mxu1 }
 0x1d9   :  { %v537_v2 = vpack.c.bf16 %v357_v0, %v353_v57  ;;  %v744_v3 = vmul.f32 %v389_v60, %v357_v0  ;;  %v753_v10 = vpack.c.bf16 %v743_v63, %v741_v5  ;;  %1221 = vmatpush1.bf16.msra.mxu1 %v1941_v44 }
 0x1da   :  { %v361_v7 = vpop.f32.mrf.mxu1  ;;  %1222 = vmatprep.subr.bf16.mxu1 %v1949_v45 }
 0x1db   :  { %v754_v8 = vpack.c.bf16 %v744_v3, %v742_v1  ;;  %1739 = vmatprep.mubr.msk.bf16.mxu0 %vm176_vm0, %v537_v2  ;;  %v745_v29 = vmul.f32 %v390_v15, %v361_v7 }
 0x1dc   :  { %v363_v11 = vpop.f32.mrf.mxu1  ;;  %713 = vmatmul.mubr.bf16.gmra.mxu0 %v536_v6 }
 0x1dd   :  { %1761 = vmatprep.mubr.msk.bf16.mxu1 %vm176_vm0, %v754_v8  ;;  %v746_v26 = vmul.f32 %v391_v13, %v363_v11  ;;  %1223 = vmatpush1.bf16.msra.mxu1 %v1947_v46 }
 0x1de   :  { %v365_v16 = vpop.f32.mrf.mxu1  ;;  %930 = vmatmul.mubr.bf16.gmra.mxu1 %v753_v10  ;;  %1224 = vmatprep.subr.bf16.mxu1 %v1955_v47 }
 0x1df   :  { %v747_v18 = vmul.f32 %v392_v12, %v365_v16  ;;  %v538_v30 = vpack.c.bf16 %v365_v16, %v361_v7 }
 0x1e0   :  { %v367_v20 = vpop.f32.mrf.mxu1 }
 0x1e1   :  { %v539_v27 = vpack.c.bf16 %v367_v20, %v363_v11  ;;  %v748_v28 = vmul.f32 %v2720_v14, %v367_v20  ;;  %v755_v33 = vpack.c.bf16 %v747_v18, %v745_v29  ;;  %1225 = vmatpush1.bf16.msra.mxu1 %v1953_v51 }
 0x1e2   :  { %v2444_v49 = vpop.f32.mrf.mxu1  ;;  %1226 = vmatprep.subr.bf16.mxu1 %v1961_v52 }
 0x1e3   :  { %v756_v31 = vpack.c.bf16 %v748_v28, %v746_v26  ;;  %1740 = vmatprep.mubr.msk.bf16.mxu0 %vm176_vm0, %v539_v27  ;;  %2724 = vst [vmem:[#allocation5_spill] sm:$0xff] %v2444_v49 }
 0x1e4   :  { %723 = vmatmul.mubr.bf16.gmra.mxu0 %v538_v30  ;;  %v2452_v53 = vpop.f32.mrf.mxu1 }
 0x1e5   :  { %1762 = vmatprep.mubr.msk.bf16.mxu1 %vm176_vm0, %v756_v31  ;;  %1053 = vmatprep.mubr.bf16.mxu0 %v2710_v24  ;;  %2725 = vst [vmem:[#allocation6_spill] sm:$0xff] %v2452_v53 }
 0x1e6   :  { %940 = vmatmul.mubr.bf16.gmra.mxu1 %v755_v33  ;;  %v2457_v56 = vpop.f32.mrf.mxu1 }
 0x1e7   :  { %2726 = vst [vmem:[#allocation7_spill] sm:$0xff] %v2457_v56  ;;  %1227 = vmatpush1.bf16.msra.mxu1 %v1959_v54  ;;  %v2729_v56 = vunpack.c.l.bf16 %v2363_v50  ;;  %v2733_v50 = vunpack.c.h.bf16 %v2319_v17 }
 0x1e8   :  { %v2459_v57 = vpop.f32.mrf.mxu1 }
 0x1ea   :  { %v2461_v62 = vpop.f32.mrf.mxu1 }
 0x1eb   :  { %2727 = vst [vmem:[#allocation8_spill] sm:$0xff] %v2461_v62  ;;  %v2731_v62 = vunpack.c.l.bf16 %v2370_v55 }
 0x1ec   :  { %v2463_v63 = vpop.f32.mrf.mxu1 }
 0x1ee   :  { %v2465_v0 = vpop.f32.mrf.mxu1 }
 0x1f0   :  { %v2467_v1 = vpop.f32.mrf.mxu1 }
 0x1f2   :  { %v2469_v2 = vpop.f32.mrf.mxu1 }
 0x1f4   :  { %v2471_v3 = vpop.f32.mrf.mxu1 }
 0x1f6   :  { %v2473_v5 = vpop.f32.mrf.mxu1 }
 0x1f8   :  { %v519_v6 = vpop.f32.mrf.mxu1 }
 0x1fa   :  { %v523_v7 = vpop.f32.mrf.mxu1 }
 0x1fc   :  { %v525_v8 = vpop.f32.mrf.mxu1 }
 0x1fe   :  { %v527_v10 = vpop.f32.mrf.mxu1 }
 0x200   :  { %v529_v11 = vpop.f32.mrf.mxu1 }
 0x28c   :  { %v2475_v16 = vpop.f32.mrf.mxu0 }
 0x28e   :  { %v696_v18 = vpop.f32.mrf.mxu0  ;;  %v2477_v20 = vpop.f32.mrf.mxu1 }
 0x28f   :  { %2728 = vst [vmem:[#allocation9_spill] sm:$0xff] %v2477_v20 }
 0x290   :  { %v698_v26 = vpop.f32.mrf.mxu0  ;;  %v2479_v27 = vpop.f32.mrf.mxu1 }
 0x292   :  { %v700_v28 = vpop.f32.mrf.mxu0  ;;  %v2481_v29 = vpop.f32.mrf.mxu1 }
 0x294   :  { %v704_v30 = vpop.f32.mrf.mxu0  ;;  %v917_v31 = vpop.f32.mrf.mxu1 }
 0x296   :  { %v706_v33 = vpop.f32.mrf.mxu0  ;;  %v921_v34 = vpop.f32.mrf.mxu1 }
 0x298   :  { %v708_v35 = vpop.f32.mrf.mxu0  ;;  %v923_v36 = vpop.f32.mrf.mxu1 }
 0x29a   :  { %v710_v38 = vpop.f32.mrf.mxu0  ;;  %v925_v39 = vpop.f32.mrf.mxu1 }
 0x29b   :  { %v957_v49 = vmul.f32 %v710_v38, %v385_v42 }
 0x29c   :  { %v714_v44 = vpop.f32.mrf.mxu0  ;;  %v927_v45 = vpop.f32.mrf.mxu1 }
 0x29e   :  { %v716_v46 = vpop.f32.mrf.mxu0  ;;  %v931_v47 = vpop.f32.mrf.mxu1 }
 0x29f   :  { %v959_v14 = vmul.f32 %v716_v46, %v387_v59  ;;  %v958_v59 = vmul.f32 %v714_v44, %v2731_v62 }
 0x2a0   :  { %v718_v51 = vpop.f32.mrf.mxu0  ;;  %v933_v52 = vpop.f32.mrf.mxu1 }
 0x2a1   :  { %v975_v42 = vadd.f32 %v959_v14, %v933_v52  ;;  %v974_v62 = vadd.f32 %v958_v59, %v931_v47  ;;  %v2736_v14 = vunpack.c.h.bf16 %v2324_v19  ;;  %v1958_v59 = vld [vmem:[%s2700_s11 + $0x44] ss:$8 sps:$4 sm:$0xff]  }
 0x2a2   :  { %v720_v54 = vpop.f32.mrf.mxu0  ;;  %v935_v48 = vpop.f32.mrf.mxu1 }
 0x2a3   :  { %v961_v43 = vmul.f32 %v720_v54, %v389_v60  ;;  %v960_v60 = vmul.f32 %v718_v51, %v2729_v56  ;;  %v953_v56 = vmul.f32 %v700_v28, %v2733_v50  ;;  %v991_v28 = vmul.f32 %v975_v42, %v2471_v3  ;;  %v1964_v42 = vld [vmem:[%s2700_s11 + $0x34] ss:$8 sps:$4 sm:$0xff]   ;;  %v1962_v50 = vld [vmem:[%s2700_s11 + $0x30] ss:$8 sps:$4 sm:$0xff]  }
 0x2a4   :  { %v724_v24 = vpop.f32.mrf.mxu0  ;;  %v937_v25 = vpop.f32.mrf.mxu1  ;;  %v990_v3 = vmul.f32 %v974_v62, %v2469_v2  ;;  %v2741_v2 = vld [vmem:[#allocation6_spill] sm:$0xff] }
 0x2a5   :  { %v962_v23 = vmul.f32 %v724_v24, %v390_v15  ;;  %v2730_v24 = vunpack.c.h.bf16 %v2387_v4  ;;  %v973_v4 = vadd.f32 %v957_v49, %v927_v45 }
 0x2a6   :  { %v726_v21 = vpop.f32.mrf.mxu0  ;;  %v941_v22 = vpop.f32.mrf.mxu1 }
 0x2a7   :  { %v963_v40 = vmul.f32 %v726_v21, %v391_v13  ;;  %v977_v21 = vadd.f32 %v961_v43, %v937_v25  ;;  %v978_v46 = vadd.f32 %v962_v23, %v941_v22  ;;  %v2734_v25 = vunpack.c.l.bf16 %v2339_v32 }
 0x2a8   :  { %v728_v41 = vpop.f32.mrf.mxu0  ;;  %v943_v61 = vpop.f32.mrf.mxu1  ;;  %v976_v43 = vadd.f32 %v960_v60, %v935_v48  ;;  %v2735_v22 = vunpack.c.l.bf16 %v2346_v37  ;;  %v2737_v32 = vunpack.c.l.bf16 %v2319_v17  ;;  %v2743_v60 = vld [vmem:[#allocation5_spill] sm:$0xff] }
 0x2a9   :  { %v964_v58 = vmul.f32 %v728_v41, %v392_v12  ;;  %v979_v13 = vadd.f32 %v963_v40, %v943_v61  ;;  %v2732_v41 = vunpack.c.h.bf16 %v2346_v37  ;;  %v956_v40 = vmul.f32 %v708_v35, %v2734_v25  ;;  %v1970_v25 = vld [vmem:[%s2700_s11 + $0x24] ss:$8 sps:$4 sm:$0xff]  }
 0x2aa   :  { %v730_v54 = vpop.f32.mrf.mxu0  ;;  %v945_v53 = vpop.f32.mrf.mxu1  ;;  %v954_v23 = vmul.f32 %v704_v30, %v2735_v22  ;;  %v994_v44 = vmul.f32 %v978_v46, %v523_v7  ;;  %v952_v48 = vmul.f32 %v698_v26, %v2737_v32  ;;  %v992_v49 = vmul.f32 %v976_v43, %v2473_v5  ;;  %v1956_v46 = vld [vmem:[%s2700_s11 + $0x40] ss:$8 sps:$4 sm:$0xff]   ;;  %v1101_v22 = vld [vmem:[%s2691_s0 + $0x10] sm:$0xff] }
 0x2ab   :  { %v965_v9 = vmul.f32 %v730_v54, %v2730_v24  ;;  %v980_v15 = vadd.f32 %v964_v58, %v945_v53  ;;  %v955_v12 = vmul.f32 %v706_v33, %v2732_v41  ;;  %v993_v58 = vmul.f32 %v977_v21, %v519_v6  ;;  %v1931_v54 = vld [vmem:[%s2698_s4] sm:$0xff]   ;;  %v1938_v21 = vld [vmem:[%s2700_s11 + $0x70] ss:$8 sps:$4 sm:$0xff]   ;;  %v1967_v41 = vld [vmem:[%s2699_s12 + $0x14] ss:$8 sps:$4 sm:$0xff]  }
 0x2ac   :  { %v947_v20 = vpop.f32.mrf.mxu1  ;;  %v995_v53 = vmul.f32 %v979_v13, %v525_v8  ;;  %v969_v8 = vadd.f32 %v953_v56, %v917_v31  ;;  %v989_v37 = vmul.f32 %v973_v4, %v2467_v1  ;;  %v2738_v7 = vunpack.c.l.bf16 %v2324_v19  ;;  %v2739_v19 = vld [vmem:[#allocation9_spill] sm:$0xff]  ;;  %v1946_v13 = vld [vmem:[%s2700_s11 + $0x64] ss:$8 sps:$4 sm:$0xff]   ;;  %v1944_v24 = vld [vmem:[%s2700_s11 + $0x60] ss:$8 sps:$4 sm:$0xff]   ;;  %1228 = vmatprep.subr.bf16.mxu1 %v1967_v41 }
 0x2ad   :  { %v981_v38 = vadd.f32 %v965_v9, %v947_v20  ;;  %v996_v61 = vmul.f32 %v980_v15, %v527_v10  ;;  %v951_v20 = vmul.f32 %v696_v18, %v2736_v14  ;;  %v971_v33 = vadd.f32 %v955_v12, %v923_v36  ;;  %v1952_v9 = vld [vmem:[%s2700_s11 + $0x54] ss:$8 sps:$4 sm:$0xff]   ;;  %v1950_v15 = vld [vmem:[%s2700_s11 + $0x50] ss:$8 sps:$4 sm:$0xff]   ;;  %v1971_v56 = vld [vmem:[%s2699_s12] ss:$8 sps:$4 sm:$0xff]  }
 0x2ae   :  { %v972_v10 = vadd.f32 %v956_v40, %v925_v39  ;;  %v950_v18 = vmul.f32 %v2475_v16, %v2738_v7  ;;  %v970_v30 = vadd.f32 %v954_v23, %v921_v34  ;;  %v968_v5 = vadd.f32 %v952_v48, %v2481_v29  ;;  %v2740_v16 = vld [vmem:[#allocation8_spill] sm:$0xff]  ;;  %v1965_v12 = vld [vmem:[%s2699_s12 + $0x10] ss:$8 sps:$4 sm:$0xff]   ;;  %v1976_v23 = vld [vmem:[%s2700_s11 + $0x14] ss:$8 sps:$4 sm:$0xff]  }
 0x2af   :  { %v997_v55 = vmul.f32 %v981_v38, %v529_v11  ;;  %v1010_v6 = vpack.c.bf16 %v996_v61, %v994_v44  ;;  %v1009_v11 = vpack.c.bf16 %v993_v58, %v991_v28  ;;  %v967_v17 = vadd.f32 %v951_v20, %v2479_v27  ;;  %v2742_v27 = vld [vmem:[#allocation7_spill] sm:$0xff]  ;;  %1229 = vmatpush1.bf16.msra.mxu1 %v1965_v12  ;;  %v1100_v4 = vld [vmem:[%s2691_s0 + $0x8] sm:$0xff]  ;;  %v1102_v58 = vld [vmem:[%s2691_s0 + $0x18] sm:$0xff] }
 0x2b0   :  { %v987_v26 = vmul.f32 %v971_v33, %v2463_v63  ;;  %v988_v31 = vmul.f32 %v972_v10, %v2465_v0  ;;  %v1008_v1 = vpack.c.bf16 %v992_v49, %v990_v3  ;;  %v985_v35 = vmul.f32 %v969_v8, %v2459_v57  ;;  %v1940_v57 = vld [vmem:[%s2700_s11 + $0x74] ss:$8 sps:$4 sm:$0xff]   ;;  %v1973_v38 = vld [vmem:[%s2699_s12 + $0x4] ss:$8 sps:$4 sm:$0xff]   ;;  %v1968_v43 = vld [vmem:[%s2700_s11 + $0x20] ss:$8 sps:$4 sm:$0xff]  }
 0x2b1   :  { %v1011_v51 = vpack.c.bf16 %v997_v55, %v995_v53  ;;  %v966_v39 = vadd.f32 %v950_v18, %v2739_v19  ;;  %v986_v34 = vmul.f32 %v970_v30, %v2740_v16  ;;  %v983_v45 = vmul.f32 %v967_v17, %v2741_v2  ;;  %1230 = vmatprep.subr.bf16.mxu1 %v1973_v38  ;;  %v1979_v40 = vld [vmem:[%s2699_s12 + $0x84] ss:$8 sps:$4 sm:$0xff]   ;;  %v1977_v61 = vld [vmem:[%s2699_s12 + $0x80] ss:$8 sps:$4 sm:$0xff]   ;;  %v1974_v44 = vld [vmem:[%s2700_s11 + $0x10] ss:$8 sps:$4 sm:$0xff]  }
 0x2b2   :  { %v1007_v36 = vpack.c.bf16 %v989_v37, %v987_v26  ;;  %v984_v47 = vmul.f32 %v968_v5, %v2742_v27  ;;  %v1104_v53 = vpack.c.bf16 %v1102_v58, %v1100_v4  ;;  %v1099_v55 = vld [vmem:[%s2691_s0] sm:$0xff]  ;;  %v2744_v33 = vmov 0   ;;  %v1987_v8 = vld [vmem:[%s2703_s14 + $0x38] sm:$0xff]   ;;  %v1988_v37 = vld [vmem:[%s2703_s14 + $0x30] sm:$0xff]  }
 0x2b3   :  { %1029 = vmatprep.subr.bf16.mxu0 %v1011_v51  ;;  %v1006_v63 = vpack.c.bf16 %v988_v31, %v986_v34  ;;  %v1005_v52 = vpack.c.bf16 %v985_v35, %v983_v45  ;;  %v982_v29 = vmul.f32 %v966_v39, %v2743_v60  ;;  %1231 = vmatpush1.bf16.msra.mxu1 %v1971_v56  ;;  %v1980_v14 = vld [vmem:[%s2700_s11] ss:$8 sps:$4 sm:$0xff]   ;;  %v1982_v20 = vld [vmem:[%s2700_s11 + $0x4] ss:$8 sps:$4 sm:$0xff]   ;;  %v1991_v18 = vld [vmem:[%s2703_s14 + $0x18] sm:$0xff]  }
 0x2b4   :  { %1030 = vmatpush1.bf16.msra.mxu0 %v1010_v6  ;;  %1246 = vmatprep.subr.bf16.mxu1 %v1979_v40  ;;  %v1103_v62 = vpack.c.bf16 %v1101_v22, %v1099_v55  ;;  %v1985_v28 = vld [vmem:[%s2700_s11 + $0x84] ss:$8 sps:$4 sm:$0xff]   ;;  %v1804_v51 = vld.sshfl [vmem:[%s2701_s13] sm:$0x33 pattern:$0x76325410] }
 0x2b5   :  { %1031 = vmatprep.subr.bf16.mxu0 %v1009_v11  ;;  %v1004_v0 = vpack.c.bf16 %v984_v47, %v982_v29  ;;  %1783 = vmatprep.mubr.msk.bf16.mxu1 %vm176_vm0, %v1104_v53  ;;  %v1411_v32 = vcombine.high %v1804_v51, %v1804_v51  ;;  %v1418_v48 = vsel %vm1416_vm6, %v1804_v51, 0  ;;  %v1983_v10 = vld [vmem:[%s2700_s11 + $0x80] ss:$8 sps:$4 sm:$0xff]   ;;  %v2745_v6 = vmov 0.0   ;;  %v1992_v30 = vld [vmem:[%s2703_s14 + $0x10] sm:$0xff]   ;;  %v999_v17 = vld [vmem:[#allocation3 + $0x8] sm:$0xff] }
 0x2b6   :  { %v1986_v49 = vld [vmem:[%s2702_s1] sm:$0xff]   ;;  %v1989_v11 = vld [vmem:[%s2703_s14 + $0x28] sm:$0xff]  }
 0x2b7   :  { %1247 = vmatpush2.bf16.msra.mxu1 %v1977_v61  ;;  %v1990_v7 = vld [vmem:[%s2703_s14 + $0x20] sm:$0xff]   ;;  %v1993_v2 = vld [vmem:[%s2703_s14 + $0x8] sm:$0xff]  }
 0x2b8   :  { %1032 = vmatpush1.bf16.msra.mxu0 %v1008_v1  ;;  %1805 = vmatprep.subr.msk.bf16.mxu1 %vm1416_vm6, %v1411_v32  ;;  %v1001_v1 = vld [vmem:[#allocation3 + $0x18] sm:$0xff]  ;;  %v1994_v45 = vld [vmem:[%s2703_s14] sm:$0xff]  }
 0x2b9   :  { %1033 = vmatprep.subr.bf16.mxu0 %v1007_v36  ;;  %v1995_v27 = vld [vmem:[%s2703_s14 + $0x40] sm:$0xff]  }
 0x2ba   :  { %1249 = vmatmul.mubr.bf16.vlgmr.msra.gmra.mxu1 %v1103_v62  ;;  %v1592_v4 = vld [vmem:[%s2705_s2] sm:$0x3] }
 0x2bb   :  { %1455 = vmatprep.mubr.bf16.mxu1 %v2744_v33  ;;  %1438 = vmatpush1.bf16.msra.mxu1 %v1418_v48 }
 0x2bc   :  { %1034 = vmatpush1.bf16.msra.mxu0 %v1006_v63  ;;  %1551 = vmatprep.subr.bf16.mxu1 %v2744_v33 }
 0x2bd   :  { %1035 = vmatprep.subr.bf16.mxu0 %v1005_v52 }
 0x2c0   :  { %1036 = vmatpush1.bf16.msra.mxu0 %v1004_v0 }
 0x2c1   :  { %1352 = vmatprep.subr.bf16.mxu0 %v1940_v57 }
 0x2c2   :  { %1806 = vmatmul.mubr.msk.bf16.vlgmr.msra.gmra.mxu1 %vm1412_vm7, %v1986_v49 }
 0x2c3   :  { %1764 = vmatmul.mubr.msk.bf16.vlgmr.msra.gmra.mxu0 %vm1017_vm5, %v1931_v54  ;;  %1552 = vmatpush1.bf16.msra.mxu1 %v1987_v8 }
 0x2c4   :  { %1353 = vmatpush1.bf16.msra.mxu0 %v1938_v21  ;;  %1553 = vmatprep.subr.bf16.mxu1 %v2744_v33 }
 0x2c5   :  { %1354 = vmatprep.subr.bf16.mxu0 %v1946_v13 }
 0x2c7   :  { %1554 = vmatpush1.bf16.msra.mxu1 %v1988_v37 }
 0x2c8   :  { %1355 = vmatpush1.bf16.msra.mxu0 %v1944_v24  ;;  %1555 = vmatprep.subr.bf16.mxu1 %v2744_v33 }
 0x2c9   :  { %1356 = vmatprep.subr.bf16.mxu0 %v1952_v9 }
 0x2cb   :  { %1556 = vmatpush1.bf16.msra.mxu1 %v1989_v11 }
 0x2cc   :  { %1357 = vmatpush1.bf16.msra.mxu0 %v1950_v15  ;;  %1557 = vmatprep.subr.bf16.mxu1 %v2744_v33 }
 0x2cd   :  { %1358 = vmatprep.subr.bf16.mxu0 %v1958_v59 }
 0x2cf   :  { %1558 = vmatpush1.bf16.msra.mxu1 %v1990_v7 }
 0x2d0   :  { %1359 = vmatpush1.bf16.msra.mxu0 %v1956_v46  ;;  %1559 = vmatprep.subr.bf16.mxu1 %v2744_v33 }
 0x2d1   :  { %1360 = vmatprep.subr.bf16.mxu0 %v1964_v42 }
 0x2d3   :  { %1560 = vmatpush1.bf16.msra.mxu1 %v1991_v18 }
 0x2d4   :  { %1361 = vmatpush1.bf16.msra.mxu0 %v1962_v50  ;;  %1561 = vmatprep.subr.bf16.mxu1 %v2744_v33 }
 0x2d5   :  { %1362 = vmatprep.subr.bf16.mxu0 %v1970_v25 }
 0x2d7   :  { %1562 = vmatpush1.bf16.msra.mxu1 %v1992_v30 }
 0x2d8   :  { %1363 = vmatpush1.bf16.msra.mxu0 %v1968_v43  ;;  %1563 = vmatprep.subr.bf16.mxu1 %v2744_v33 }
 0x2d9   :  { %1364 = vmatprep.subr.bf16.mxu0 %v1976_v23 }
 0x2db   :  { %1564 = vmatpush1.bf16.msra.mxu1 %v1993_v2 }
 0x2dc   :  { %1365 = vmatpush1.bf16.msra.mxu0 %v1974_v44  ;;  %1565 = vmatprep.subr.bf16.mxu1 %v2744_v33 }
 0x2dd   :  { %1366 = vmatprep.subr.bf16.mxu0 %v1982_v20 }
 0x2df   :  { %1566 = vmatpush1.bf16.msra.mxu1 %v1994_v45 }
 0x2e0   :  { %1367 = vmatpush1.bf16.msra.mxu0 %v1980_v14  ;;  %1581 = vmatprep.subr.bf16.mxu1 %v2744_v33 }
 0x2e1   :  { %1382 = vmatprep.subr.bf16.mxu0 %v1985_v28 }
 0x2e3   :  { %1582 = vmatpush2.bf16.msra.mxu1 %v1995_v27 }
 0x2e4   :  { %1383 = vmatpush2.bf16.msra.mxu0 %v1983_v10 }
 0x2e5   :  { %1823 = vmatprep.subr.mxu0 %v2745_v6 }
 0x37a   :  { %v1250_v47 = vpop.f32.mrf.mxu1 }
 0x37c   :  { %v1252_v63 = vpop.f32.mrf.mxu1 }
 0x37e   :  { %v1254_v52 = vpop.f32.mrf.mxu1 }
 0x380   :  { %v1256_v60 = vpop.f32.mrf.mxu1 }
 0x382   :  { %v1457_v29 = vpop.f32.mrf.mxu1 }
 0x383   :  { %v1055_v3 = vpop.f32.mrf.mxu0 }
 0x384   :  { %v1459_v0 = vpop.f32.mrf.mxu1 }
 0x385   :  { %v1057_v26 = vpop.f32.mrf.mxu0 }
 0x386   :  { %v1065_v5 = vadd.f32 %v1057_v26, %v999_v17  ;;  %v1461_v15 = vpop.f32.mrf.mxu1 }
 0x387   :  { %v1059_v31 = vpop.f32.mrf.mxu0 }
 0x388   :  { %1069 = vst.msk [vmem:[#allocation3 + $0x8] sm:$0xff] %vm176_vm0, %v1065_v5  ;;  %v1079_v34 = vpack.c.bf16 %v1059_v31, %v1055_v3  ;;  %v1463_v38 = vpop.f32.mrf.mxu1 }
 0x389   :  { %v1061_v35 = vpop.f32.mrf.mxu0 }
 0x38a   :  { %v1067_v36 = vadd.f32 %v1061_v35, %v1001_v1 }
 0x38c   :  { %1071 = vst.msk [vmem:[#allocation3 + $0x18] sm:$0xff] %vm176_vm0, %v1067_v36 }
 0x38f   :  { %v1076_v19 = vld [vmem:[#allocation3 + $0x8] sm:$0xff] }
 0x393   :  { %v1078_v39 = vld [vmem:[#allocation3 + $0x18] sm:$0xff] }
 0x394   :  { %v1080_v16 = vpack.c.bf16 %v1078_v39, %v1076_v19 }
 0x396   :  { %1802 = vmatprep.mubr.msk.bf16.mxu0 %vm176_vm0, %v1080_v16 }
 0x397   :  { %1385 = vmatmul.mubr.bf16.vlgmr.msra.gmra.mxu0 %v1079_v34 }
 0x398   :  { %1827 = vmatprep.mubr.msk.f32.mxu0 %vm1998_vm8, %v2745_v6 }
 0x457   :  { %v1386_v57 = vpop.f32.mrf.mxu0 }
 0x458   :  { %v1387_v54 = vadd.f32 %v1386_v57, %v1250_v47 }
 0x459   :  { %v1388_v21 = vpop.f32.mrf.mxu0 }
 0x45a   :  { %v1389_v13 = vadd.f32 %v1388_v21, %v1252_v63  ;;  %v1466_v24 = vadd.f32 %v1457_v29, %v1387_v54 }
 0x45b   :  { %v1390_v9 = vpop.f32.mrf.mxu0 }
 0x45c   :  { %1470 = vst [vmem:[%s2704_s16] sm:$0xff] %v1466_v24  ;;  %v1391_v59 = vadd.f32 %v1390_v9, %v1254_v52  ;;  %v1467_v46 = vadd.f32 %v1459_v0, %v1389_v13 }
 0x45d   :  { %v1392_v41 = vpop.f32.mrf.mxu0 }
 0x45e   :  { %1471 = vst.msk [vmem:[%s2704_s16 + $0x8] sm:$0xff] %vm176_vm0, %v1467_v46  ;;  %v1393_v12 = vadd.f32 %v1392_v41, %v1256_v60  ;;  %v1468_v42 = vadd.f32 %v1461_v15, %v1391_v59 }
 0x460   :  { %1472 = vst [vmem:[%s2704_s16 + $0x10] sm:$0xff] %v1468_v42  ;;  %v1469_v50 = vadd.f32 %v1463_v38, %v1393_v12  ;;  %v1474_v25 = vpack.c.bf16 %v1468_v42, %v1466_v24 }
 0x462   :  { %1473 = vst.msk [vmem:[%s2704_s16 + $0x18] sm:$0xff] %vm176_vm0, %v1469_v50  ;;  %v1475_v56 = vpack.c.bf16 %v1469_v50, %v1467_v46 }
 0x464   :  { %1816 = vmatprep.mubr.msk.bf16.mxu1 %vm176_vm0, %v1475_v56 }
 0x465   :  { %1584 = vmatmul.mubr.bf16.vlgmr.msra.gmra.mxu1 %v1474_v25 }
 0x525   :  { %v1585_v40 = vpop.f32.mrf.mxu1 }
 0x527   :  { %v1587_v43 = vpop.f32.mrf.mxu1 }
 0x529   :  { %v1588_v61 = vpop.f32.mrf.mxu1 }
 0x52a   :  { %1824 = vmatpush3.msra.mxu0 %v1588_v61 }
 0x52b   :  { %v1590_v58 = vpop.f32.mrf.mxu1  ;;  %1825 = vmatprep.subr.mxu0 %v2745_v6 }
 0x52c   :  { %1826 = vmatpush3.msra.mxu0 %v1585_v40 }
 0x52d   :  { %1828 = vmatmul.mubr.msk.f32.vlgmr.msra.gmra.mxu0 %vm176_vm0, %v1592_v4 }
 0x5ed   :  { %v1662_v53 = vpop.f32.mrf.mxu0 }
 0x5ee   :  { %1667 = vst.msk [vmem:[%s2706_s17] sm:$0x3] %vm1666_vm9, %v1662_v53 }
 0x5ef   :  { %v1829_v55 = vpop.f32.mrf.mxu0 }

// kernel: forward.7
= control target key start
LH: loop header
LB: loop body
LE: loop exit
PB: predicated region body
PF: predicated region fallthrough
CT: control target
= control target key end

     0   :  { %s2815_s0 = inlined_call_operand.vmem [shape: f32[16,144], index: 0, kind: input, shape index: {}]   ;;  %s2816_s1 = inlined_call_operand.vmem [shape: bf16[16,4], index: 1, kind: input, shape index: {}]   ;;  %s2817_s2 = inlined_call_operand.vmem [shape: f32[2,16], index: 2, kind: input, shape index: {}]   ;;  %s2818_s3 = inlined_call_operand.vmem [shape: bf16[64,16], index: 3, kind: input, shape index: {}]   ;;  %s2819_s4 = inlined_call_operand.vmem [shape: bf16[16,64], index: 4, kind: input, shape index: {}]   ;;  %s2820_s5 = inlined_call_operand.vmem [shape: bf16[64,144], index: 5, kind: input, shape index: {}]   ;;  %s2821_s6 = inlined_call_operand.vmem [shape: bf16[64,32], index: 6, kind: input, shape index: {}]   ;;  %s2822_s7 = inlined_call_operand.vmem [shape: bf16[144,144], index: 7, kind: input, shape index: {}]   ;;  %s2823_s8 = inlined_call_operand.vmem [shape: bf16[144,144], index: 8, kind: input, shape index: {}]   ;;  %s2824_s9 = inlined_call_operand.vmem [shape: bf16[144,144], index: 9, kind: input, shape index: {}]   ;;  %s2825_s10 = inlined_call_operand.vmem [shape: bf16[32,144], index: 10, kind: input, shape index: {}]   ;;  %s2826_s11 = inlined_call_operand.vmem [shape: bf16[144,144], index: 11, kind: input, shape index: {}]   ;;  %s2827_s12 = inlined_call_operand.vmem [shape: bf16[144,144], index: 12, kind: input, shape index: {}]   ;;  %s2828_s13 = inlined_call_operand.vmem [shape: bf16[4,144], index: 13, kind: input, shape index: {}]   ;;  %s2829_s14 = inlined_call_operand.vmem [shape: bf16[144,16], index: 14, kind: input, shape index: {}]   ;;  %s2830_s15 = inlined_call_operand.vmem [shape: bf16[16,1], index: 15, kind: input, shape index: {}]   ;;  %s2831_s16 = inlined_call_operand.hbm [shape: f32[16,144], index: 16, kind: output, shape index: {0}]   ;;  %s2832_s17 = inlined_call_operand.vmem [shape: f32[2,1], index: 17, kind: output, shape index: {1}]  }
   0x1   :  { %2848 = sst [smem:[#allocation12_spill]] %s2815_s0 }
   0x2   :  { %2849 = sst [smem:[#allocation13_spill]] %s2816_s1 }
   0x3   :  { %v1926_v0 = vld [vmem:[%s2822_s7 + $0x74] ss:$8 sps:$4 sm:$0xff]   ;;  %v1928_v1 = vld [vmem:[%s2822_s7 + $0x70] ss:$8 sps:$4 sm:$0xff]   ;;  %v1929_v2 = vld [vmem:[%s2822_s7 + $0x64] ss:$8 sps:$4 sm:$0xff]  }
   0x4   :  { %179 = vmatprep.subr.bf16.mxu0 %v1926_v0  ;;  %v1931_v3 = vld [vmem:[%s2822_s7 + $0x60] ss:$8 sps:$4 sm:$0xff]   ;;  %v1932_v4 = vld [vmem:[%s2822_s7 + $0x54] ss:$8 sps:$4 sm:$0xff]   ;;  %v1934_v5 = vld [vmem:[%s2822_s7 + $0x50] ss:$8 sps:$4 sm:$0xff]  }
   0x5   :  { %180 = vmatpush1.bf16.msra.mxu0 %v1928_v1  ;;  %v1935_v6 = vld [vmem:[%s2822_s7 + $0x44] ss:$8 sps:$4 sm:$0xff]   ;;  %v1937_v7 = vld [vmem:[%s2822_s7 + $0x40] ss:$8 sps:$4 sm:$0xff]   ;;  %v1938_v8 = vld [vmem:[%s2822_s7 + $0x34] ss:$8 sps:$4 sm:$0xff]  }
   0x6   :  { %181 = vmatprep.subr.bf16.mxu0 %v1929_v2  ;;  %s2850_s29 = sld [smem:[#allocation12_spill]]  ;;  %vm175_vm0 = vcmask 130048   ;;  %v1940_v11 = vld [vmem:[%s2822_s7 + $0x30] ss:$8 sps:$4 sm:$0xff]   ;;  %v1941_v13 = vld [vmem:[%s2822_s7 + $0x24] ss:$8 sps:$4 sm:$0xff]  }
   0x7   :  { %v1943_v14 = vld [vmem:[%s2822_s7 + $0x20] ss:$8 sps:$4 sm:$0xff]   ;;  %v1944_v15 = vld [vmem:[%s2822_s7 + $0x14] ss:$8 sps:$4 sm:$0xff]   ;;  %v1946_v16 = vld [vmem:[%s2822_s7 + $0x10] ss:$8 sps:$4 sm:$0xff]  }
   0x8   :  { %v1947_v17 = vld [vmem:[%s2822_s7 + $0x4] ss:$8 sps:$4 sm:$0xff]   ;;  %v1949_v18 = vld [vmem:[%s2822_s7] ss:$8 sps:$4 sm:$0xff]  }
   0x9   :  { %182 = vmatpush1.bf16.msra.mxu0 %v1931_v3  ;;  %v1950_v19 = vld [vmem:[%s2822_s7 + $0x84] ss:$8 sps:$4 sm:$0xff]   ;;  %v1952_v20 = vld [vmem:[%s2822_s7 + $0x80] ss:$8 sps:$4 sm:$0xff]  }
   0xa   :  { %183 = vmatprep.subr.bf16.mxu0 %v1932_v4 }
   0xc   :  { %v62_v9 = vld [vmem:[%s2850_s29 + $0x8] sm:$0xff]  ;;  %v64_v10 = vld [vmem:[%s2850_s29 + $0x18] sm:$0xff]  ;;  %v61_v21 = vld [vmem:[%s2850_s29] sm:$0xff] }
   0xd   :  { %184 = vmatpush1.bf16.msra.mxu0 %v1934_v5  ;;  %v66_v12 = vpack.c.bf16 %v64_v10, %v62_v9  ;;  %v63_v22 = vld [vmem:[%s2850_s29 + $0x10] sm:$0xff] }
   0xe   :  { %185 = vmatprep.subr.bf16.mxu0 %v1935_v6  ;;  %v65_v23 = vpack.c.bf16 %v63_v22, %v61_v21 }
   0xf   :  { %1772 = vmatprep.mubr.msk.bf16.mxu0 %vm175_vm0, %v66_v12 }
  0x11   :  { %186 = vmatpush1.bf16.msra.mxu0 %v1937_v7 }
  0x12   :  { %187 = vmatprep.subr.bf16.mxu0 %v1938_v8 }
  0x15   :  { %188 = vmatpush1.bf16.msra.mxu0 %v1940_v11 }
  0x16   :  { %189 = vmatprep.subr.bf16.mxu0 %v1941_v13 }
  0x19   :  { %190 = vmatpush1.bf16.msra.mxu0 %v1943_v14 }
  0x1a   :  { %191 = vmatprep.subr.bf16.mxu0 %v1944_v15 }
  0x1d   :  { %192 = vmatpush1.bf16.msra.mxu0 %v1946_v16 }
  0x1e   :  { %193 = vmatprep.subr.bf16.mxu0 %v1947_v17 }
  0x21   :  { %194 = vmatpush1.bf16.msra.mxu0 %v1949_v18 }
  0x22   :  { %209 = vmatprep.subr.bf16.mxu0 %v1950_v19 }
  0x25   :  { %210 = vmatpush2.bf16.msra.mxu0 %v1952_v20 }
  0x28   :  { %212 = vmatmul.mubr.bf16.vlgmr.msra.gmra.mxu0 %v65_v23 }
  0x29   :  { %23 = vsyncpa [#allocation5], 0  ;;  %v2836_v24 = vmov 0   ;;  %v1967_v25 = vld [vmem:[%s2823_s8 + $0x70] ss:$8 sps:$4 sm:$0xff]   ;;  %vm234_vm1 = vcmask 1043456  }
  0x2a   :  { %328 = vmatprep.mubr.bf16.mxu1 %v2836_v24  ;;  %v1969_v26 = vld [vmem:[%s2823_s8 + $0x74] ss:$8 sps:$4 sm:$0xff]   ;;  %v1975_v27 = vld [vmem:[%s2823_s8 + $0x64] ss:$8 sps:$4 sm:$0xff]   ;;  %v1973_v28 = vld [vmem:[%s2823_s8 + $0x60] ss:$8 sps:$4 sm:$0xff]  }
  0x2b   :  { %659 = vmatprep.subr.bf16.mxu0 %v1969_v26  ;;  %v1980_v29 = vld [vmem:[%s2823_s8 + $0x50] ss:$8 sps:$4 sm:$0xff]   ;;  %v1982_v30 = vld [vmem:[%s2823_s8 + $0x54] ss:$8 sps:$4 sm:$0xff]   ;;  %v1988_v31 = vld [vmem:[%s2823_s8 + $0x44] ss:$8 sps:$4 sm:$0xff]  }
  0x2c   :  { %660 = vmatpush1.bf16.msra.mxu0 %v1967_v25  ;;  %v1986_v32 = vld [vmem:[%s2823_s8 + $0x40] ss:$8 sps:$4 sm:$0xff]   ;;  %v1993_v33 = vld [vmem:[%s2823_s8 + $0x30] ss:$8 sps:$4 sm:$0xff]   ;;  %v1995_v34 = vld [vmem:[%s2823_s8 + $0x34] ss:$8 sps:$4 sm:$0xff]  }
  0x2d   :  { %661 = vmatprep.subr.bf16.mxu0 %v1975_v27  ;;  %v2001_v35 = vld [vmem:[%s2823_s8 + $0x24] ss:$8 sps:$4 sm:$0xff]   ;;  %v1999_v36 = vld [vmem:[%s2823_s8 + $0x20] ss:$8 sps:$4 sm:$0xff]   ;;  %v2006_v37 = vld [vmem:[%s2823_s8 + $0x10] ss:$8 sps:$4 sm:$0xff]  }
  0x2e   :  { %v2008_v38 = vld [vmem:[%s2823_s8 + $0x14] ss:$8 sps:$4 sm:$0xff]   ;;  %vm235_vm2 = vcmask 130052   ;;  %v1956_v48 = vld [vmem:[%s2818_s3] sm:$0xff]   ;;  %v1960_v49 = vld [vmem:[%s2825_s10 + $0x10] ss:$8 sps:$4 sm:$0xff]  }
  0x2f   :  { %vm236_vm3 = vmor %vm235_vm2, %vm234_vm1  ;;  %v1962_v45 = vld [vmem:[%s2825_s10 + $0x14] ss:$8 sps:$4 sm:$0xff]   ;;  %v1965_v50 = vld [vmem:[%s2825_s10 + $0x4] ss:$8 sps:$4 sm:$0xff]   ;;  %vm445_vm4 = vcmask 261120   ;;  %vm1016_vm5 = vcmask 523264  }
  0x30   :  { %662 = vmatpush1.bf16.msra.mxu0 %v1973_v28  ;;  %v1963_v51 = vld [vmem:[%s2825_s10] ss:$8 sps:$4 sm:$0xff]   ;;  %v1972_v52 = vld [vmem:[%s2824_s9 + $0x74] ss:$8 sps:$4 sm:$0xff]   ;;  %v1970_v57 = vld [vmem:[%s2824_s9 + $0x70] ss:$8 sps:$4 sm:$0xff]  }
  0x31   :  { %663 = vmatprep.subr.bf16.mxu0 %v1982_v30  ;;  %v1957_v53 = vld [vmem:[%s2818_s3 + $0x8] sm:$0xff]   ;;  %v1958_v54 = vld [vmem:[%s2818_s3 + $0x10] sm:$0xff]   ;;  %v1959_v55 = vld [vmem:[%s2818_s3 + $0x18] sm:$0xff]   ;;  %vm1415_vm6 = vcmask 1041408   ;;  %s2872_s18 = sld [smem:[#allocation13_spill]]  ;;  %vm1411_vm7 = vcmask 31744  }
  0x32   :  { %v1966_v56 = vld [vmem:[%s2821_s6] sm:$0xff]   ;;  %v1985_v60 = vld [vmem:[%s2824_s9 + $0x54] ss:$8 sps:$4 sm:$0xff]   ;;  %v1979_v61 = vld [vmem:[%s2821_s6 + $0x8] sm:$0xff]   ;;  %vm2122_vm8 = vmmov 0  }
  0x33   :  { %v1978_v58 = vld [vmem:[%s2824_s9 + $0x64] ss:$8 sps:$4 sm:$0xff]   ;;  %v1976_v59 = vld [vmem:[%s2824_s9 + $0x60] ss:$8 sps:$4 sm:$0xff]   ;;  %v1983_v62 = vld [vmem:[%s2824_s9 + $0x50] ss:$8 sps:$4 sm:$0xff]  }
  0x34   :  { %664 = vmatpush1.bf16.msra.mxu0 %v1980_v29  ;;  %v1991_v63 = vld [vmem:[%s2824_s9 + $0x44] ss:$8 sps:$4 sm:$0xff]   ;;  %v1989_v0 = vld [vmem:[%s2824_s9 + $0x40] ss:$8 sps:$4 sm:$0xff]   ;;  %v1998_v1 = vld [vmem:[%s2824_s9 + $0x34] ss:$8 sps:$4 sm:$0xff]  }
  0x35   :  { %665 = vmatprep.subr.bf16.mxu0 %v1988_v31  ;;  %v1992_v2 = vld [vmem:[%s2821_s6 + $0x10] sm:$0xff]   ;;  %v2004_v4 = vld [vmem:[%s2824_s9 + $0x24] ss:$8 sps:$4 sm:$0xff]   ;;  %v2002_v5 = vld [vmem:[%s2824_s9 + $0x20] ss:$8 sps:$4 sm:$0xff]  }
  0x36   :  { %v1996_v3 = vld [vmem:[%s2824_s9 + $0x30] ss:$8 sps:$4 sm:$0xff]   ;;  %v2011_v7 = vld [vmem:[%s2824_s9 + $0x14] ss:$8 sps:$4 sm:$0xff]   ;;  %v2014_v9 = vld [vmem:[%s2823_s8 + $0x4] ss:$8 sps:$4 sm:$0xff]  }
  0x37   :  { %v2005_v6 = vld [vmem:[%s2821_s6 + $0x18] sm:$0xff]   ;;  %v2012_v10 = vld [vmem:[%s2823_s8] ss:$8 sps:$4 sm:$0xff]   ;;  %v2017_v11 = vld [vmem:[%s2824_s9 + $0x4] ss:$8 sps:$4 sm:$0xff]  }
  0x38   :  { %666 = vmatpush1.bf16.msra.mxu0 %v1986_v32  ;;  %v2009_v8 = vld [vmem:[%s2824_s9 + $0x10] ss:$8 sps:$4 sm:$0xff]   ;;  %v2015_v12 = vld [vmem:[%s2824_s9] ss:$8 sps:$4 sm:$0xff]   ;;  %v2020_v13 = vld [vmem:[%s2823_s8 + $0x84] ss:$8 sps:$4 sm:$0xff]  }
  0x39   :  { %667 = vmatprep.subr.bf16.mxu0 %v1995_v34  ;;  %v2018_v14 = vld [vmem:[%s2823_s8 + $0x80] ss:$8 sps:$4 sm:$0xff]   ;;  %v2023_v15 = vld [vmem:[%s2824_s9 + $0x84] ss:$8 sps:$4 sm:$0xff]   ;;  %v2466_v32 = vld [vmem:[%s2820_s5 + $0x18] sm:$0xff] }
  0x3a   :  { %v2021_v16 = vld [vmem:[%s2824_s9 + $0x80] ss:$8 sps:$4 sm:$0xff]  }
  0x3b   :  { %v2446_v17 = vld [vmem:[%s2820_s5 + $0x8] sm:$0xff]  ;;  %v2451_v19 = vld [vmem:[%s2820_s5] sm:$0xff] }
  0x3c   :  { %668 = vmatpush1.bf16.msra.mxu0 %v1993_v33  ;;  %v2839_v21 = vunpack.c.l.bf16 %v2446_v17  ;;  %v2840_v22 = vunpack.c.h.bf16 %v2451_v19  ;;  %v2843_v23 = vunpack.c.h.bf16 %v2446_v17  ;;  %v2838_v25 = vunpack.c.l.bf16 %v2451_v19 }
  0x3d   :  { %669 = vmatprep.subr.bf16.mxu0 %v2001_v35 }
  0x40   :  { %670 = vmatpush1.bf16.msra.mxu0 %v1999_v36 }
  0x41   :  { %671 = vmatprep.subr.bf16.mxu0 %v2008_v38 }
  0x44   :  { %672 = vmatpush1.bf16.msra.mxu0 %v2006_v37  ;;  %v2473_v37 = vld [vmem:[%s2820_s5 + $0x10] sm:$0xff] }
  0x45   :  { %673 = vmatprep.subr.bf16.mxu0 %v2014_v9  ;;  %v2521_v9 = vld [vmem:[%s2820_s5 + $0x30] sm:$0xff] }
  0x48   :  { %674 = vmatpush1.bf16.msra.mxu0 %v2012_v10 }
  0x49   :  { %689 = vmatprep.subr.bf16.mxu0 %v2020_v13  ;;  %v390_v13 = vunpack.c.h.bf16 %v2521_v9 }
  0x4c   :  { %690 = vmatpush2.bf16.msra.mxu0 %v2018_v14 }
  0xe8   :  { %v213_v39 = vpop.f32.mrf.mxu0 }
  0xea   :  { %v215_v40 = vpop.f32.mrf.mxu0 }
  0xeb   :  { %v1900_v41 = vpack.c.bf16 %v215_v40, %v213_v39  ;;  %v2842_v40 = vunpack.c.l.bf16 %v2466_v32 }
  0xec   :  { %v217_v42 = vpop.f32.mrf.mxu0 }
  0xed   :  { %237 = vst.msk [vmem:[#allocation2] sm:$0xff] %vm236_vm3, %v1900_v41  ;;  %v2844_v41 = vunpack.c.h.bf16 %v2473_v37 }
  0xee   :  { %v219_v43 = vpop.f32.mrf.mxu0 }
  0xef   :  { %v1901_v44 = vpack.c.bf16 %v219_v43, %v217_v42  ;;  %v384_v42 = vunpack.c.h.bf16 %v2466_v32  ;;  %v2841_v43 = vunpack.c.l.bf16 %v2473_v37 }
  0xf1   :  { %238 = vst.msk [vmem:[#allocation2 + $0x8] sm:$0xff] %vm236_vm3, %v1901_v44 }
  0xf8   :  { %v1953_v46 = vld [vmem:[#allocation2 + $0x4] ss:$8 sps:$4 sm:$0xff]   ;;  %v1955_v47 = vld [vmem:[#allocation2] ss:$8 sps:$4 sm:$0xff]  }
  0xf9   :  { %310 = vmatprep.subr.bf16.mxu1 %v1953_v46 }
  0xfa   :  { %311 = vmatpush1.bf16.msra.mxu1 %v1955_v47 }
  0xfb   :  { %470 = vmatprep.subr.bf16.mxu1 %v1962_v45 }
  0xfd   :  { %1781 = vmatmul.mubr.msk.bf16.vlgmr.msra.gmra.mxu1 %vm175_vm0, %v1956_v48 }
  0xfe   :  { %338 = vmatprep.mubr.bf16.mxu1 %v2836_v24  ;;  %471 = vmatpush1.bf16.msra.mxu1 %v1960_v49 }
  0xff   :  { %472 = vmatprep.subr.bf16.mxu1 %v1965_v50  ;;  %v2490_v50 = vld [vmem:[%s2820_s5 + $0x28] sm:$0xff] }
 0x102   :  { %473 = vmatpush1.bf16.msra.mxu1 %v1963_v51 }
 0x103   :  { %876 = vmatprep.subr.bf16.mxu1 %v1972_v52 }
 0x105   :  { %1782 = vmatmul.mubr.msk.bf16.gmra.mxu1 %vm175_vm0, %v1957_v53 }
 0x106   :  { %348 = vmatprep.mubr.bf16.mxu1 %v2836_v24 }
 0x10d   :  { %1783 = vmatmul.mubr.msk.bf16.gmra.mxu1 %vm175_vm0, %v1958_v54 }
 0x10e   :  { %358 = vmatprep.mubr.bf16.mxu1 %v2836_v24 }
 0x115   :  { %1784 = vmatmul.mubr.msk.bf16.gmra.mxu1 %vm175_vm0, %v1959_v55  ;;  %v2497_v55 = vld [vmem:[%s2820_s5 + $0x20] sm:$0xff] }
 0x116   :  { %490 = vmatprep.mubr.bf16.mxu1 %v2836_v24 }
 0x11d   :  { %1793 = vmatmul.mubr.msk.bf16.vlgmr.msra.gmra.mxu1 %vm445_vm4, %v1966_v56 }
 0x11e   :  { %877 = vmatpush1.bf16.msra.mxu1 %v1970_v57  ;;  %500 = vmatprep.mubr.bf16.mxu1 %v2836_v24 }
 0x11f   :  { %878 = vmatprep.subr.bf16.mxu1 %v1978_v58  ;;  %v2847_v58 = vunpack.c.l.bf16 %v2490_v50 }
 0x122   :  { %879 = vmatpush1.bf16.msra.mxu1 %v1976_v59  ;;  %v386_v59 = vunpack.c.h.bf16 %v2497_v55 }
 0x123   :  { %880 = vmatprep.subr.bf16.mxu1 %v1985_v60  ;;  %v388_v60 = vunpack.c.h.bf16 %v2490_v50 }
 0x125   :  { %1794 = vmatmul.mubr.msk.bf16.gmra.mxu1 %vm445_vm4, %v1979_v61  ;;  %v2845_v61 = vunpack.c.l.bf16 %v2497_v55 }
 0x126   :  { %881 = vmatpush1.bf16.msra.mxu1 %v1983_v62  ;;  %510 = vmatprep.mubr.bf16.mxu1 %v2836_v24 }
 0x127   :  { %882 = vmatprep.subr.bf16.mxu1 %v1991_v63 }
 0x12a   :  { %883 = vmatpush1.bf16.msra.mxu1 %v1989_v0 }
 0x12b   :  { %884 = vmatprep.subr.bf16.mxu1 %v1998_v1 }
 0x12d   :  { %1795 = vmatmul.mubr.msk.bf16.gmra.mxu1 %vm445_vm4, %v1992_v2 }
 0x12e   :  { %885 = vmatpush1.bf16.msra.mxu1 %v1996_v3  ;;  %520 = vmatprep.mubr.bf16.mxu1 %v2836_v24 }
 0x12f   :  { %886 = vmatprep.subr.bf16.mxu1 %v2004_v4  ;;  %v2514_v4 = vld [vmem:[%s2820_s5 + $0x38] sm:$0xff] }
 0x130   :  { %v2846_v14 = vunpack.c.h.bf16 %v2514_v4 }
 0x132   :  { %887 = vmatpush1.bf16.msra.mxu1 %v2002_v5 }
 0x133   :  { %888 = vmatprep.subr.bf16.mxu1 %v2011_v7 }
 0x135   :  { %1796 = vmatmul.mubr.msk.bf16.gmra.mxu1 %vm445_vm4, %v2005_v6 }
 0x136   :  { %889 = vmatpush1.bf16.msra.mxu1 %v2009_v8 }
 0x137   :  { %890 = vmatprep.subr.bf16.mxu1 %v2017_v11 }
 0x13a   :  { %891 = vmatpush1.bf16.msra.mxu1 %v2015_v12  ;;  %v391_v12 = vunpack.c.l.bf16 %v2514_v4 }
 0x13b   :  { %906 = vmatprep.subr.bf16.mxu1 %v2023_v15  ;;  %v389_v15 = vunpack.c.l.bf16 %v2521_v9 }
 0x13e   :  { %907 = vmatpush2.bf16.msra.mxu1 %v2021_v16 }
 0x1bd   :  { %v330_v18 = vpop.f32.mrf.mxu1 }
 0x1be   :  { %v732_v33 = vmul.f32 %v2838_v25, %v330_v18 }
 0x1bf   :  { %v332_v20 = vpop.f32.mrf.mxu1 }
 0x1c0   :  { %v733_v29 = vmul.f32 %v2840_v22, %v332_v20 }
 0x1c1   :  { %v334_v26 = vpop.f32.mrf.mxu1 }
 0x1c2   :  { %v734_v27 = vmul.f32 %v2839_v21, %v334_v26  ;;  %v531_v34 = vpack.c.bf16 %v334_v26, %v330_v18 }
 0x1c3   :  { %v336_v28 = vpop.f32.mrf.mxu1 }
 0x1c4   :  { %v532_v30 = vpack.c.bf16 %v336_v28, %v332_v20  ;;  %v735_v31 = vmul.f32 %v2843_v23, %v336_v28  ;;  %v748_v38 = vpack.c.bf16 %v734_v27, %v732_v33 }
 0x1c5   :  { %v340_v35 = vpop.f32.mrf.mxu1 }
 0x1c6   :  { %v749_v36 = vpack.c.bf16 %v735_v31, %v733_v29  ;;  %1815 = vmatprep.mubr.msk.bf16.mxu0 %vm175_vm0, %v532_v30  ;;  %v736_v51 = vmul.f32 %v2841_v43, %v340_v35 }
 0x1c7   :  { %v342_v39 = vpop.f32.mrf.mxu1  ;;  %692 = vmatmul.mubr.bf16.vlgmr.msra.gmra.mxu0 %v531_v34  ;;  %v2025_v34 = vld [vmem:[%s2827_s12 + $0x70] ss:$8 sps:$4 sm:$0xff]  }
 0x1c8   :  { %1837 = vmatprep.mubr.msk.bf16.mxu1 %vm175_vm0, %v749_v36  ;;  %v737_v47 = vmul.f32 %v2844_v41, %v342_v39  ;;  %v2030_v36 = vld [vmem:[%s2827_s12 + $0x64] ss:$8 sps:$4 sm:$0xff]  }
 0x1c9   :  { %v344_v44 = vpop.f32.mrf.mxu1  ;;  %909 = vmatmul.mubr.bf16.vlgmr.msra.gmra.mxu1 %v748_v38  ;;  %v2028_v38 = vld [vmem:[%s2827_s12 + $0x60] ss:$8 sps:$4 sm:$0xff]  }
 0x1ca   :  { %v738_v45 = vmul.f32 %v2842_v40, %v344_v44  ;;  %v533_v52 = vpack.c.bf16 %v344_v44, %v340_v35  ;;  %v2027_v35 = vld [vmem:[%s2827_s12 + $0x74] ss:$8 sps:$4 sm:$0xff]   ;;  %v2034_v44 = vld [vmem:[%s2827_s12 + $0x50] ss:$8 sps:$4 sm:$0xff]  }
 0x1cb   :  { %v346_v46 = vpop.f32.mrf.mxu1  ;;  %1215 = vmatprep.subr.bf16.mxu1 %v2027_v35 }
 0x1cc   :  { %v534_v48 = vpack.c.bf16 %v346_v46, %v342_v39  ;;  %v739_v49 = vmul.f32 %v384_v42, %v346_v46  ;;  %v750_v56 = vpack.c.bf16 %v738_v45, %v736_v51  ;;  %1216 = vmatpush1.bf16.msra.mxu1 %v2025_v34  ;;  %v2036_v39 = vld [vmem:[%s2827_s12 + $0x54] ss:$8 sps:$4 sm:$0xff]   ;;  %v2042_v45 = vld [vmem:[%s2827_s12 + $0x44] ss:$8 sps:$4 sm:$0xff]   ;;  %v2040_v46 = vld [vmem:[%s2827_s12 + $0x40] ss:$8 sps:$4 sm:$0xff]  }
 0x1cd   :  { %v350_v53 = vpop.f32.mrf.mxu1  ;;  %1217 = vmatprep.subr.bf16.mxu1 %v2030_v36  ;;  %v2046_v51 = vld [vmem:[%s2827_s12 + $0x30] ss:$8 sps:$4 sm:$0xff]  }
 0x1ce   :  { %v751_v54 = vpack.c.bf16 %v739_v49, %v737_v47  ;;  %1816 = vmatprep.mubr.msk.bf16.mxu0 %vm175_vm0, %v534_v48  ;;  %v740_v5 = vmul.f32 %v2845_v61, %v350_v53  ;;  %v2048_v47 = vld [vmem:[%s2827_s12 + $0x34] ss:$8 sps:$4 sm:$0xff]   ;;  %v2834_v48 = vmov 0.0  }
 0x1cf   :  { %v352_v57 = vpop.f32.mrf.mxu1  ;;  %702 = vmatmul.mubr.bf16.gmra.mxu0 %v533_v52  ;;  %240 = vst.msk [vmem:[#allocation3 + $0x8] sm:$0xff] %vm175_vm0, %v2834_v48  ;;  %242 = vst.msk [vmem:[#allocation3 + $0x18] sm:$0xff] %vm175_vm0, %v2834_v48  ;;  %v2054_v52 = vld [vmem:[%s2827_s12 + $0x24] ss:$8 sps:$4 sm:$0xff]  }
 0x1d0   :  { %1838 = vmatprep.mubr.msk.bf16.mxu1 %vm175_vm0, %v751_v54  ;;  %v741_v1 = vmul.f32 %v386_v59, %v352_v57  ;;  %1218 = vmatpush1.bf16.msra.mxu1 %v2028_v38  ;;  %v2052_v54 = vld [vmem:[%s2827_s12 + $0x20] ss:$8 sps:$4 sm:$0xff]  }
 0x1d1   :  { %v354_v62 = vpop.f32.mrf.mxu1  ;;  %919 = vmatmul.mubr.bf16.gmra.mxu1 %v750_v56  ;;  %1219 = vmatprep.subr.bf16.mxu1 %v2036_v39 }
 0x1d2   :  { %v742_v63 = vmul.f32 %v2847_v58, %v354_v62  ;;  %v535_v6 = vpack.c.bf16 %v354_v62, %v350_v53 }
 0x1d3   :  { %v356_v0 = vpop.f32.mrf.mxu1 }
 0x1d4   :  { %v536_v2 = vpack.c.bf16 %v356_v0, %v352_v57  ;;  %v743_v3 = vmul.f32 %v388_v60, %v356_v0  ;;  %v752_v10 = vpack.c.bf16 %v742_v63, %v740_v5  ;;  %1220 = vmatpush1.bf16.msra.mxu1 %v2034_v44 }
 0x1d5   :  { %v360_v7 = vpop.f32.mrf.mxu1  ;;  %1221 = vmatprep.subr.bf16.mxu1 %v2042_v45 }
 0x1d6   :  { %v753_v8 = vpack.c.bf16 %v743_v3, %v741_v1  ;;  %1817 = vmatprep.mubr.msk.bf16.mxu0 %vm175_vm0, %v536_v2  ;;  %v744_v29 = vmul.f32 %v389_v15, %v360_v7 }
 0x1d7   :  { %v362_v11 = vpop.f32.mrf.mxu1  ;;  %712 = vmatmul.mubr.bf16.gmra.mxu0 %v535_v6 }
 0x1d8   :  { %1839 = vmatprep.mubr.msk.bf16.mxu1 %vm175_vm0, %v753_v8  ;;  %v745_v26 = vmul.f32 %v390_v13, %v362_v11  ;;  %1222 = vmatpush1.bf16.msra.mxu1 %v2040_v46 }
 0x1d9   :  { %v364_v16 = vpop.f32.mrf.mxu1  ;;  %929 = vmatmul.mubr.bf16.gmra.mxu1 %v752_v10  ;;  %1223 = vmatprep.subr.bf16.mxu1 %v2048_v47 }
 0x1da   :  { %v746_v18 = vmul.f32 %v391_v12, %v364_v16  ;;  %v537_v30 = vpack.c.bf16 %v364_v16, %v360_v7 }
 0x1db   :  { %v366_v20 = vpop.f32.mrf.mxu1 }
 0x1dc   :  { %v538_v27 = vpack.c.bf16 %v366_v20, %v362_v11  ;;  %v747_v28 = vmul.f32 %v2846_v14, %v366_v20  ;;  %v754_v33 = vpack.c.bf16 %v746_v18, %v744_v29  ;;  %1224 = vmatpush1.bf16.msra.mxu1 %v2046_v51 }
 0x1dd   :  { %v2571_v49 = vpop.f32.mrf.mxu1  ;;  %1225 = vmatprep.subr.bf16.mxu1 %v2054_v52 }
 0x1de   :  { %v755_v31 = vpack.c.bf16 %v747_v28, %v745_v26  ;;  %1818 = vmatprep.mubr.msk.bf16.mxu0 %vm175_vm0, %v538_v27  ;;  %2851 = vst [vmem:[#allocation7_spill] sm:$0xff] %v2571_v49 }
 0x1df   :  { %722 = vmatmul.mubr.bf16.gmra.mxu0 %v537_v30  ;;  %v2579_v53 = vpop.f32.mrf.mxu1 }
 0x1e0   :  { %1840 = vmatprep.mubr.msk.bf16.mxu1 %vm175_vm0, %v755_v31  ;;  %1052 = vmatprep.mubr.bf16.mxu0 %v2836_v24  ;;  %2852 = vst [vmem:[#allocation8_spill] sm:$0xff] %v2579_v53 }
 0x1e1   :  { %939 = vmatmul.mubr.bf16.gmra.mxu1 %v754_v33  ;;  %v2584_v56 = vpop.f32.mrf.mxu1 }
 0x1e2   :  { %2853 = vst [vmem:[#allocation9_spill] sm:$0xff] %v2584_v56  ;;  %1226 = vmatpush1.bf16.msra.mxu1 %v2052_v54  ;;  %v2856_v56 = vunpack.c.l.bf16 %v2490_v50  ;;  %v2860_v50 = vunpack.c.h.bf16 %v2446_v17 }
 0x1e3   :  { %v2586_v57 = vpop.f32.mrf.mxu1 }
 0x1e5   :  { %v2588_v62 = vpop.f32.mrf.mxu1 }
 0x1e6   :  { %2854 = vst [vmem:[#allocation10_spill] sm:$0xff] %v2588_v62  ;;  %v2858_v62 = vunpack.c.l.bf16 %v2497_v55 }
 0x1e7   :  { %v2590_v63 = vpop.f32.mrf.mxu1 }
 0x1e9   :  { %v2592_v0 = vpop.f32.mrf.mxu1 }
 0x1eb   :  { %v2594_v1 = vpop.f32.mrf.mxu1 }
 0x1ed   :  { %v2596_v2 = vpop.f32.mrf.mxu1 }
 0x1ef   :  { %v2598_v3 = vpop.f32.mrf.mxu1 }
 0x1f1   :  { %v2600_v5 = vpop.f32.mrf.mxu1 }
 0x1f3   :  { %v518_v6 = vpop.f32.mrf.mxu1 }
 0x1f5   :  { %v522_v7 = vpop.f32.mrf.mxu1 }
 0x1f7   :  { %v524_v8 = vpop.f32.mrf.mxu1 }
 0x1f9   :  { %v526_v10 = vpop.f32.mrf.mxu1 }
 0x1fb   :  { %v528_v11 = vpop.f32.mrf.mxu1 }
 0x287   :  { %v2602_v16 = vpop.f32.mrf.mxu0 }
 0x289   :  { %v695_v18 = vpop.f32.mrf.mxu0  ;;  %v2604_v20 = vpop.f32.mrf.mxu1 }
 0x28a   :  { %2855 = vst [vmem:[#allocation11_spill] sm:$0xff] %v2604_v20 }
 0x28b   :  { %v697_v26 = vpop.f32.mrf.mxu0  ;;  %v2606_v27 = vpop.f32.mrf.mxu1 }
 0x28d   :  { %v699_v28 = vpop.f32.mrf.mxu0  ;;  %v2608_v29 = vpop.f32.mrf.mxu1 }
 0x28f   :  { %v703_v30 = vpop.f32.mrf.mxu0  ;;  %v916_v31 = vpop.f32.mrf.mxu1 }
 0x291   :  { %v705_v33 = vpop.f32.mrf.mxu0  ;;  %v920_v34 = vpop.f32.mrf.mxu1 }
 0x293   :  { %v707_v35 = vpop.f32.mrf.mxu0  ;;  %v922_v36 = vpop.f32.mrf.mxu1 }
 0x295   :  { %v709_v38 = vpop.f32.mrf.mxu0  ;;  %v924_v39 = vpop.f32.mrf.mxu1 }
 0x296   :  { %v956_v49 = vmul.f32 %v709_v38, %v384_v42 }
 0x297   :  { %v713_v44 = vpop.f32.mrf.mxu0  ;;  %v926_v45 = vpop.f32.mrf.mxu1 }
 0x299   :  { %v715_v46 = vpop.f32.mrf.mxu0  ;;  %v930_v47 = vpop.f32.mrf.mxu1 }
 0x29a   :  { %v958_v14 = vmul.f32 %v715_v46, %v386_v59  ;;  %v957_v59 = vmul.f32 %v713_v44, %v2858_v62 }
 0x29b   :  { %v717_v51 = vpop.f32.mrf.mxu0  ;;  %v932_v52 = vpop.f32.mrf.mxu1 }
 0x29c   :  { %v974_v42 = vadd.f32 %v958_v14, %v932_v52  ;;  %v973_v62 = vadd.f32 %v957_v59, %v930_v47  ;;  %v2863_v14 = vunpack.c.h.bf16 %v2451_v19  ;;  %v2051_v59 = vld [vmem:[%s2826_s11 + $0x44] ss:$8 sps:$4 sm:$0xff]  }
 0x29d   :  { %v719_v54 = vpop.f32.mrf.mxu0  ;;  %v934_v48 = vpop.f32.mrf.mxu1 }
 0x29e   :  { %v960_v43 = vmul.f32 %v719_v54, %v388_v60  ;;  %v959_v60 = vmul.f32 %v717_v51, %v2856_v56  ;;  %v952_v56 = vmul.f32 %v699_v28, %v2860_v50  ;;  %v990_v28 = vmul.f32 %v974_v42, %v2598_v3  ;;  %v2057_v42 = vld [vmem:[%s2826_s11 + $0x34] ss:$8 sps:$4 sm:$0xff]   ;;  %v2055_v50 = vld [vmem:[%s2826_s11 + $0x30] ss:$8 sps:$4 sm:$0xff]  }
 0x29f   :  { %v723_v24 = vpop.f32.mrf.mxu0  ;;  %v936_v25 = vpop.f32.mrf.mxu1  ;;  %v989_v3 = vmul.f32 %v973_v62, %v2596_v2  ;;  %v2868_v2 = vld [vmem:[#allocation8_spill] sm:$0xff] }
 0x2a0   :  { %v961_v23 = vmul.f32 %v723_v24, %v389_v15  ;;  %v2857_v24 = vunpack.c.h.bf16 %v2514_v4  ;;  %v972_v4 = vadd.f32 %v956_v49, %v926_v45 }
 0x2a1   :  { %v725_v21 = vpop.f32.mrf.mxu0  ;;  %v940_v22 = vpop.f32.mrf.mxu1 }
 0x2a2   :  { %v962_v40 = vmul.f32 %v725_v21, %v390_v13  ;;  %v976_v21 = vadd.f32 %v960_v43, %v936_v25  ;;  %v977_v46 = vadd.f32 %v961_v23, %v940_v22  ;;  %v2861_v25 = vunpack.c.l.bf16 %v2466_v32 }
 0x2a3   :  { %v727_v41 = vpop.f32.mrf.mxu0  ;;  %v942_v61 = vpop.f32.mrf.mxu1  ;;  %v975_v43 = vadd.f32 %v959_v60, %v934_v48  ;;  %v2862_v22 = vunpack.c.l.bf16 %v2473_v37  ;;  %v2864_v32 = vunpack.c.l.bf16 %v2446_v17  ;;  %v2870_v60 = vld [vmem:[#allocation7_spill] sm:$0xff] }
 0x2a4   :  { %v963_v58 = vmul.f32 %v727_v41, %v391_v12  ;;  %v978_v13 = vadd.f32 %v962_v40, %v942_v61  ;;  %v2859_v41 = vunpack.c.h.bf16 %v2473_v37  ;;  %v955_v40 = vmul.f32 %v707_v35, %v2861_v25  ;;  %v2063_v25 = vld [vmem:[%s2826_s11 + $0x24] ss:$8 sps:$4 sm:$0xff]  }
 0x2a5   :  { %v729_v54 = vpop.f32.mrf.mxu0  ;;  %v944_v53 = vpop.f32.mrf.mxu1  ;;  %v953_v23 = vmul.f32 %v703_v30, %v2862_v22  ;;  %v993_v44 = vmul.f32 %v977_v46, %v522_v7  ;;  %v951_v48 = vmul.f32 %v697_v26, %v2864_v32  ;;  %v991_v49 = vmul.f32 %v975_v43, %v2600_v5  ;;  %v2049_v46 = vld [vmem:[%s2826_s11 + $0x40] ss:$8 sps:$4 sm:$0xff]   ;;  %v1100_v22 = vld [vmem:[%s2850_s29 + $0x10] sm:$0xff] }
 0x2a6   :  { %v964_v9 = vmul.f32 %v729_v54, %v2857_v24  ;;  %v979_v15 = vadd.f32 %v963_v58, %v944_v53  ;;  %v954_v12 = vmul.f32 %v705_v33, %v2859_v41  ;;  %v992_v58 = vmul.f32 %v976_v21, %v518_v6  ;;  %v2024_v54 = vld [vmem:[%s2819_s4] sm:$0xff]   ;;  %v2031_v21 = vld [vmem:[%s2826_s11 + $0x70] ss:$8 sps:$4 sm:$0xff]   ;;  %v2060_v41 = vld [vmem:[%s2827_s12 + $0x14] ss:$8 sps:$4 sm:$0xff]   ;;  %s2123_s4 = smov [#allocation4]  }
 0x2a7   :  { %v946_v20 = vpop.f32.mrf.mxu1  ;;  %v994_v53 = vmul.f32 %v978_v13, %v524_v8  ;;  %v968_v8 = vadd.f32 %v952_v56, %v916_v31  ;;  %v988_v37 = vmul.f32 %v972_v4, %v2594_v1  ;;  %v2865_v7 = vunpack.c.l.bf16 %v2451_v19  ;;  %v2866_v19 = vld [vmem:[#allocation11_spill] sm:$0xff]  ;;  %v2039_v13 = vld [vmem:[%s2826_s11 + $0x64] ss:$8 sps:$4 sm:$0xff]   ;;  %v2037_v24 = vld [vmem:[%s2826_s11 + $0x60] ss:$8 sps:$4 sm:$0xff]   ;;  %1227 = vmatprep.subr.bf16.mxu1 %v2060_v41  ;;  %s1739_s28 = sshll.u32 %s2123_s4, 4  ;;  %s1740_s28 = int_to_ptr.vmem [resolvable:$true] %s1739_s28 }
 0x2a8   :  { %v980_v38 = vadd.f32 %v964_v9, %v946_v20  ;;  %v995_v61 = vmul.f32 %v979_v15, %v526_v10  ;;  %v950_v20 = vmul.f32 %v695_v18, %v2863_v14  ;;  %v970_v33 = vadd.f32 %v954_v12, %v922_v36  ;;  %v2045_v9 = vld [vmem:[%s2826_s11 + $0x54] ss:$8 sps:$4 sm:$0xff]   ;;  %v2043_v15 = vld [vmem:[%s2826_s11 + $0x50] ss:$8 sps:$4 sm:$0xff]   ;;  %v2064_v56 = vld [vmem:[%s2827_s12] ss:$8 sps:$4 sm:$0xff]   ;;  %p2103_p1 = scmp.lt.s32.totalorder %s1740_s28, %s1740_s28 }
 0x2a9   :  { %v971_v10 = vadd.f32 %v955_v40, %v924_v39  ;;  %v949_v18 = vmul.f32 %v2602_v16, %v2865_v7  ;;  %v969_v30 = vadd.f32 %v953_v23, %v920_v34  ;;  %v967_v5 = vadd.f32 %v951_v48, %v2608_v29  ;;  %v2867_v16 = vld [vmem:[#allocation10_spill] sm:$0xff]  ;;  %v2058_v12 = vld [vmem:[%s2827_s12 + $0x10] ss:$8 sps:$4 sm:$0xff]   ;;  %v2069_v23 = vld [vmem:[%s2826_s11 + $0x14] ss:$8 sps:$4 sm:$0xff]   ;;  %s2098_s0 = scalar_lea.vmem %s1740_s28, 512 }
 0x2aa   :  { %v996_v55 = vmul.f32 %v980_v38, %v528_v11  ;;  %v1009_v6 = vpack.c.bf16 %v995_v61, %v993_v44  ;;  %v1008_v11 = vpack.c.bf16 %v992_v58, %v990_v28  ;;  %v966_v17 = vadd.f32 %v950_v20, %v2606_v27  ;;  %v2869_v27 = vld [vmem:[#allocation9_spill] sm:$0xff]  ;;  %1228 = vmatpush1.bf16.msra.mxu1 %v2058_v12  ;;  %v1099_v4 = vld [vmem:[%s2850_s29 + $0x8] sm:$0xff]  ;;  %v1101_v58 = vld [vmem:[%s2850_s29 + $0x18] sm:$0xff]  ;;  %p2099_p0 = scmp.ne.s32.totalorder %s1740_s28, %s2098_s0  ;;  %p2104_p2 = scmp.lt.s32.totalorder %s2098_s0, %s2098_s0 }
 0x2ab   :  { %v986_v26 = vmul.f32 %v970_v33, %v2590_v63  ;;  %v987_v31 = vmul.f32 %v971_v10, %v2592_v0  ;;  %v1007_v1 = vpack.c.bf16 %v991_v49, %v989_v3  ;;  %v984_v35 = vmul.f32 %v968_v8, %v2586_v57  ;;  %v2033_v57 = vld [vmem:[%s2826_s11 + $0x74] ss:$8 sps:$4 sm:$0xff]   ;;  %v2066_v38 = vld [vmem:[%s2827_s12 + $0x4] ss:$8 sps:$4 sm:$0xff]   ;;  %v2061_v43 = vld [vmem:[%s2826_s11 + $0x20] ss:$8 sps:$4 sm:$0xff]  }
 0x2ac   :  { %v1010_v51 = vpack.c.bf16 %v996_v55, %v994_v53  ;;  %v965_v39 = vadd.f32 %v949_v18, %v2866_v19  ;;  %v985_v34 = vmul.f32 %v969_v30, %v2867_v16  ;;  %v982_v45 = vmul.f32 %v966_v17, %v2868_v2  ;;  %1229 = vmatprep.subr.bf16.mxu1 %v2066_v38  ;;  %v2072_v40 = vld [vmem:[%s2827_s12 + $0x84] ss:$8 sps:$4 sm:$0xff]   ;;  %v2070_v61 = vld [vmem:[%s2827_s12 + $0x80] ss:$8 sps:$4 sm:$0xff]   ;;  %v2067_v44 = vld [vmem:[%s2826_s11 + $0x10] ss:$8 sps:$4 sm:$0xff]   ;;  %p2105_p3 = por %p2104_p2, %p2103_p1 }
 0x2ad   :  { %v1006_v36 = vpack.c.bf16 %v988_v37, %v986_v26  ;;  %v983_v47 = vmul.f32 %v967_v5, %v2869_v27  ;;  %v1103_v53 = vpack.c.bf16 %v1101_v58, %v1099_v4  ;;  %v1098_v55 = vld [vmem:[%s2850_s29] sm:$0xff]  ;;  %v2871_v33 = vmov 0   ;;  %v2080_v8 = vld [vmem:[%s2829_s14 + $0x38] sm:$0xff]   ;;  %v2081_v37 = vld [vmem:[%s2829_s14 + $0x30] sm:$0xff]  }
 0x2ae   :  { %1028 = vmatprep.subr.bf16.mxu0 %v1010_v51  ;;  %v1005_v63 = vpack.c.bf16 %v987_v31, %v985_v34  ;;  %v1004_v52 = vpack.c.bf16 %v984_v35, %v982_v45  ;;  %v981_v29 = vmul.f32 %v965_v39, %v2870_v60  ;;  %1230 = vmatpush1.bf16.msra.mxu1 %v2064_v56  ;;  %v2073_v14 = vld [vmem:[%s2826_s11] ss:$8 sps:$4 sm:$0xff]   ;;  %v2075_v20 = vld [vmem:[%s2826_s11 + $0x4] ss:$8 sps:$4 sm:$0xff]   ;;  %v2084_v18 = vld [vmem:[%s2829_s14 + $0x18] sm:$0xff]   ;;  %p2106_p4 = pnand %p2105_p3, %p2099_p0 }
 0x2af   :  { %1029 = vmatpush1.bf16.msra.mxu0 %v1009_v6  ;;  %1245 = vmatprep.subr.bf16.mxu1 %v2072_v40  ;;  %v1102_v62 = vpack.c.bf16 %v1100_v22, %v1098_v55  ;;  %v2078_v28 = vld [vmem:[%s2826_s11 + $0x84] ss:$8 sps:$4 sm:$0xff]   ;;  %v1882_v51 = vld.sshfl [vmem:[%s2828_s13] sm:$0x33 pattern:$0x76325410] }
 0x2b0   :  { %1030 = vmatprep.subr.bf16.mxu0 %v1008_v11  ;;  %v1003_v0 = vpack.c.bf16 %v983_v47, %v981_v29  ;;  %1861 = vmatprep.mubr.msk.bf16.mxu1 %vm175_vm0, %v1103_v53  ;;  %v1410_v32 = vcombine.high %v1882_v51, %v1882_v51  ;;  %v1417_v48 = vsel %vm1415_vm6, %v1882_v51, 0  ;;  %v2076_v10 = vld [vmem:[%s2826_s11 + $0x80] ss:$8 sps:$4 sm:$0xff]   ;;  %v2873_v6 = vmov 0.0   ;;  %v2085_v30 = vld [vmem:[%s2829_s14 + $0x10] sm:$0xff]   ;;  %v998_v17 = vld [vmem:[#allocation3 + $0x8] sm:$0xff] }
 0x2b1   :  { %v2079_v49 = vld [vmem:[%s2872_s18] sm:$0xff]   ;;  %v2082_v11 = vld [vmem:[%s2829_s14 + $0x28] sm:$0xff]  }
 0x2b2   :  { %1246 = vmatpush2.bf16.msra.mxu1 %v2070_v61  ;;  %v2083_v7 = vld [vmem:[%s2829_s14 + $0x20] sm:$0xff]   ;;  %v2086_v2 = vld [vmem:[%s2829_s14 + $0x8] sm:$0xff]  }
 0x2b3   :  { %1031 = vmatpush1.bf16.msra.mxu0 %v1007_v1  ;;  %1883 = vmatprep.subr.msk.bf16.mxu1 %vm1415_vm6, %v1410_v32  ;;  %v1000_v1 = vld [vmem:[#allocation3 + $0x18] sm:$0xff]  ;;  %v2087_v45 = vld [vmem:[%s2829_s14] sm:$0xff]  }
 0x2b4   :  { %1032 = vmatprep.subr.bf16.mxu0 %v1006_v36  ;;  %v2088_v27 = vld [vmem:[%s2829_s14 + $0x40] sm:$0xff]  }
 0x2b5   :  { %1248 = vmatmul.mubr.bf16.vlgmr.msra.gmra.mxu1 %v1102_v62  ;;  %v2089_v40 = vld [vmem:[%s2830_s15] sm:$0xff]  }
 0x2b6   :  { %1454 = vmatprep.mubr.bf16.mxu1 %v2871_v33  ;;  %1437 = vmatpush1.bf16.msra.mxu1 %v1417_v48 }
 0x2b7   :  { %1033 = vmatpush1.bf16.msra.mxu0 %v1005_v63  ;;  %1550 = vmatprep.subr.bf16.mxu1 %v2871_v33 }
 0x2b8   :  { %1034 = vmatprep.subr.bf16.mxu0 %v1004_v52 }
 0x2bb   :  { %1035 = vmatpush1.bf16.msra.mxu0 %v1003_v0 }
 0x2bc   :  { %1351 = vmatprep.subr.bf16.mxu0 %v2033_v57 }
 0x2bd   :  { %1884 = vmatmul.mubr.msk.bf16.vlgmr.msra.gmra.mxu1 %vm1411_vm7, %v2079_v49  ;;  %v1658_v49 = vld [vmem:[%s2817_s2] sm:$0x3] }
 0x2be   :  { %1842 = vmatmul.mubr.msk.bf16.vlgmr.msra.gmra.mxu0 %vm1016_vm5, %v2024_v54  ;;  %1551 = vmatpush1.bf16.msra.mxu1 %v2080_v8 }
 0x2bf   :  { %1352 = vmatpush1.bf16.msra.mxu0 %v2031_v21  ;;  %1552 = vmatprep.subr.bf16.mxu1 %v2871_v33 }
 0x2c0   :  { %1353 = vmatprep.subr.bf16.mxu0 %v2039_v13 }
 0x2c2   :  { %1553 = vmatpush1.bf16.msra.mxu1 %v2081_v37 }
 0x2c3   :  { %1354 = vmatpush1.bf16.msra.mxu0 %v2037_v24  ;;  %1554 = vmatprep.subr.bf16.mxu1 %v2871_v33 }
 0x2c4   :  { %1355 = vmatprep.subr.bf16.mxu0 %v2045_v9 }
 0x2c6   :  { %1555 = vmatpush1.bf16.msra.mxu1 %v2082_v11 }
 0x2c7   :  { %1356 = vmatpush1.bf16.msra.mxu0 %v2043_v15  ;;  %1556 = vmatprep.subr.bf16.mxu1 %v2871_v33 }
 0x2c8   :  { %1357 = vmatprep.subr.bf16.mxu0 %v2051_v59 }
 0x2ca   :  { %1557 = vmatpush1.bf16.msra.mxu1 %v2083_v7 }
 0x2cb   :  { %1358 = vmatpush1.bf16.msra.mxu0 %v2049_v46  ;;  %1558 = vmatprep.subr.bf16.mxu1 %v2871_v33 }
 0x2cc   :  { %1359 = vmatprep.subr.bf16.mxu0 %v2057_v42 }
 0x2ce   :  { %1559 = vmatpush1.bf16.msra.mxu1 %v2084_v18 }
 0x2cf   :  { %1360 = vmatpush1.bf16.msra.mxu0 %v2055_v50  ;;  %1560 = vmatprep.subr.bf16.mxu1 %v2871_v33 }
 0x2d0   :  { %1361 = vmatprep.subr.bf16.mxu0 %v2063_v25 }
 0x2d2   :  { %1561 = vmatpush1.bf16.msra.mxu1 %v2085_v30 }
 0x2d3   :  { %1362 = vmatpush1.bf16.msra.mxu0 %v2061_v43  ;;  %1562 = vmatprep.subr.bf16.mxu1 %v2871_v33 }
 0x2d4   :  { %1363 = vmatprep.subr.bf16.mxu0 %v2069_v23 }
 0x2d6   :  { %1563 = vmatpush1.bf16.msra.mxu1 %v2086_v2 }
 0x2d7   :  { %1364 = vmatpush1.bf16.msra.mxu0 %v2067_v44  ;;  %1564 = vmatprep.subr.bf16.mxu1 %v2871_v33 }
 0x2d8   :  { %1365 = vmatprep.subr.bf16.mxu0 %v2075_v20 }
 0x2da   :  { %1565 = vmatpush1.bf16.msra.mxu1 %v2087_v45 }
 0x2db   :  { %1366 = vmatpush1.bf16.msra.mxu0 %v2073_v14  ;;  %1580 = vmatprep.subr.bf16.mxu1 %v2871_v33 }
 0x2dc   :  { %1381 = vmatprep.subr.bf16.mxu0 %v2078_v28 }
 0x2de   :  { %1581 = vmatpush2.bf16.msra.mxu1 %v2088_v27 }
 0x2df   :  { %1382 = vmatpush2.bf16.msra.mxu0 %v2076_v10 }
 0x2e0   :  { %1907 = vmatprep.subr.bf16.mxu0 %v2873_v6 }
 0x375   :  { %v1249_v47 = vpop.f32.mrf.mxu1 }
 0x377   :  { %v1251_v63 = vpop.f32.mrf.mxu1 }
 0x379   :  { %v1253_v52 = vpop.f32.mrf.mxu1 }
 0x37b   :  { %v1255_v60 = vpop.f32.mrf.mxu1 }
 0x37d   :  { %v1456_v29 = vpop.f32.mrf.mxu1 }
 0x37e   :  { %v1054_v3 = vpop.f32.mrf.mxu0 }
 0x37f   :  { %v1458_v0 = vpop.f32.mrf.mxu1 }
 0x380   :  { %v1056_v26 = vpop.f32.mrf.mxu0 }
 0x381   :  { %v1064_v5 = vadd.f32 %v1056_v26, %v998_v17  ;;  %v1460_v15 = vpop.f32.mrf.mxu1 }
 0x382   :  { %v1058_v31 = vpop.f32.mrf.mxu0 }
 0x383   :  { %1068 = vst.msk [vmem:[#allocation3 + $0x8] sm:$0xff] %vm175_vm0, %v1064_v5  ;;  %v1078_v34 = vpack.c.bf16 %v1058_v31, %v1054_v3  ;;  %v1462_v38 = vpop.f32.mrf.mxu1 }
 0x384   :  { %v1060_v35 = vpop.f32.mrf.mxu0 }
 0x385   :  { %v1066_v36 = vadd.f32 %v1060_v35, %v1000_v1 }
 0x387   :  { %1070 = vst.msk [vmem:[#allocation3 + $0x18] sm:$0xff] %vm175_vm0, %v1066_v36 }
 0x38a   :  { %v1075_v19 = vld [vmem:[#allocation3 + $0x8] sm:$0xff] }
 0x38e   :  { %v1077_v39 = vld [vmem:[#allocation3 + $0x18] sm:$0xff] }
 0x38f   :  { %v1079_v16 = vpack.c.bf16 %v1077_v39, %v1075_v19 }
 0x391   :  { %1880 = vmatprep.mubr.msk.bf16.mxu0 %vm175_vm0, %v1079_v16 }
 0x392   :  { %1384 = vmatmul.mubr.bf16.vlgmr.msra.gmra.mxu0 %v1078_v34 }
 0x393   :  { %1908 = vmatpush3.bf16.msra.mxu0 %v2089_v40  ;;  %1909 = vmatprep.mubr.msk.bf16.mxu0 %vm2122_vm8, %v2873_v6 }
 0x394   :  { %1913 = vmatprep.subr.mxu0 %v2873_v6 }
 0x452   :  { %v1385_v57 = vpop.f32.mrf.mxu0 }
 0x453   :  { %v1386_v54 = vadd.f32 %v1385_v57, %v1249_v47 }
 0x454   :  { %v1387_v21 = vpop.f32.mrf.mxu0 }
 0x455   :  { %v1388_v13 = vadd.f32 %v1387_v21, %v1251_v63  ;;  %v1465_v24 = vadd.f32 %v1456_v29, %v1386_v54 }
 0x456   :  { %v1389_v9 = vpop.f32.mrf.mxu0 }
 0x457   :  { %1469 = vst [vmem:[#allocation4] sm:$0xff] %v1465_v24  ;;  %v1390_v59 = vadd.f32 %v1389_v9, %v1253_v52  ;;  %v1466_v46 = vadd.f32 %v1458_v0, %v1388_v13 }
 0x458   :  { %v1391_v41 = vpop.f32.mrf.mxu0 }
 0x459   :  { %1470 = vst.msk [vmem:[#allocation4 + $0x8] sm:$0xff] %vm175_vm0, %v1466_v46  ;;  %v1392_v12 = vadd.f32 %v1391_v41, %v1255_v60  ;;  %v1467_v42 = vadd.f32 %v1460_v15, %v1390_v59 }
 0x45b   :  { %1471 = vst [vmem:[#allocation4 + $0x10] sm:$0xff] %v1467_v42  ;;  %v1468_v50 = vadd.f32 %v1462_v38, %v1392_v12  ;;  %v1473_v25 = vpack.c.bf16 %v1467_v42, %v1465_v24 }
 0x45d   :  { %1472 = vst.msk [vmem:[#allocation4 + $0x18] sm:$0xff] %vm175_vm0, %v1468_v50  ;;  %v1474_v56 = vpack.c.bf16 %v1468_v50, %v1466_v46 }
 0x45f   :  { %1894 = vmatprep.mubr.msk.bf16.mxu1 %vm175_vm0, %v1474_v56 }
 0x460   :  { %1583 = vmatmul.mubr.bf16.vlgmr.msra.gmra.mxu1 %v1473_v25 }
 0x520   :  { %v1584_v43 = vpop.f32.mrf.mxu1 }
 0x521   :  { %v1895_v61 = vmul.f32 -1.442695, %v1584_v43 }
 0x522   :  { %v1586_v4 = vpop.f32.mrf.mxu1 }
 0x523   :  { %2090 = vpow2.f32 %v1895_v61 }
 0x524   :  { %v1587_v58 = vpop.f32.mrf.mxu1 }
 0x525   :  { %v1896_v53 = vmul.f32 -1.442695, %v1587_v58 }
 0x526   :  { %v1589_v55 = vpop.f32.mrf.mxu1 }
 0x527   :  { %2092 = vpow2.f32 %v1896_v53 }
 0x530   :  { %v2091_v22 = vpop.eup %2090 }
 0x531   :  { %v1597_v23 = vadd.f32 1.0, %v2091_v22 }
 0x533   :  { %2094 = vrcp.f32 %v1597_v23 }
 0x534   :  { %v2093_v62 = vpop.eup %2092 }
 0x535   :  { %v1598_v44 = vadd.f32 1.0, %v2093_v62 }
 0x537   :  { %2096 = vrcp.f32 %v1598_v44 }
 0x540   :  { %v2095_v14 = vpop.eup %2094 }
 0x541   :  { %v1603_v33 = vmul.f32 %v2095_v14, %v1584_v43 }
 0x544   :  { %v2097_v20 = vpop.eup %2096 }
 0x545   :  { %v1604_v28 = vmul.f32 %v2097_v20, %v1587_v58 }
 0x547   :  { %v1605_v51 = vpack.c.bf16 %v1604_v28, %v1603_v33 }
 0x549   :  { %1910 = vmatmul.mubr.msk.bf16.vlgmr.msra.gmra.mxu0 %vm175_vm0, %v1605_v51 }
 0x54a   :  { %1917 = vmatprep.mubr.msk.f32.mxu0 %vm2122_vm8, %v2873_v6 }
 0x609   :  { %v1651_v32 = vpop.f32.mrf.mxu0 }
 0x60b   :  { %v1911_v48 = vpop.f32.mrf.mxu0 }
 0x60d   :  { %v1654_v10 = vpop.f32.mrf.mxu0 }
 0x60e   :  { %1914 = vmatpush3.msra.mxu0 %v1654_v10 }
 0x60f   :  { %v1912_v8 = vpop.f32.mrf.mxu0  ;;  %1915 = vmatprep.subr.mxu0 %v2873_v6 }
 0x610   :  { %1916 = vmatpush3.msra.mxu0 %v1651_v32 }
 0x611   :  { %1918 = vmatmul.mubr.msk.f32.vlgmr.msra.gmra.mxu0 %vm175_vm0, %v1658_v49 }
 0x612   :  { %2109 = shalt.err (!%p2106_p4)
}
 0x613   :  { %s2124_s3 = smov 256   ;;  %s2125_s30 = smov 16   ;;  %vm1732_vm9 = vcmask 1024  }
 0x614   :  { %1745 = dma.vmem_to_hbm [thread:$0]  %s1740_s28, 512, %s2831_s16, [#allocation5], %s2124_s3, %s2124_s3, %s2125_s30  }
 0x6d1   :  { %v1728_v6 = vpop.f32.mrf.mxu0 }
 0x6d2   :  { %1733 = vst.msk [vmem:[%s2832_s17] sm:$0x3] %vm1732_vm9, %v1728_v6 }
 0x6d3   :  { %v1919_v37 = vpop.f32.mrf.mxu0 }
 0x6d4   :  { %2118 = dma.done.wait [#allocation5], 512  }
 0x6d5   :  { %2119 = vsyncadd [#allocation5], 4294966784 }
 0x6d6   :  { %1753 = vsyncpa [#allocation5], 1 }

</bundles_post_ra>
